<compile_context>
chip_gen: v7x
topology: tpu7x:2x2x1
jax: 0.10.0
libtpu: 0.0.40
codegen_flags: <defaults>
</compile_context>

<pallas_src>
import functools

import jax
import jax.numpy as jnp
from jax.experimental import pallas as pl
from jax.experimental.pallas import tpu as pltpu


def _round_up(x, m):
    return ((x + m - 1) // m) * m


def _pick_row_tile(n):
    """Node/row tile: 256 normally, 128 for small row counts (keeps >=2 grid
    steps when possible so v7x's two TensorCores both get work)."""
    return 256 if n > 256 else 128


def _pick_edge_tile(n):
    """Edge (reduction) tile for aggregation and row tile for the message MLP."""
    if n > 1024:
        return 512
    if n > 256:
        return 256
    return 128


# ----------------------------------------------------------------------------
# Fused 2-layer MLP kernels (bf16 MXU inputs, f32 accumulation, f32 tanh)
# ----------------------------------------------------------------------------
def _mlp2_kernel(x_ref, w1_ref, b1_ref, w2_ref, b2_ref, o_ref, *, final_tanh):
    """Linear -> tanh -> Linear (-> optional tanh)."""
    h = jnp.dot(x_ref[...], w1_ref[...], preferred_element_type=jnp.float32)
    h = jnp.tanh(h + b1_ref[...])
    y = jnp.dot(h.astype(jnp.bfloat16), w2_ref[...],
                preferred_element_type=jnp.float32) + b2_ref[...]
    if final_tanh:
        y = jnp.tanh(y)
    o_ref[...] = y.astype(o_ref.dtype)


def mlp2(x, w1, b1, w2, b2, *, final_tanh, row_tile, out_dtype=jnp.bfloat16):
    """Row-tiled fused 2-layer MLP over x (N, d_in); N % row_tile == 0."""
    n, d_in = x.shape
    d_h = w1.shape[1]
    d_out = w2.shape[1]
    assert n % row_tile == 0, (n, row_tile)

    # lane-dense output: pad second-layer weights to a 128-multiple width
    d_out_p = _round_up(d_out, 128)
    if d_out_p != d_out:
        w2 = jnp.pad(w2, ((0, 0), (0, d_out_p - d_out)))
        b2 = jnp.pad(b2, (0, d_out_p - d_out))

    out = pl.pallas_call(
        functools.partial(_mlp2_kernel, final_tanh=final_tanh),
        out_shape=jax.ShapeDtypeStruct((n, d_out_p), out_dtype),
        grid=(n // row_tile,),
        in_specs=[
            pl.BlockSpec((row_tile, d_in), lambda i: (i, 0)),
            pl.BlockSpec((d_in, d_h), lambda i: (0, 0)),
            pl.BlockSpec((1, d_h), lambda i: (0, 0)),
            pl.BlockSpec((d_h, d_out_p), lambda i: (0, 0)),
            pl.BlockSpec((1, d_out_p), lambda i: (0, 0)),
        ],
        out_specs=pl.BlockSpec((row_tile, d_out_p), lambda i: (i, 0)),
        compiler_params=pltpu.CompilerParams(dimension_semantics=("parallel",)),
    )(
        x.astype(jnp.bfloat16),
        w1.astype(jnp.bfloat16),
        b1.reshape(1, -1).astype(jnp.float32),
        w2.astype(jnp.bfloat16),
        b2.reshape(1, -1).astype(jnp.float32),
    )
    if d_out_p != d_out:
        out = out[:, :d_out]
    return out


def _mlp2_dual_kernel(x_ref, a_ref, w1x_ref, w1a_ref, b1_ref, w2_ref, b2_ref,
                      o_ref, *, final_tanh):
    """[x, a] @ W1 realized as x @ W1x + a @ W1a (no HBM concat of inputs)."""
    h = (jnp.dot(x_ref[...], w1x_ref[...], preferred_element_type=jnp.float32)
         + jnp.dot(a_ref[...], w1a_ref[...], preferred_element_type=jnp.float32))
    h = jnp.tanh(h + b1_ref[...])
    y = jnp.dot(h.astype(jnp.bfloat16), w2_ref[...],
                preferred_element_type=jnp.float32) + b2_ref[...]
    if final_tanh:
        y = jnp.tanh(y)
    o_ref[...] = y.astype(o_ref.dtype)


def mlp2_dual(x, a, w1, b1, w2, b2, *, final_tanh, row_tile,
              out_dtype=jnp.bfloat16):
    """Fused update MLP on (x, a) without materializing jnp.concatenate([x, a])."""
    n, dx = x.shape
    n2, da = a.shape
    assert n == n2 and n % row_tile == 0
    d_h = w1.shape[1]
    d_out = w2.shape[1]
    d_out_p = _round_up(d_out, 128)
    if d_out_p != d_out:
        w2 = jnp.pad(w2, ((0, 0), (0, d_out_p - d_out)))
        b2 = jnp.pad(b2, (0, d_out_p - d_out))

    out = pl.pallas_call(
        functools.partial(_mlp2_dual_kernel, final_tanh=final_tanh),
        out_shape=jax.ShapeDtypeStruct((n, d_out_p), out_dtype),
        grid=(n // row_tile,),
        in_specs=[
            pl.BlockSpec((row_tile, dx), lambda i: (i, 0)),
            pl.BlockSpec((row_tile, da), lambda i: (i, 0)),
            pl.BlockSpec((dx, d_h), lambda i: (0, 0)),
            pl.BlockSpec((da, d_h), lambda i: (0, 0)),
            pl.BlockSpec((1, d_h), lambda i: (0, 0)),
            pl.BlockSpec((d_h, d_out_p), lambda i: (0, 0)),
            pl.BlockSpec((1, d_out_p), lambda i: (0, 0)),
        ],
        out_specs=pl.BlockSpec((row_tile, d_out_p), lambda i: (i, 0)),
        compiler_params=pltpu.CompilerParams(dimension_semantics=("parallel",)),
    )(
        x.astype(jnp.bfloat16),
        a.astype(jnp.bfloat16),
        w1[:dx].astype(jnp.bfloat16),
        w1[dx:].astype(jnp.bfloat16),
        b1.reshape(1, -1).astype(jnp.float32),
        w2.astype(jnp.bfloat16),
        b2.reshape(1, -1).astype(jnp.float32),
    )
    if d_out_p != d_out:
        out = out[:, :d_out]
    return out


# ----------------------------------------------------------------------------
# Scatter-free mean aggregation (one-hot tile built in-kernel, bf16 MXU,
# f32 accumulator, empty edge tiles skipped via scalar-prefetched tile ranges)
# ----------------------------------------------------------------------------
def _clamped_k(i, k, lo_ref, hi_ref):
    lo = lo_ref[i]
    hi = jnp.maximum(hi_ref[i], lo)          # empty tile range: lo=0, hi=-1 -> 0
    return jnp.minimum(jnp.maximum(k, lo), hi)


def _dst_idx_map(i, k, lo_ref, hi_ref):
    return (0, _clamped_k(i, k, lo_ref, hi_ref))


def _msg_idx_map(i, k, lo_ref, hi_ref):
    return (_clamped_k(i, k, lo_ref, hi_ref), 0)


def _aggregate_kernel(lo_ref, hi_ref, dst_ref, msg_ref, invdeg_ref, o_ref, acc_ref):
    i = pl.program_id(0)
    k = pl.program_id(1)
    tm = acc_ref.shape[0]
    tk = dst_ref.shape[1]

    @pl.when(k == 0)
    def _():
        acc_ref[...] = jnp.zeros_like(acc_ref)

    # Only edge tiles in [lo_i, hi_i] can contain edges scattering into node
    # tile i (edges are sorted by destination); everything else is skipped and
    # its DMA suppressed by the clamped index_map.
    @pl.when(jnp.logical_and(k >= lo_ref[i], k <= hi_ref[i]))
    def _():
        node_ids = jax.lax.broadcasted_iota(jnp.int32, (tm, tk), 0) + i * tm
        # (tm, tk) one-hot scatter tile; sentinel dst (== n_nodes_pad) never matches.
        scatter = (node_ids == dst_ref[...]).astype(jnp.bfloat16)
        acc_ref[...] += jnp.dot(scatter, msg_ref[...],
                                preferred_element_type=jnp.float32)

    @pl.when(k == pl.num_programs(1) - 1)
    def _():
        o_ref[...] = (acc_ref[...] * invdeg_ref[...]).astype(o_ref.dtype)


def aggregate_mean(messages, es, n_nodes_pad):
    """Mean of messages per destination node; never materializes (N x E) scatter."""
    e_pad, d = messages.shape
    node_tile = es["node_tile"]
    edge_tile = es["edge_tile"]
    assert e_pad % edge_tile == 0 and n_nodes_pad % node_tile == 0
    dst2d = es["dst_s"].reshape(1, e_pad).astype(jnp.int32)

    grid_spec = pltpu.PrefetchScalarGridSpec(
        num_scalar_prefetch=2,
        grid=(n_nodes_pad // node_tile, e_pad // edge_tile),
        in_specs=[
            pl.BlockSpec((1, edge_tile), _dst_idx_map),
            pl.BlockSpec((edge_tile, d), _msg_idx_map),
            pl.BlockSpec((node_tile, 1), lambda i, k, lo, hi: (i, 0)),
        ],
        out_specs=pl.BlockSpec((node_tile, d), lambda i, k, lo, hi: (i, 0)),
        scratch_shapes=[pltpu.VMEM((node_tile, d), jnp.float32)],
    )
    return pl.pallas_call(
        _aggregate_kernel,
        out_shape=jax.ShapeDtypeStruct((n_nodes_pad, d), jnp.bfloat16),
        grid_spec=grid_spec,
        compiler_params=pltpu.CompilerParams(
            dimension_semantics=("parallel", "arbitrary")),
    )(es["lo"], es["hi"], dst2d, messages.astype(jnp.bfloat16), es["inv_deg"])


# ----------------------------------------------------------------------------
# Graph / edge-set preprocessing (done ONCE per forward, reused by all layers)
# ----------------------------------------------------------------------------
def _pad_rows(a, n_pad):
    return jnp.pad(a, ((0, n_pad - a.shape[0]), (0, 0)))


def _build_edge_set(src, dst, n_nodes_pad, node_tile, edge_tile):
    """Sort edges by destination, pad, and precompute per-node-tile edge-tile
    ranges plus inverse in-degree (all plain XLA, once per forward)."""
    src = src.astype(jnp.int32)
    dst = dst.astype(jnp.int32)
    e = src.shape[0]

    order = jnp.argsort(dst)
    src = src[order]
    dst = dst[order]

    e_pad = _round_up(max(e, edge_tile), edge_tile)
    pad = e_pad - e
    src_g = jnp.pad(src, (0, pad))                                # gather row 0
    dst_g = jnp.pad(dst, (0, pad))                                # gather row 0
    dst_s = jnp.pad(dst, (0, pad), constant_values=n_nodes_pad)   # never matches

    # inverse in-degree (zero-degree nodes -> 0, i.e. zero aggregated value)
    deg = jnp.zeros((n_nodes_pad,), jnp.float32).at[dst].add(1.0)
    inv_deg = jnp.where(deg > 0, 1.0 / jnp.maximum(deg, 1.0), 0.0).reshape(-1, 1)

    # per-node-tile [lo, hi] edge-tile ranges (edges are dst-sorted)
    n_tiles = n_nodes_pad // node_tile
    t_start = (jnp.arange(n_tiles) * node_tile).astype(jnp.int32)
    e_start = jnp.searchsorted(dst, t_start, side="left")
    e_end = jnp.searchsorted(dst, t_start + node_tile, side="left")
    lo = (e_start // edge_tile).astype(jnp.int32)
    hi = ((e_end - 1) // edge_tile).astype(jnp.int32)
    empty = e_end == e_start
    lo = jnp.where(empty, jnp.int32(0), lo)
    hi = jnp.where(empty, jnp.int32(-1), hi)

    return {
        "src": src_g, "dst_g": dst_g, "dst_s": dst_s,
        "inv_deg": inv_deg, "lo": lo, "hi": hi,
        "e_pad": e_pad, "node_tile": node_tile, "edge_tile": edge_tile,
    }


# ----------------------------------------------------------------------------
# GNN layers (graph gather glue in plain JAX; matmuls/reductions in Pallas)
# ----------------------------------------------------------------------------
def gnn_layer_internal(params, x, u, pos, es):
    src, dst_g = es["src"], es["dst_g"]
    pos_d = (pos[dst_g] - pos[src]).astype(jnp.bfloat16)   # diff in f32, store bf16
    msg_in = jnp.concatenate([x[dst_g], x[src], u[dst_g], u[src], pos_d], axis=-1)
    msg = mlp2(msg_in, *params["msg"], final_tanh=True, row_tile=es["edge_tile"])
    agg = aggregate_mean(msg, es, x.shape[0])
    return mlp2_dual(x, agg, *params["upd"], final_tanh=False,
                     row_tile=es["node_tile"])


def gnn_layer_external(params, x, ex_x, pos, ex_pos, es):
    src, dst_g = es["src"], es["dst_g"]
    pos_d = (pos[dst_g] - ex_pos[src]).astype(jnp.bfloat16)
    msg_in = jnp.concatenate([x[dst_g], ex_x[src], pos_d], axis=-1)
    msg = mlp2(msg_in, *params["msg"], final_tanh=True, row_tile=es["edge_tile"])
    agg = aggregate_mean(msg, es, x.shape[0])
    return mlp2_dual(x, agg, *params["upd"], final_tanh=False,
                     row_tile=es["node_tile"])


# ----------------------------------------------------------------------------
# Parameter construction (deterministic; weights stored bf16, biases f32)
# ----------------------------------------------------------------------------
def _linear(key, d_in, d_out):
    kw, kb = jax.random.split(key)
    lim = 1.0 / jnp.sqrt(jnp.float32(d_in))
    w = jax.random.uniform(kw, (d_in, d_out), jnp.float32, -lim, lim)
    b = jax.random.uniform(kb, (d_out,), jnp.float32, -lim, lim)
    return w.astype(jnp.bfloat16), b


def _mlp2_params(key, d_in, d_h, d_out):
    k1, k2 = jax.random.split(key)
    w1, b1 = _linear(k1, d_in, d_h)
    w2, b2 = _linear(k2, d_h, d_out)
    return (w1, b1, w2, b2)


def init_mpnn_params(key, n_passing, n_node_features_m, n_node_features_e,
                     n_out_features, hidden):
    keys = jax.random.split(key, 6 + n_passing)
    params = {}
    params["embedding"] = _mlp2_params(keys[0], n_node_features_m + 2, hidden, hidden)
    params["output"] = _mlp2_params(keys[1], hidden, hidden, n_out_features)
    ex_msg_in = hidden + n_node_features_e + 2
    params["gnn_ex_1"] = {
        "msg": _mlp2_params(keys[2], ex_msg_in, hidden, hidden),
        "upd": _mlp2_params(keys[3], hidden + hidden, hidden, hidden),
    }
    params["gnn_ex_2"] = {
        "msg": _mlp2_params(keys[4], ex_msg_in, hidden, hidden),
        "upd": _mlp2_params(keys[5], hidden + hidden, hidden, hidden),
    }
    in_msg_in = 2 * hidden + 2 * n_node_features_m + 2
    params["gnn_layers"] = []
    for i in range(n_passing):
        km, ku = jax.random.split(keys[6 + i])
        params["gnn_layers"].append({
            "msg": _mlp2_params(km, in_msg_in, hidden, hidden),
            "upd": _mlp2_params(ku, hidden + hidden, hidden, hidden),
        })
    return params


# ----------------------------------------------------------------------------
# MPNN forward
# ----------------------------------------------------------------------------
def mpnn_forward(params, madis_x, madis_lon, madis_lat, edge_index,
                 ex_lon, ex_lat, ex_x, edge_index_e2m, *,
                 n_passing, n_out_features):
    n_batch, n_stations_m, n_hours_m, n_features_m = madis_x.shape
    madis_x = madis_x.reshape(n_batch, n_stations_m, -1)

    # ---- build_graph_internal (padded once) ----
    n_nodes = n_batch * n_stations_m
    node_tile = _pick_row_tile(n_nodes)
    n_nodes_pad = _round_up(n_nodes, node_tile)

    u = _pad_rows(madis_x.reshape(n_nodes, -1).astype(jnp.bfloat16), n_nodes_pad)
    in_pos = _pad_rows(
        jnp.concatenate((madis_lon, madis_lat), axis=2)
        .reshape(n_nodes, -1).astype(jnp.float32),
        n_nodes_pad,
    )
    shift_m = (jnp.arange(n_batch, dtype=edge_index.dtype) * n_stations_m
               ).reshape(-1, 1, 1)
    ei = jnp.transpose(edge_index + shift_m, (1, 0, 2)).reshape(2, -1)  # (2, B*E)
    es_m = _build_edge_set(ei[0], ei[1], n_nodes_pad, node_tile,
                           _pick_edge_tile(ei.shape[1]))

    # ---- embedding MLP (Linear-tanh-Linear-tanh) ----
    emb_in = jnp.concatenate((u, in_pos.astype(jnp.bfloat16)), axis=-1)
    in_x = mlp2(emb_in, *params["embedding"], final_tanh=True, row_tile=node_tile)

    # ---- build_graph_external ----
    n_stations_e = ex_x.shape[1]
    n_ex = n_batch * n_stations_e
    ex_x_flat = ex_x.reshape(n_ex, -1).astype(jnp.bfloat16)
    ex_pos = jnp.concatenate(
        (ex_lon.reshape(n_batch, n_stations_e, 1),
         ex_lat.reshape(n_batch, n_stations_e, 1)), axis=2,
    ).reshape(n_ex, -1).astype(jnp.float32)
    ex_shift = jnp.arange(n_batch, dtype=edge_index_e2m.dtype) * n_stations_e
    m_shift = jnp.arange(n_batch, dtype=edge_index_e2m.dtype) * n_stations_m
    shift = jnp.stack((ex_shift, m_shift), axis=1)[:, :, None]   # (B, 2, 1)
    ei_e = jnp.transpose(edge_index_e2m + shift, (1, 0, 2)).reshape(2, -1)
    es_e = _build_edge_set(ei_e[0], ei_e[1], n_nodes_pad, node_tile,
                           _pick_edge_tile(ei_e.shape[1]))

    # ---- message passing ----
    in_x = gnn_layer_external(params["gnn_ex_1"], in_x, ex_x_flat, in_pos, ex_pos, es_e)
    for i in range(n_passing):
        in_x = gnn_layer_internal(params["gnn_layers"][i], in_x, u, in_pos, es_m)
    in_x = gnn_layer_external(params["gnn_ex_2"], in_x, ex_x_flat, in_pos, ex_pos, es_e)

    # ---- output MLP (Linear-tanh-Linear), f32 output ----
    out = mlp2(in_x, *params["output"], final_tanh=False, row_tile=node_tile,
               out_dtype=jnp.float32)
    return out[:n_nodes].reshape(n_batch, n_stations_m, n_out_features)


# ----------------------------------------------------------------------------
# Example run
# ----------------------------------------------------------------------------
if __name__ == "__main__":
    B = 2            # batch
    NM = 8           # madis stations
    NE = 6           # external stations
    N_HOURS = 4
    N_FEAT = 2
    N_NODE_FEATURES_M = N_HOURS * N_FEAT   # flattened per-node features
    N_NODE_FEATURES_E = 3
    HIDDEN = 128     # module default hidden_dim (lane-dense)
    N_OUT = 4
    N_PASSING = 2
    E_M = 12         # internal edges per graph
    E_E = 10         # external->madis edges per graph

    key = jax.random.PRNGKey(0)
    (k_par, k_mx, k_lon, k_lat, k_ei, k_exlon, k_exlat, k_exx, k_eie) = (
        jax.random.split(key, 9)
    )

    params = init_mpnn_params(
        k_par, N_PASSING, N_NODE_FEATURES_M, N_NODE_FEATURES_E, N_OUT, HIDDEN
    )

    madis_x = jax.random.normal(k_mx, (B, NM, N_HOURS, N_FEAT), jnp.float32)
    madis_lon = jax.random.normal(k_lon, (B, NM, 1), jnp.float32)
    madis_lat = jax.random.normal(k_lat, (B, NM, 1), jnp.float32)
    edge_index = jax.random.randint(k_ei, (B, 2, E_M), 0, NM, jnp.int32)
    ex_lon = jax.random.normal(k_exlon, (B, NE), jnp.float32)
    ex_lat = jax.random.normal(k_exlat, (B, NE), jnp.float32)
    ex_x = jax.random.normal(k_exx, (B, NE, N_NODE_FEATURES_E), jnp.float32)
    k_src, k_dst = jax.random.split(k_eie)
    edge_index_e2m = jnp.stack(
        (
            jax.random.randint(k_src, (B, E_E), 0, NE, jnp.int32),
            jax.random.randint(k_dst, (B, E_E), 0, NM, jnp.int32),
        ),
        axis=1,
    )  # (B, 2, E_E): row 0 -> external node, row 1 -> madis node

    fwd = jax.jit(
        functools.partial(mpnn_forward, n_passing=N_PASSING, n_out_features=N_OUT)
    )
    out = fwd(
        params, madis_x, madis_lon, madis_lat, edge_index,
        ex_lon, ex_lat, ex_x, edge_index_e2m,
    )
    out = jax.block_until_ready(out)
    assert out.shape == (B, NM, N_OUT)
    assert bool(jnp.all(jnp.isfinite(out)))
    print("KERNEL_OK")
</pallas_src>

<mosaic_0001>
module attributes {stable_mosaic.version = 11 : i64} {
  func.func @_mlp2_kernel(%arg0: i32, %arg1: memref<128x10xbf16, #tpu.memory_space<vmem>>, %arg2: memref<10x128xbf16, #tpu.memory_space<vmem>>, %arg3: memref<1x128xf32, #tpu.memory_space<vmem>>, %arg4: memref<128x128xbf16, #tpu.memory_space<vmem>>, %arg5: memref<1x128xf32, #tpu.memory_space<vmem>>, %arg6: memref<128x128xbf16, #tpu.memory_space<vmem>>) attributes {dimension_semantics = [#tpu.dimension_semantics<parallel>], iteration_bounds = array<i64: 1>, scalar_prefetch = 0 : i64, scratch_operands = 0 : i64, tpu.core_type = #tpu.core_type<tc>, window_params = [{transform_indices = @transform_0, window_bounds = array<i64: 128, 10>}, {pipeline_mode = #tpu.pipeline_mode<synchronous>, transform_indices = @transform_1, window_bounds = array<i64: 10, 128>}, {pipeline_mode = #tpu.pipeline_mode<synchronous>, transform_indices = @transform_2, window_bounds = array<i64: 1, 128>}, {pipeline_mode = #tpu.pipeline_mode<synchronous>, transform_indices = @transform_3, window_bounds = array<i64: 128, 128>}, {pipeline_mode = #tpu.pipeline_mode<synchronous>, transform_indices = @transform_4, window_bounds = array<i64: 1, 128>}, {transform_indices = @transform_5, window_bounds = array<i64: 128, 128>}]} {
    %c0 = arith.constant 0 : index
    %c0_0 = arith.constant 0 : index
    %0 = vector.load %arg1[%c0, %c0_0] : memref<128x10xbf16, #tpu.memory_space<vmem>>, vector<128x10xbf16>
    %c0_1 = arith.constant 0 : index
    %c0_2 = arith.constant 0 : index
    %1 = vector.load %arg2[%c0_1, %c0_2] : memref<10x128xbf16, #tpu.memory_space<vmem>>, vector<10x128xbf16>
    %cst = arith.constant dense<0.000000e+00> : vector<128x128xf32>
    %2 = tpu.matmul %0, %1, %cst {dimension_numbers = #tpu.dot_dimension_numbers<[1], [0], [0], [1], [0, 0, 1, 1], [], []>} : vector<128x10xbf16>, vector<10x128xbf16>, vector<128x128xf32> -> vector<128x128xf32>
    %c0_3 = arith.constant 0 : index
    %c0_4 = arith.constant 0 : index
    %3 = vector.load %arg3[%c0_3, %c0_4] : memref<1x128xf32, #tpu.memory_space<vmem>>, vector<1x128xf32>
    %4 = vector.broadcast %3 : vector<1x128xf32> to vector<128x128xf32>
    %5 = arith.addf %2, %4 : vector<128x128xf32>
    %6 = math.tanh %5 : vector<128x128xf32>
    %7 = arith.truncf %6 : vector<128x128xf32> to vector<128x128xbf16>
    %c0_5 = arith.constant 0 : index
    %c0_6 = arith.constant 0 : index
    %8 = vector.load %arg4[%c0_5, %c0_6] : memref<128x128xbf16, #tpu.memory_space<vmem>>, vector<128x128xbf16>
    %cst_7 = arith.constant dense<0.000000e+00> : vector<128x128xf32>
    %9 = tpu.matmul %7, %8, %cst_7 {dimension_numbers = #tpu.dot_dimension_numbers<[1], [0], [0], [1], [0, 0, 1, 1], [], []>} : vector<128x128xbf16>, vector<128x128xbf16>, vector<128x128xf32> -> vector<128x128xf32>
    %c0_8 = arith.constant 0 : index
    %c0_9 = arith.constant 0 : index
    %10 = vector.load %arg5[%c0_8, %c0_9] : memref<1x128xf32, #tpu.memory_space<vmem>>, vector<1x128xf32>
    %11 = vector.broadcast %10 : vector<1x128xf32> to vector<128x128xf32>
    %12 = arith.addf %9, %11 : vector<128x128xf32>
    %13 = math.tanh %12 : vector<128x128xf32>
    %14 = arith.truncf %13 : vector<128x128xf32> to vector<128x128xbf16>
    %c0_10 = arith.constant 0 : index
    %c0_11 = arith.constant 0 : index
    %15 = vector.load %arg6[%c0_10, %c0_11] : memref<128x128xbf16, #tpu.memory_space<vmem>>, vector<128x128xbf16>
    tpu.vector_store %arg6[%c0_10, %c0_11], %14 {strides = array<i32>} : memref<128x128xbf16, #tpu.memory_space<vmem>>, vector<128x128xbf16>,
    return
  }
  func.func @transform_0(%arg0: i32) -> (i32, i32) {
    %c0_i32 = arith.constant 0 : i32
    %c0_i32_0 = arith.constant 0 : i32
    return %arg0, %c0_i32 : i32, i32
  }
  func.func @transform_1(%arg0: i32) -> (i32, i32) {
    %c0_i32 = arith.constant 0 : i32
    %c0_i32_0 = arith.constant 0 : i32
    %c0_i32_1 = arith.constant 0 : i32
    return %c0_i32, %c0_i32_0 : i32, i32
  }
  func.func @transform_2(%arg0: i32) -> (i32, i32) {
    %c0_i32 = arith.constant 0 : i32
    %c0_i32_0 = arith.constant 0 : i32
    %c0_i32_1 = arith.constant 0 : i32
    return %c0_i32, %c0_i32_0 : i32, i32
  }
  func.func @transform_3(%arg0: i32) -> (i32, i32) {
    %c0_i32 = arith.constant 0 : i32
    %c0_i32_0 = arith.constant 0 : i32
    %c0_i32_1 = arith.constant 0 : i32
    return %c0_i32, %c0_i32_0 : i32, i32
  }
  func.func @transform_4(%arg0: i32) -> (i32, i32) {
    %c0_i32 = arith.constant 0 : i32
    %c0_i32_0 = arith.constant 0 : i32
    %c0_i32_1 = arith.constant 0 : i32
    return %c0_i32, %c0_i32_0 : i32, i32
  }
  func.func @transform_5(%arg0: i32) -> (i32, i32) {
    %c0_i32 = arith.constant 0 : i32
    %c0_i32_0 = arith.constant 0 : i32
    return %arg0, %c0_i32 : i32, i32
  }
}

module attributes {stable_mosaic.version = 11 : i64} {
  func.func @_mlp2_kernel(%arg0: i32, %arg1: memref<128x133xbf16, #tpu.memory_space<vmem>>, %arg2: memref<133x128xbf16, #tpu.memory_space<vmem>>, %arg3: memref<1x128xf32, #tpu.memory_space<vmem>>, %arg4: memref<128x128xbf16, #tpu.memory_space<vmem>>, %arg5: memref<1x128xf32, #tpu.memory_space<vmem>>, %arg6: memref<128x128xbf16, #tpu.memory_space<vmem>>) attributes {dimension_semantics = [#tpu.dimension_semantics<parallel>], iteration_bounds = array<i64: 1>, scalar_prefetch = 0 : i64, scratch_operands = 0 : i64, tpu.core_type = #tpu.core_type<tc>, window_params = [{transform_indices = @transform_0, window_bounds = array<i64: 128, 133>}, {pipeline_mode = #tpu.pipeline_mode<synchronous>, transform_indices = @transform_1, window_bounds = array<i64: 133, 128>}, {pipeline_mode = #tpu.pipeline_mode<synchronous>, transform_indices = @transform_2, window_bounds = array<i64: 1, 128>}, {pipeline_mode = #tpu.pipeline_mode<synchronous>, transform_indices = @transform_3, window_bounds = array<i64: 128, 128>}, {pipeline_mode = #tpu.pipeline_mode<synchronous>, transform_indices = @transform_4, window_bounds = array<i64: 1, 128>}, {transform_indices = @transform_5, window_bounds = array<i64: 128, 128>}]} {
    %c0 = arith.constant 0 : index
    %c0_0 = arith.constant 0 : index
    %0 = vector.load %arg1[%c0, %c0_0] : memref<128x133xbf16, #tpu.memory_space<vmem>>, vector<128x133xbf16>
    %c0_1 = arith.constant 0 : index
    %c0_2 = arith.constant 0 : index
    %1 = vector.load %arg2[%c0_1, %c0_2] : memref<133x128xbf16, #tpu.memory_space<vmem>>, vector<133x128xbf16>
    %cst = arith.constant dense<0.000000e+00> : vector<128x128xf32>
    %2 = tpu.matmul %0, %1, %cst {dimension_numbers = #tpu.dot_dimension_numbers<[1], [0], [0], [1], [0, 0, 1, 1], [], []>} : vector<128x133xbf16>, vector<133x128xbf16>, vector<128x128xf32> -> vector<128x128xf32>
    %c0_3 = arith.constant 0 : index
    %c0_4 = arith.constant 0 : index
    %3 = vector.load %arg3[%c0_3, %c0_4] : memref<1x128xf32, #tpu.memory_space<vmem>>, vector<1x128xf32>
    %4 = vector.broadcast %3 : vector<1x128xf32> to vector<128x128xf32>
    %5 = arith.addf %2, %4 : vector<128x128xf32>
    %6 = math.tanh %5 : vector<128x128xf32>
    %7 = arith.truncf %6 : vector<128x128xf32> to vector<128x128xbf16>
    %c0_5 = arith.constant 0 : index
    %c0_6 = arith.constant 0 : index
    %8 = vector.load %arg4[%c0_5, %c0_6] : memref<128x128xbf16, #tpu.memory_space<vmem>>, vector<128x128xbf16>
    %cst_7 = arith.constant dense<0.000000e+00> : vector<128x128xf32>
    %9 = tpu.matmul %7, %8, %cst_7 {dimension_numbers = #tpu.dot_dimension_numbers<[1], [0], [0], [1], [0, 0, 1, 1], [], []>} : vector<128x128xbf16>, vector<128x128xbf16>, vector<128x128xf32> -> vector<128x128xf32>
    %c0_8 = arith.constant 0 : index
    %c0_9 = arith.constant 0 : index
    %10 = vector.load %arg5[%c0_8, %c0_9] : memref<1x128xf32, #tpu.memory_space<vmem>>, vector<1x128xf32>
    %11 = vector.broadcast %10 : vector<1x128xf32> to vector<128x128xf32>
    %12 = arith.addf %9, %11 : vector<128x128xf32>
    %13 = math.tanh %12 : vector<128x128xf32>
    %14 = arith.truncf %13 : vector<128x128xf32> to vector<128x128xbf16>
    %c0_10 = arith.constant 0 : index
    %c0_11 = arith.constant 0 : index
    %15 = vector.load %arg6[%c0_10, %c0_11] : memref<128x128xbf16, #tpu.memory_space<vmem>>, vector<128x128xbf16>
    tpu.vector_store %arg6[%c0_10, %c0_11], %14 {strides = array<i32>} : memref<128x128xbf16, #tpu.memory_space<vmem>>, vector<128x128xbf16>,
    return
  }
  func.func @transform_0(%arg0: i32) -> (i32, i32) {
    %c0_i32 = arith.constant 0 : i32
    %c0_i32_0 = arith.constant 0 : i32
    return %arg0, %c0_i32 : i32, i32
  }
  func.func @transform_1(%arg0: i32) -> (i32, i32) {
    %c0_i32 = arith.constant 0 : i32
    %c0_i32_0 = arith.constant 0 : i32
    %c0_i32_1 = arith.constant 0 : i32
    return %c0_i32, %c0_i32_0 : i32, i32
  }
  func.func @transform_2(%arg0: i32) -> (i32, i32) {
    %c0_i32 = arith.constant 0 : i32
    %c0_i32_0 = arith.constant 0 : i32
    %c0_i32_1 = arith.constant 0 : i32
    return %c0_i32, %c0_i32_0 : i32, i32
  }
  func.func @transform_3(%arg0: i32) -> (i32, i32) {
    %c0_i32 = arith.constant 0 : i32
    %c0_i32_0 = arith.constant 0 : i32
    %c0_i32_1 = arith.constant 0 : i32
    return %c0_i32, %c0_i32_0 : i32, i32
  }
  func.func @transform_4(%arg0: i32) -> (i32, i32) {
    %c0_i32 = arith.constant 0 : i32
    %c0_i32_0 = arith.constant 0 : i32
    %c0_i32_1 = arith.constant 0 : i32
    return %c0_i32, %c0_i32_0 : i32, i32
  }
  func.func @transform_5(%arg0: i32) -> (i32, i32) {
    %c0_i32 = arith.constant 0 : i32
    %c0_i32_0 = arith.constant 0 : i32
    return %arg0, %c0_i32 : i32, i32
  }
}

module attributes {stable_mosaic.version = 11 : i64} {
  func.func @_aggregate_kernel(%arg0: i32, %arg1: i32, %arg2: memref<1xi32, #tpu.memory_space<smem>>, %arg3: memref<1xi32, #tpu.memory_space<smem>>, %arg4: memref<1x128xi32, #tpu.memory_space<vmem>>, %arg5: memref<128x128xbf16, #tpu.memory_space<vmem>>, %arg6: memref<128x1xf32, #tpu.memory_space<vmem>>, %arg7: memref<128x128xbf16, #tpu.memory_space<vmem>>, %arg8: memref<128x128xf32, #tpu.memory_space<vmem>>) attributes {dimension_semantics = [#tpu.dimension_semantics<parallel>, #tpu.dimension_semantics<arbitrary>], iteration_bounds = array<i64: 1, 1>, scalar_prefetch = 2 : i64, scratch_operands = 1 : i64, tpu.core_type = #tpu.core_type<tc>, window_params = [{transform_indices = @transform_0, window_bounds = array<i64: 1, 128>}, {transform_indices = @transform_1, window_bounds = array<i64: 128, 128>}, {transform_indices = @transform_2, window_bounds = array<i64: 128, 1>}, {transform_indices = @transform_3, window_bounds = array<i64: 128, 128>}]} {
    %c0_i32 = arith.constant 0 : i32
    %0 = arith.cmpi eq, %arg1, %c0_i32 : i32
    %1 = arith.extui %0 : i1 to i32
    %c0_i32_0 = arith.constant 0 : i32
    %2 = arith.cmpi ne, %1, %c0_i32_0 : i32
    scf.if %2 {
      %cst = arith.constant 0.000000e+00 : f32
      %15 = vector.broadcast %cst : f32 to vector<128x128xf32>
      %c0 = arith.constant 0 : index
      %c0_4 = arith.constant 0 : index
      %16 = vector.load %arg8[%c0, %c0_4] : memref<128x128xf32, #tpu.memory_space<vmem>>, vector<128x128xf32>
      tpu.vector_store %arg8[%c0, %c0_4], %15 {strides = array<i32>} : memref<128x128xf32, #tpu.memory_space<vmem>>, vector<128x128xf32>,
    } else {
    }
    %3 = arith.index_cast %arg0 : i32 to index
    %4 = memref.load %arg2[%3] : memref<1xi32, #tpu.memory_space<smem>>
    %5 = arith.cmpi sge, %arg1, %4 : i32
    %6 = arith.index_cast %arg0 : i32 to index
    %7 = memref.load %arg3[%6] : memref<1xi32, #tpu.memory_space<smem>>
    %8 = arith.cmpi sle, %arg1, %7 : i32
    %9 = arith.andi %5, %8 : i1
    %10 = arith.extui %9 : i1 to i32
    %c0_i32_1 = arith.constant 0 : i32
    %11 = arith.cmpi ne, %10, %c0_i32_1 : i32
    scf.if %11 {
      %15 = tpu.iota {dimensions = array<i32: 0>} : vector<128x128xi32>
      %c128_i32 = arith.constant 128 : i32
      %16 = arith.muli %arg0, %c128_i32 : i32
      %17 = vector.broadcast %16 : i32 to vector<128x128xi32>
      %18 = arith.addi %15, %17 : vector<128x128xi32>
      %c0 = arith.constant 0 : index
      %c0_4 = arith.constant 0 : index
      %19 = vector.load %arg4[%c0, %c0_4] : memref<1x128xi32, #tpu.memory_space<vmem>>, vector<1x128xi32>
      %20 = vector.broadcast %19 : vector<1x128xi32> to vector<128x128xi32>
      %21 = arith.cmpi eq, %18, %20 : vector<128x128xi32>
      %22 = arith.extui %21 : vector<128x128xi1> to vector<128x128xi32>
      %23 = arith.sitofp %22 : vector<128x128xi32> to vector<128x128xf32>
      %24 = arith.truncf %23 : vector<128x128xf32> to vector<128x128xbf16>
      %c0_5 = arith.constant 0 : index
      %c0_6 = arith.constant 0 : index
      %25 = vector.load %arg8[%c0_5, %c0_6] : memref<128x128xf32, #tpu.memory_space<vmem>>, vector<128x128xf32>
      %c0_7 = arith.constant 0 : index
      %c0_8 = arith.constant 0 : index
      %26 = vector.load %arg5[%c0_7, %c0_8] : memref<128x128xbf16, #tpu.memory_space<vmem>>, vector<128x128xbf16>
      %cst = arith.constant dense<0.000000e+00> : vector<128x128xf32>
      %27 = tpu.matmul %24, %26, %cst {dimension_numbers = #tpu.dot_dimension_numbers<[1], [0], [0], [1], [0, 0, 1, 1], [], []>} : vector<128x128xbf16>, vector<128x128xbf16>, vector<128x128xf32> -> vector<128x128xf32>
      %28 = arith.addf %25, %27 : vector<128x128xf32>
      %c0_9 = arith.constant 0 : index
      %c0_10 = arith.constant 0 : index
      %29 = vector.load %arg8[%c0_9, %c0_10] : memref<128x128xf32, #tpu.memory_space<vmem>>, vector<128x128xf32>
      tpu.vector_store %arg8[%c0_9, %c0_10], %28 {strides = array<i32>} : memref<128x128xf32, #tpu.memory_space<vmem>>, vector<128x128xf32>,
    } else {
    }
    %c0_i32_2 = arith.constant 0 : i32
    %12 = arith.cmpi eq, %arg1, %c0_i32_2 : i32
    %13 = arith.extui %12 : i1 to i32
    %c0_i32_3 = arith.constant 0 : i32
    %14 = arith.cmpi ne, %13, %c0_i32_3 : i32
    scf.if %14 {
      %c0 = arith.constant 0 : index
      %c0_4 = arith.constant 0 : index
      %15 = vector.load %arg8[%c0, %c0_4] : memref<128x128xf32, #tpu.memory_space<vmem>>, vector<128x128xf32>
      %c0_5 = arith.constant 0 : index
      %c0_6 = arith.constant 0 : index
      %16 = vector.load %arg6[%c0_5, %c0_6] : memref<128x1xf32, #tpu.memory_space<vmem>>, vector<128x1xf32>
      %17 = vector.broadcast %16 : vector<128x1xf32> to vector<128x128xf32>
      %18 = arith.mulf %15, %17 : vector<128x128xf32>
      %19 = arith.truncf %18 : vector<128x128xf32> to vector<128x128xbf16>
      %c0_7 = arith.constant 0 : index
      %c0_8 = arith.constant 0 : index
      %20 = vector.load %arg7[%c0_7, %c0_8] : memref<128x128xbf16, #tpu.memory_space<vmem>>, vector<128x128xbf16>
      tpu.vector_store %arg7[%c0_7, %c0_8], %19 {strides = array<i32>} : memref<128x128xbf16, #tpu.memory_space<vmem>>, vector<128x128xbf16>,
    } else {
    }
    return
  }
  func.func @transform_0(%arg0: i32, %arg1: i32, %arg2: memref<1xi32, #tpu.memory_space<smem>>, %arg3: memref<1xi32, #tpu.memory_space<smem>>) -> (i32, i32) {
    %0 = arith.index_cast %arg0 : i32 to index
    %1 = memref.load %arg2[%0] : memref<1xi32, #tpu.memory_space<smem>>
    %2 = arith.index_cast %arg0 : i32 to index
    %3 = memref.load %arg3[%2] : memref<1xi32, #tpu.memory_space<smem>>
    %4 = arith.maxsi %3, %1 : i32
    %5 = arith.maxsi %arg1, %1 : i32
    %6 = arith.minsi %5, %4 : i32
    %c0_i32 = arith.constant 0 : i32
    %c0_i32_0 = arith.constant 0 : i32
    return %c0_i32, %6 : i32, i32
  }
  func.func @transform_1(%arg0: i32, %arg1: i32, %arg2: memref<1xi32, #tpu.memory_space<smem>>, %arg3: memref<1xi32, #tpu.memory_space<smem>>) -> (i32, i32) {
    %0 = arith.index_cast %arg0 : i32 to index
    %1 = memref.load %arg2[%0] : memref<1xi32, #tpu.memory_space<smem>>
    %2 = arith.index_cast %arg0 : i32 to index
    %3 = memref.load %arg3[%2] : memref<1xi32, #tpu.memory_space<smem>>
    %4 = arith.maxsi %3, %1 : i32
    %5 = arith.maxsi %arg1, %1 : i32
    %6 = arith.minsi %5, %4 : i32
    %c0_i32 = arith.constant 0 : i32
    %c0_i32_0 = arith.constant 0 : i32
    return %6, %c0_i32 : i32, i32
  }
  func.func @transform_2(%arg0: i32, %arg1: i32, %arg2: memref<1xi32, #tpu.memory_space<smem>>, %arg3: memref<1xi32, #tpu.memory_space<smem>>) -> (i32, i32) {
    %c0_i32 = arith.constant 0 : i32
    %c0_i32_0 = arith.constant 0 : i32
    return %arg0, %c0_i32 : i32, i32
  }
  func.func @transform_3(%arg0: i32, %arg1: i32, %arg2: memref<1xi32, #tpu.memory_space<smem>>, %arg3: memref<1xi32, #tpu.memory_space<smem>>) -> (i32, i32) {
    %c0_i32 = arith.constant 0 : i32
    %c0_i32_0 = arith.constant 0 : i32
    return %arg0, %c0_i32 : i32, i32
  }
}

module attributes {stable_mosaic.version = 11 : i64} {
  func.func @_mlp2_dual_kernel(%arg0: i32, %arg1: memref<128x128xbf16, #tpu.memory_space<vmem>>, %arg2: memref<128x128xbf16, #tpu.memory_space<vmem>>, %arg3: memref<128x128xbf16, #tpu.memory_space<vmem>>, %arg4: memref<128x128xbf16, #tpu.memory_space<vmem>>, %arg5: memref<1x128xf32, #tpu.memory_space<vmem>>, %arg6: memref<128x128xbf16, #tpu.memory_space<vmem>>, %arg7: memref<1x128xf32, #tpu.memory_space<vmem>>, %arg8: memref<128x128xbf16, #tpu.memory_space<vmem>>) attributes {dimension_semantics = [#tpu.dimension_semantics<parallel>], iteration_bounds = array<i64: 1>, scalar_prefetch = 0 : i64, scratch_operands = 0 : i64, tpu.core_type = #tpu.core_type<tc>, window_params = [{transform_indices = @transform_0, window_bounds = array<i64: 128, 128>}, {transform_indices = @transform_1, window_bounds = array<i64: 128, 128>}, {pipeline_mode = #tpu.pipeline_mode<synchronous>, transform_indices = @transform_2, window_bounds = array<i64: 128, 128>}, {pipeline_mode = #tpu.pipeline_mode<synchronous>, transform_indices = @transform_3, window_bounds = array<i64: 128, 128>}, {pipeline_mode = #tpu.pipeline_mode<synchronous>, transform_indices = @transform_4, window_bounds = array<i64: 1, 128>}, {pipeline_mode = #tpu.pipeline_mode<synchronous>, transform_indices = @transform_5, window_bounds = array<i64: 128, 128>}, {pipeline_mode = #tpu.pipeline_mode<synchronous>, transform_indices = @transform_6, window_bounds = array<i64: 1, 128>}, {transform_indices = @transform_7, window_bounds = array<i64: 128, 128>}]} {
    %c0 = arith.constant 0 : index
    %c0_0 = arith.constant 0 : index
    %0 = vector.load %arg1[%c0, %c0_0] : memref<128x128xbf16, #tpu.memory_space<vmem>>, vector<128x128xbf16>
    %c0_1 = arith.constant 0 : index
    %c0_2 = arith.constant 0 : index
    %1 = vector.load %arg3[%c0_1, %c0_2] : memref<128x128xbf16, #tpu.memory_space<vmem>>, vector<128x128xbf16>
    %cst = arith.constant dense<0.000000e+00> : vector<128x128xf32>
    %2 = tpu.matmul %0, %1, %cst {dimension_numbers = #tpu.dot_dimension_numbers<[1], [0], [0], [1], [0, 0, 1, 1], [], []>} : vector<128x128xbf16>, vector<128x128xbf16>, vector<128x128xf32> -> vector<128x128xf32>
    %c0_3 = arith.constant 0 : index
    %c0_4 = arith.constant 0 : index
    %3 = vector.load %arg2[%c0_3, %c0_4] : memref<128x128xbf16, #tpu.memory_space<vmem>>, vector<128x128xbf16>
    %c0_5 = arith.constant 0 : index
    %c0_6 = arith.constant 0 : index
    %4 = vector.load %arg4[%c0_5, %c0_6] : memref<128x128xbf16, #tpu.memory_space<vmem>>, vector<128x128xbf16>
    %cst_7 = arith.constant dense<0.000000e+00> : vector<128x128xf32>
    %5 = tpu.matmul %3, %4, %cst_7 {dimension_numbers = #tpu.dot_dimension_numbers<[1], [0], [0], [1], [0, 0, 1, 1], [], []>} : vector<128x128xbf16>, vector<128x128xbf16>, vector<128x128xf32> -> vector<128x128xf32>
    %6 = arith.addf %2, %5 : vector<128x128xf32>
    %c0_8 = arith.constant 0 : index
    %c0_9 = arith.constant 0 : index
    %7 = vector.load %arg5[%c0_8, %c0_9] : memref<1x128xf32, #tpu.memory_space<vmem>>, vector<1x128xf32>
    %8 = vector.broadcast %7 : vector<1x128xf32> to vector<128x128xf32>
    %9 = arith.addf %6, %8 : vector<128x128xf32>
    %10 = math.tanh %9 : vector<128x128xf32>
    %11 = arith.truncf %10 : vector<128x128xf32> to vector<128x128xbf16>
    %c0_10 = arith.constant 0 : index
    %c0_11 = arith.constant 0 : index
    %12 = vector.load %arg6[%c0_10, %c0_11] : memref<128x128xbf16, #tpu.memory_space<vmem>>, vector<128x128xbf16>
    %cst_12 = arith.constant dense<0.000000e+00> : vector<128x128xf32>
    %13 = tpu.matmul %11, %12, %cst_12 {dimension_numbers = #tpu.dot_dimension_numbers<[1], [0], [0], [1], [0, 0, 1, 1], [], []>} : vector<128x128xbf16>, vector<128x128xbf16>, vector<128x128xf32> -> vector<128x128xf32>
    %c0_13 = arith.constant 0 : index
    %c0_14 = arith.constant 0 : index
    %14 = vector.load %arg7[%c0_13, %c0_14] : memref<1x128xf32, #tpu.memory_space<vmem>>, vector<1x128xf32>
    %15 = vector.broadcast %14 : vector<1x128xf32> to vector<128x128xf32>
    %16 = arith.addf %13, %15 : vector<128x128xf32>
    %17 = arith.truncf %16 : vector<128x128xf32> to vector<128x128xbf16>
    %c0_15 = arith.constant 0 : index
    %c0_16 = arith.constant 0 : index
    %18 = vector.load %arg8[%c0_15, %c0_16] : memref<128x128xbf16, #tpu.memory_space<vmem>>, vector<128x128xbf16>
    tpu.vector_store %arg8[%c0_15, %c0_16], %17 {strides = array<i32>} : memref<128x128xbf16, #tpu.memory_space<vmem>>, vector<128x128xbf16>,
    return
  }
  func.func @transform_0(%arg0: i32) -> (i32, i32) {
    %c0_i32 = arith.constant 0 : i32
    %c0_i32_0 = arith.constant 0 : i32
    return %arg0, %c0_i32 : i32, i32
  }
  func.func @transform_1(%arg0: i32) -> (i32, i32) {
    %c0_i32 = arith.constant 0 : i32
    %c0_i32_0 = arith.constant 0 : i32
    return %arg0, %c0_i32 : i32, i32
  }
  func.func @transform_2(%arg0: i32) -> (i32, i32) {
    %c0_i32 = arith.constant 0 : i32
    %c0_i32_0 = arith.constant 0 : i32
    %c0_i32_1 = arith.constant 0 : i32
    return %c0_i32, %c0_i32_0 : i32, i32
  }
  func.func @transform_3(%arg0: i32) -> (i32, i32) {
    %c0_i32 = arith.constant 0 : i32
    %c0_i32_0 = arith.constant 0 : i32
    %c0_i32_1 = arith.constant 0 : i32
    return %c0_i32, %c0_i32_0 : i32, i32
  }
  func.func @transform_4(%arg0: i32) -> (i32, i32) {
    %c0_i32 = arith.constant 0 : i32
    %c0_i32_0 = arith.constant 0 : i32
    %c0_i32_1 = arith.constant 0 : i32
    return %c0_i32, %c0_i32_0 : i32, i32
  }
  func.func @transform_5(%arg0: i32) -> (i32, i32) {
    %c0_i32 = arith.constant 0 : i32
    %c0_i32_0 = arith.constant 0 : i32
    %c0_i32_1 = arith.constant 0 : i32
    return %c0_i32, %c0_i32_0 : i32, i32
  }
  func.func @transform_6(%arg0: i32) -> (i32, i32) {
    %c0_i32 = arith.constant 0 : i32
    %c0_i32_0 = arith.constant 0 : i32
    %c0_i32_1 = arith.constant 0 : i32
    return %c0_i32, %c0_i32_0 : i32, i32
  }
  func.func @transform_7(%arg0: i32) -> (i32, i32) {
    %c0_i32 = arith.constant 0 : i32
    %c0_i32_0 = arith.constant 0 : i32
    return %arg0, %c0_i32 : i32, i32
  }
}

module attributes {stable_mosaic.version = 11 : i64} {
  func.func @_mlp2_kernel(%arg0: i32, %arg1: memref<128x274xbf16, #tpu.memory_space<vmem>>, %arg2: memref<274x128xbf16, #tpu.memory_space<vmem>>, %arg3: memref<1x128xf32, #tpu.memory_space<vmem>>, %arg4: memref<128x128xbf16, #tpu.memory_space<vmem>>, %arg5: memref<1x128xf32, #tpu.memory_space<vmem>>, %arg6: memref<128x128xbf16, #tpu.memory_space<vmem>>) attributes {dimension_semantics = [#tpu.dimension_semantics<parallel>], iteration_bounds = array<i64: 1>, scalar_prefetch = 0 : i64, scratch_operands = 0 : i64, tpu.core_type = #tpu.core_type<tc>, window_params = [{transform_indices = @transform_0, window_bounds = array<i64: 128, 274>}, {pipeline_mode = #tpu.pipeline_mode<synchronous>, transform_indices = @transform_1, window_bounds = array<i64: 274, 128>}, {pipeline_mode = #tpu.pipeline_mode<synchronous>, transform_indices = @transform_2, window_bounds = array<i64: 1, 128>}, {pipeline_mode = #tpu.pipeline_mode<synchronous>, transform_indices = @transform_3, window_bounds = array<i64: 128, 128>}, {pipeline_mode = #tpu.pipeline_mode<synchronous>, transform_indices = @transform_4, window_bounds = array<i64: 1, 128>}, {transform_indices = @transform_5, window_bounds = array<i64: 128, 128>}]} {
    %c0 = arith.constant 0 : index
    %c0_0 = arith.constant 0 : index
    %0 = vector.load %arg1[%c0, %c0_0] : memref<128x274xbf16, #tpu.memory_space<vmem>>, vector<128x274xbf16>
    %c0_1 = arith.constant 0 : index
    %c0_2 = arith.constant 0 : index
    %1 = vector.load %arg2[%c0_1, %c0_2] : memref<274x128xbf16, #tpu.memory_space<vmem>>, vector<274x128xbf16>
    %cst = arith.constant dense<0.000000e+00> : vector<128x128xf32>
    %2 = tpu.matmul %0, %1, %cst {dimension_numbers = #tpu.dot_dimension_numbers<[1], [0], [0], [1], [0, 0, 1, 1], [], []>} : vector<128x274xbf16>, vector<274x128xbf16>, vector<128x128xf32> -> vector<128x128xf32>
    %c0_3 = arith.constant 0 : index
    %c0_4 = arith.constant 0 : index
    %3 = vector.load %arg3[%c0_3, %c0_4] : memref<1x128xf32, #tpu.memory_space<vmem>>, vector<1x128xf32>
    %4 = vector.broadcast %3 : vector<1x128xf32> to vector<128x128xf32>
    %5 = arith.addf %2, %4 : vector<128x128xf32>
    %6 = math.tanh %5 : vector<128x128xf32>
    %7 = arith.truncf %6 : vector<128x128xf32> to vector<128x128xbf16>
    %c0_5 = arith.constant 0 : index
    %c0_6 = arith.constant 0 : index
    %8 = vector.load %arg4[%c0_5, %c0_6] : memref<128x128xbf16, #tpu.memory_space<vmem>>, vector<128x128xbf16>
    %cst_7 = arith.constant dense<0.000000e+00> : vector<128x128xf32>
    %9 = tpu.matmul %7, %8, %cst_7 {dimension_numbers = #tpu.dot_dimension_numbers<[1], [0], [0], [1], [0, 0, 1, 1], [], []>} : vector<128x128xbf16>, vector<128x128xbf16>, vector<128x128xf32> -> vector<128x128xf32>
    %c0_8 = arith.constant 0 : index
    %c0_9 = arith.constant 0 : index
    %10 = vector.load %arg5[%c0_8, %c0_9] : memref<1x128xf32, #tpu.memory_space<vmem>>, vector<1x128xf32>
    %11 = vector.broadcast %10 : vector<1x128xf32> to vector<128x128xf32>
    %12 = arith.addf %9, %11 : vector<128x128xf32>
    %13 = math.tanh %12 : vector<128x128xf32>
    %14 = arith.truncf %13 : vector<128x128xf32> to vector<128x128xbf16>
    %c0_10 = arith.constant 0 : index
    %c0_11 = arith.constant 0 : index
    %15 = vector.load %arg6[%c0_10, %c0_11] : memref<128x128xbf16, #tpu.memory_space<vmem>>, vector<128x128xbf16>
    tpu.vector_store %arg6[%c0_10, %c0_11], %14 {strides = array<i32>} : memref<128x128xbf16, #tpu.memory_space<vmem>>, vector<128x128xbf16>,
    return
  }
  func.func @transform_0(%arg0: i32) -> (i32, i32) {
    %c0_i32 = arith.constant 0 : i32
    %c0_i32_0 = arith.constant 0 : i32
    return %arg0, %c0_i32 : i32, i32
  }
  func.func @transform_1(%arg0: i32) -> (i32, i32) {
    %c0_i32 = arith.constant 0 : i32
    %c0_i32_0 = arith.constant 0 : i32
    %c0_i32_1 = arith.constant 0 : i32
    return %c0_i32, %c0_i32_0 : i32, i32
  }
  func.func @transform_2(%arg0: i32) -> (i32, i32) {
    %c0_i32 = arith.constant 0 : i32
    %c0_i32_0 = arith.constant 0 : i32
    %c0_i32_1 = arith.constant 0 : i32
    return %c0_i32, %c0_i32_0 : i32, i32
  }
  func.func @transform_3(%arg0: i32) -> (i32, i32) {
    %c0_i32 = arith.constant 0 : i32
    %c0_i32_0 = arith.constant 0 : i32
    %c0_i32_1 = arith.constant 0 : i32
    return %c0_i32, %c0_i32_0 : i32, i32
  }
  func.func @transform_4(%arg0: i32) -> (i32, i32) {
    %c0_i32 = arith.constant 0 : i32
    %c0_i32_0 = arith.constant 0 : i32
    %c0_i32_1 = arith.constant 0 : i32
    return %c0_i32, %c0_i32_0 : i32, i32
  }
  func.func @transform_5(%arg0: i32) -> (i32, i32) {
    %c0_i32 = arith.constant 0 : i32
    %c0_i32_0 = arith.constant 0 : i32
    return %arg0, %c0_i32 : i32, i32
  }
}

module attributes {stable_mosaic.version = 11 : i64} {
  func.func @_mlp2_kernel(%arg0: i32, %arg1: memref<128x128xbf16, #tpu.memory_space<vmem>>, %arg2: memref<128x128xbf16, #tpu.memory_space<vmem>>, %arg3: memref<1x128xf32, #tpu.memory_space<vmem>>, %arg4: memref<128x128xbf16, #tpu.memory_space<vmem>>, %arg5: memref<1x128xf32, #tpu.memory_space<vmem>>, %arg6: memref<128x128xf32, #tpu.memory_space<vmem>>) attributes {dimension_semantics = [#tpu.dimension_semantics<parallel>], iteration_bounds = array<i64: 1>, scalar_prefetch = 0 : i64, scratch_operands = 0 : i64, tpu.core_type = #tpu.core_type<tc>, window_params = [{transform_indices = @transform_0, window_bounds = array<i64: 128, 128>}, {pipeline_mode = #tpu.pipeline_mode<synchronous>, transform_indices = @transform_1, window_bounds = array<i64: 128, 128>}, {pipeline_mode = #tpu.pipeline_mode<synchronous>, transform_indices = @transform_2, window_bounds = array<i64: 1, 128>}, {pipeline_mode = #tpu.pipeline_mode<synchronous>, transform_indices = @transform_3, window_bounds = array<i64: 128, 128>}, {pipeline_mode = #tpu.pipeline_mode<synchronous>, transform_indices = @transform_4, window_bounds = array<i64: 1, 128>}, {transform_indices = @transform_5, window_bounds = array<i64: 128, 128>}]} {
    %c0 = arith.constant 0 : index
    %c0_0 = arith.constant 0 : index
    %0 = vector.load %arg1[%c0, %c0_0] : memref<128x128xbf16, #tpu.memory_space<vmem>>, vector<128x128xbf16>
    %c0_1 = arith.constant 0 : index
    %c0_2 = arith.constant 0 : index
    %1 = vector.load %arg2[%c0_1, %c0_2] : memref<128x128xbf16, #tpu.memory_space<vmem>>, vector<128x128xbf16>
    %cst = arith.constant dense<0.000000e+00> : vector<128x128xf32>
    %2 = tpu.matmul %0, %1, %cst {dimension_numbers = #tpu.dot_dimension_numbers<[1], [0], [0], [1], [0, 0, 1, 1], [], []>} : vector<128x128xbf16>, vector<128x128xbf16>, vector<128x128xf32> -> vector<128x128xf32>
    %c0_3 = arith.constant 0 : index
    %c0_4 = arith.constant 0 : index
    %3 = vector.load %arg3[%c0_3, %c0_4] : memref<1x128xf32, #tpu.memory_space<vmem>>, vector<1x128xf32>
    %4 = vector.broadcast %3 : vector<1x128xf32> to vector<128x128xf32>
    %5 = arith.addf %2, %4 : vector<128x128xf32>
    %6 = math.tanh %5 : vector<128x128xf32>
    %7 = arith.truncf %6 : vector<128x128xf32> to vector<128x128xbf16>
    %c0_5 = arith.constant 0 : index
    %c0_6 = arith.constant 0 : index
    %8 = vector.load %arg4[%c0_5, %c0_6] : memref<128x128xbf16, #tpu.memory_space<vmem>>, vector<128x128xbf16>
    %cst_7 = arith.constant dense<0.000000e+00> : vector<128x128xf32>
    %9 = tpu.matmul %7, %8, %cst_7 {dimension_numbers = #tpu.dot_dimension_numbers<[1], [0], [0], [1], [0, 0, 1, 1], [], []>} : vector<128x128xbf16>, vector<128x128xbf16>, vector<128x128xf32> -> vector<128x128xf32>
    %c0_8 = arith.constant 0 : index
    %c0_9 = arith.constant 0 : index
    %10 = vector.load %arg5[%c0_8, %c0_9] : memref<1x128xf32, #tpu.memory_space<vmem>>, vector<1x128xf32>
    %11 = vector.broadcast %10 : vector<1x128xf32> to vector<128x128xf32>
    %12 = arith.addf %9, %11 : vector<128x128xf32>
    %c0_10 = arith.constant 0 : index
    %c0_11 = arith.constant 0 : index
    %13 = vector.load %arg6[%c0_10, %c0_11] : memref<128x128xf32, #tpu.memory_space<vmem>>, vector<128x128xf32>
    tpu.vector_store %arg6[%c0_10, %c0_11], %12 {strides = array<i32>} : memref<128x128xf32, #tpu.memory_space<vmem>>, vector<128x128xf32>,
    return
  }
  func.func @transform_0(%arg0: i32) -> (i32, i32) {
    %c0_i32 = arith.constant 0 : i32
    %c0_i32_0 = arith.constant 0 : i32
    return %arg0, %c0_i32 : i32, i32
  }
  func.func @transform_1(%arg0: i32) -> (i32, i32) {
    %c0_i32 = arith.constant 0 : i32
    %c0_i32_0 = arith.constant 0 : i32
    %c0_i32_1 = arith.constant 0 : i32
    return %c0_i32, %c0_i32_0 : i32, i32
  }
  func.func @transform_2(%arg0: i32) -> (i32, i32) {
    %c0_i32 = arith.constant 0 : i32
    %c0_i32_0 = arith.constant 0 : i32
    %c0_i32_1 = arith.constant 0 : i32
    return %c0_i32, %c0_i32_0 : i32, i32
  }
  func.func @transform_3(%arg0: i32) -> (i32, i32) {
    %c0_i32 = arith.constant 0 : i32
    %c0_i32_0 = arith.constant 0 : i32
    %c0_i32_1 = arith.constant 0 : i32
    return %c0_i32, %c0_i32_0 : i32, i32
  }
  func.func @transform_4(%arg0: i32) -> (i32, i32) {
    %c0_i32 = arith.constant 0 : i32
    %c0_i32_0 = arith.constant 0 : i32
    %c0_i32_1 = arith.constant 0 : i32
    return %c0_i32, %c0_i32_0 : i32, i32
  }
  func.func @transform_5(%arg0: i32) -> (i32, i32) {
    %c0_i32 = arith.constant 0 : i32
    %c0_i32_0 = arith.constant 0 : i32
    return %arg0, %c0_i32 : i32, i32
  }
}

</mosaic_0001>

<bundles_post_ra>
// kernel: squeeze.10
= control target key start
LH: loop header
LB: loop body
LE: loop exit
PB: predicated region body
PF: predicated region fallthrough
CT: control target
= control target key end

     0   :  { %vm7_vm0 = vcmask 80896   ;;  %vm13_vm1 = vcmask 162896   ;;  %s39_s0 = inlined_call_operand.vmem [shape: s32[2,10], index: 0, kind: input, shape index: {}]   ;;  %s40_s1 = inlined_call_operand.vmem [shape: s32[20], index: 1, kind: output, shape index: {}]  }
   0x1   :  { %v4_v0 = vld [vmem:[%s39_s0] sm:$0x3]  ;;  %s22_s0 = smov 10  }
   0x2   :  { %5 = vst [vmem:[#allocation1] sm:$0x3] %v4_v0 }
   0x9   :  { %v10_v1 = vld [vmem:[#allocation1 + $0x1] sm:$0x1]   ;;  %v6_v2 = vld [vmem:[#allocation1] sm:$0x1]  }
   0xa   :  { %11 = vrot.lane.b32.xlu0 %v10_v1, %s22_s0  ;;  %8 = vst.msk [vmem:[#allocation0] sm:$0x1] %vm7_vm0, %v6_v2  }
  0x7c   :  { %v12_v3 = vpop.permute.xlu0 %11  }
  0x7d   :  { %14 = vst.msk [vmem:[#allocation0] sm:$0x1] %vm13_vm1, %v12_v3  }
  0x84   :  { %v18_v4 = vld [vmem:[#allocation0] sm:$0x1] }
  0x85   :  { %20 = vst [vmem:[%s40_s1] sm:$0x1] %v18_v4 }

// kernel: mpnn_forward.14
= control target key start
LH: loop header
LB: loop body
LE: loop exit
PB: predicated region body
PF: predicated region fallthrough
CT: control target
= control target key end

     0   :  { %vm116_vm0 = vcmask 1044480   ;;  %vm91_vm1 = vcmask 80896   ;;  %s925_s1 = inlined_call_operand.vmem [shape: bf16[10,128], index: 1, kind: input, shape index: {}]   ;;  %s926_s0 = inlined_call_operand.vmem [shape: bf16[128,10], index: 0, kind: input, shape index: {}]   ;;  %s927_s3 = inlined_call_operand.vmem [shape: bf16[128,128], index: 3, kind: input, shape index: {}]   ;;  %s928_s2 = inlined_call_operand.vmem [shape: f32[1,128], index: 2, kind: input, shape index: {}]   ;;  %s929_s4 = inlined_call_operand.vmem [shape: f32[1,128], index: 4, kind: input, shape index: {}]   ;;  %s930_s5 = inlined_call_operand.vmem [shape: bf16[128,128], index: 5, kind: output, shape index: {}]  }
   0x1   :  { %v707_v0 = vld [vmem:[%s925_s1] sm:$0x1f]   ;;  %v709_v3 = vld [vmem:[%s926_s0 + $0x8] sm:$0xff]   ;;  %v710_v4 = vld [vmem:[%s926_s0 + $0x10] sm:$0xff]  }
   0x2   :  { %v708_v1 = vld [vmem:[%s926_s0] sm:$0xff]   ;;  %706 = vmatprep.subr.msk.bf16.mxu0 %vm116_vm0, %v707_v0  ;;  %v118_v2 = vsel %vm116_vm0, %v707_v0, 0  ;;  %v711_v5 = vld [vmem:[%s926_s0 + $0x18] sm:$0xff]   ;;  %v717_v8 = vld [vmem:[%s927_s3 + $0x8] sm:$0xff]  }
   0x3   :  { %641 = vmatpush3.bf16.msra.mxu0 %v118_v2  ;;  %642 = vmatprep.mubr.msk.bf16.mxu0 %vm91_vm1, %v708_v1  ;;  %v712_v6 = vld [vmem:[%s926_s0 + $0x20] sm:$0xff]   ;;  %v718_v9 = vld [vmem:[%s927_s3 + $0x10] sm:$0xff]   ;;  %v713_v10 = vld [vmem:[%s926_s0 + $0x28] sm:$0xff]  }
   0x4   :  { %v716_v7 = vld [vmem:[%s927_s3] sm:$0xff]   ;;  %v714_v11 = vld [vmem:[%s926_s0 + $0x30] sm:$0xff]   ;;  %v715_v12 = vld [vmem:[%s926_s0 + $0x38] sm:$0xff]  }
   0x5   :  { %658 = vmatprep.subr.bf16.mxu0 %v716_v7  ;;  %690 = vmatprep.subr.bf16.mxu1 %v716_v7  ;;  %v719_v13 = vld [vmem:[%s927_s3 + $0x18] sm:$0xff]   ;;  %v720_v14 = vld [vmem:[%s927_s3 + $0x20] sm:$0xff]   ;;  %v721_v15 = vld [vmem:[%s927_s3 + $0x28] sm:$0xff]  }
   0x6   :  { %643 = vmatmul.mubr.msk.bf16.vlgmr.msra.gmra.mrb[0].mxu0 %vm91_vm1, %v709_v3  ;;  %698 = vmatpush3.bf16.msra.mxu1 %v716_v7  ;;  %v722_v16 = vld [vmem:[%s927_s3 + $0x30] sm:$0xff]   ;;  %v723_v17 = vld [vmem:[%s927_s3 + $0x38] sm:$0xff]   ;;  %v509_v18 = vld [vmem:[%s928_s2] ss:$0 sm:$0xff] }
   0x7   :  { %646 = vmatprep.mubr.msk.bf16.mxu0 %vm91_vm1, %v710_v4  ;;  %659 = vmatpush3.bf16.msra.mxu0 %v716_v7 }
   0x8   :  { %660 = vmatprep.subr.bf16.mxu0 %v717_v8  ;;  %691 = vmatprep.subr.bf16.mxu1 %v717_v8 }
   0xa   :  { %699 = vmatpush3.bf16.msra.mxu1 %v717_v8 }
   0xb   :  { %661 = vmatpush3.bf16.msra.mxu0 %v717_v8  ;;  %692 = vmatprep.subr.bf16.mxu1 %v718_v9 }
   0xc   :  { %662 = vmatprep.subr.bf16.mxu0 %v718_v9 }
   0xe   :  { %647 = vmatmul.mubr.msk.bf16.gmra.mrb[4].mxu0 %vm91_vm1, %v711_v5  ;;  %700 = vmatpush3.bf16.msra.mxu1 %v718_v9 }
   0xf   :  { %650 = vmatprep.mubr.msk.bf16.mxu0 %vm91_vm1, %v712_v6  ;;  %663 = vmatpush3.bf16.msra.mxu0 %v718_v9 }
  0x10   :  { %664 = vmatprep.subr.bf16.mxu0 %v719_v13  ;;  %693 = vmatprep.subr.bf16.mxu1 %v719_v13 }
  0x12   :  { %701 = vmatpush3.bf16.msra.mxu1 %v719_v13 }
  0x13   :  { %665 = vmatpush3.bf16.msra.mxu0 %v719_v13  ;;  %694 = vmatprep.subr.bf16.mxu1 %v720_v14 }
  0x14   :  { %666 = vmatprep.subr.bf16.mxu0 %v720_v14 }
  0x16   :  { %651 = vmatmul.mubr.msk.bf16.gmra.mrb[8].mxu0 %vm91_vm1, %v713_v10  ;;  %702 = vmatpush3.bf16.msra.mxu1 %v720_v14 }
  0x17   :  { %654 = vmatprep.mubr.msk.bf16.mxu0 %vm91_vm1, %v714_v11  ;;  %667 = vmatpush3.bf16.msra.mxu0 %v720_v14  ;;  %v883_v11 = vld [vmem:[%s929_s4] ss:$0 sm:$0xff] }
  0x18   :  { %668 = vmatprep.subr.bf16.mxu0 %v721_v15  ;;  %695 = vmatprep.subr.bf16.mxu1 %v721_v15 }
  0x1a   :  { %703 = vmatpush3.bf16.msra.mxu1 %v721_v15 }
  0x1b   :  { %669 = vmatpush3.bf16.msra.mxu0 %v721_v15  ;;  %696 = vmatprep.subr.bf16.mxu1 %v722_v16 }
  0x1c   :  { %670 = vmatprep.subr.bf16.mxu0 %v722_v16 }
  0x1e   :  { %655 = vmatmul.mubr.msk.bf16.gmra.mrb[12].mxu0 %vm91_vm1, %v715_v12  ;;  %704 = vmatpush3.bf16.msra.mxu1 %v722_v16 }
  0x1f   :  { %671 = vmatpush3.bf16.msra.mxu0 %v722_v16  ;;  %697 = vmatprep.subr.bf16.mxu1 %v723_v17 }
  0x20   :  { %672 = vmatprep.subr.bf16.mxu0 %v723_v17 }
  0x22   :  { %705 = vmatpush3.bf16.msra.mxu1 %v723_v17 }
  0x23   :  { %673 = vmatpush3.bf16.msra.mxu0 %v723_v17 }
  0xd9   :  { %v644_v19 = vpop.f32.mrb[0].mxu0 }
  0xda   :  { %v163_v20 = vadd.f32 %v644_v19, %v509_v18  ;;  %v154_v21 = vpop.f32.mrb[1].mxu0 }
  0xdb   :  { %v155_v22 = vadd.f32 %v509_v18, %v154_v21  ;;  %v645_v23 = vpop.f32.mrb[2].mxu0 }
  0xdc   :  { %724 = vtanh.f32 %v163_v20  ;;  %v166_v24 = vadd.f32 %v645_v23, %v509_v18  ;;  %v157_v25 = vpop.f32.mrb[3].mxu0 }
  0xdd   :  { %726 = vtanh.f32 %v155_v22  ;;  %v158_v26 = vadd.f32 %v509_v18, %v157_v25 }
  0xde   :  { %728 = vtanh.f32 %v166_v24 }
  0xdf   :  { %730 = vtanh.f32 %v158_v26 }
  0xe1   :  { %v648_v27 = vpop.f32.mrb[4].mxu0 }
  0xe2   :  { %v179_v28 = vadd.f32 %v648_v27, %v509_v18  ;;  %v170_v29 = vpop.f32.mrb[5].mxu0 }
  0xe3   :  { %v171_v30 = vadd.f32 %v509_v18, %v170_v29  ;;  %v649_v31 = vpop.f32.mrb[6].mxu0 }
  0xe4   :  { %732 = vtanh.f32 %v179_v28  ;;  %v182_v32 = vadd.f32 %v649_v31, %v509_v18  ;;  %v173_v33 = vpop.f32.mrb[7].mxu0 }
  0xe5   :  { %734 = vtanh.f32 %v171_v30  ;;  %v174_v34 = vadd.f32 %v509_v18, %v173_v33 }
  0xe6   :  { %v725_v35 = vpop.eup %724  ;;  %736 = vtanh.f32 %v182_v32 }
  0xe7   :  { %v727_v36 = vpop.eup %726  ;;  %738 = vtanh.f32 %v174_v34 }
  0xe8   :  { %v729_v37 = vpop.eup %728 }
  0xe9   :  { %v731_v38 = vpop.eup %730  ;;  %v652_v39 = vpop.f32.mrb[8].mxu0  ;;  %v234_v40 = vpack.c.bf16 %v729_v37, %v725_v35 }
  0xea   :  { %v195_v41 = vadd.f32 %v652_v39, %v509_v18  ;;  %v186_v42 = vpop.f32.mrb[9].mxu0  ;;  %v233_v43 = vpack.c.bf16 %v731_v38, %v727_v36 }
  0xeb   :  { %v187_v44 = vadd.f32 %v509_v18, %v186_v42  ;;  %v653_v45 = vpop.f32.mrb[10].mxu0 }
  0xec   :  { %740 = vtanh.f32 %v195_v41  ;;  %v198_v46 = vadd.f32 %v653_v45, %v509_v18  ;;  %v189_v47 = vpop.f32.mrb[11].mxu0  ;;  %674 = vmatprep.mubr.bf16.mxu0 %v233_v43 }
  0xed   :  { %742 = vtanh.f32 %v187_v44  ;;  %v190_v48 = vadd.f32 %v509_v18, %v189_v47  ;;  %675 = vmatmul.mubr.bf16.vlgmr.msra.gmra.mrb[16].mxu0 %v234_v40 }
  0xee   :  { %v733_v49 = vpop.eup %732  ;;  %744 = vtanh.f32 %v198_v46 }
  0xef   :  { %v735_v50 = vpop.eup %734  ;;  %746 = vtanh.f32 %v190_v48 }
  0xf0   :  { %v737_v51 = vpop.eup %736 }
  0xf1   :  { %v739_v52 = vpop.eup %738  ;;  %v656_v53 = vpop.f32.mrb[12].mxu0  ;;  %v236_v54 = vpack.c.bf16 %v737_v51, %v733_v49 }
  0xf2   :  { %v211_v55 = vadd.f32 %v656_v53, %v509_v18  ;;  %v202_v56 = vpop.f32.mrb[13].mxu0  ;;  %v235_v57 = vpack.c.bf16 %v739_v52, %v735_v50 }
  0xf3   :  { %v203_v58 = vadd.f32 %v509_v18, %v202_v56  ;;  %v657_v59 = vpop.f32.mrb[14].mxu0 }
  0xf4   :  { %748 = vtanh.f32 %v211_v55  ;;  %v214_v60 = vadd.f32 %v657_v59, %v509_v18  ;;  %v205_v61 = vpop.f32.mrb[15].mxu0  ;;  %678 = vmatprep.mubr.bf16.mxu1 %v235_v57 }
  0xf5   :  { %750 = vtanh.f32 %v203_v58  ;;  %v206_v62 = vadd.f32 %v509_v18, %v205_v61  ;;  %679 = vmatmul.mubr.bf16.vlgmr.msra.gmra.mrb[0].mxu1 %v236_v54 }
  0xf6   :  { %v741_v63 = vpop.eup %740  ;;  %752 = vtanh.f32 %v214_v60 }
  0xf7   :  { %v743_v0 = vpop.eup %742  ;;  %754 = vtanh.f32 %v206_v62 }
  0xf8   :  { %v745_v1 = vpop.eup %744 }
  0xf9   :  { %v747_v2 = vpop.eup %746  ;;  %v238_v3 = vpack.c.bf16 %v745_v1, %v741_v63 }
  0xfa   :  { %v237_v4 = vpack.c.bf16 %v747_v2, %v743_v0 }
  0xfc   :  { %682 = vmatprep.mubr.bf16.mxu1 %v237_v4 }
  0xfd   :  { %683 = vmatmul.mubr.bf16.gmra.mrb[4].mxu1 %v238_v3 }
  0xfe   :  { %v749_v5 = vpop.eup %748 }
  0xff   :  { %v751_v6 = vpop.eup %750 }
 0x100   :  { %v753_v7 = vpop.eup %752 }
 0x101   :  { %v755_v8 = vpop.eup %754  ;;  %v240_v9 = vpack.c.bf16 %v753_v7, %v749_v5 }
 0x102   :  { %v239_v10 = vpack.c.bf16 %v755_v8, %v751_v6 }
 0x104   :  { %686 = vmatprep.mubr.bf16.mxu1 %v239_v10 }
 0x105   :  { %687 = vmatmul.mubr.bf16.gmra.mrb[8].mxu1 %v240_v9 }
 0x1c0   :  { %v676_v12 = vpop.f32.mrb[16].mxu0 }
 0x1c1   :  { %v355_v13 = vadd.f32 %v676_v12, %v883_v11  ;;  %v346_v14 = vpop.f32.mrb[17].mxu0 }
 0x1c2   :  { %v347_v15 = vadd.f32 %v883_v11, %v346_v14  ;;  %v677_v16 = vpop.f32.mrb[18].mxu0 }
 0x1c3   :  { %756 = vtanh.f32 %v355_v13  ;;  %v358_v17 = vadd.f32 %v677_v16, %v883_v11  ;;  %v349_v18 = vpop.f32.mrb[19].mxu0 }
 0x1c4   :  { %758 = vtanh.f32 %v347_v15  ;;  %v350_v19 = vadd.f32 %v883_v11, %v349_v18 }
 0x1c5   :  { %760 = vtanh.f32 %v358_v17 }
 0x1c6   :  { %762 = vtanh.f32 %v350_v19 }
 0x1c8   :  { %v680_v20 = vpop.f32.mrb[0].mxu1 }
 0x1c9   :  { %v371_v21 = vadd.f32 %v680_v20, %v883_v11  ;;  %v362_v22 = vpop.f32.mrb[1].mxu1 }
 0x1ca   :  { %v363_v23 = vadd.f32 %v883_v11, %v362_v22  ;;  %v681_v24 = vpop.f32.mrb[2].mxu1 }
 0x1cb   :  { %764 = vtanh.f32 %v371_v21  ;;  %v374_v25 = vadd.f32 %v681_v24, %v883_v11  ;;  %v365_v26 = vpop.f32.mrb[3].mxu1 }
 0x1cc   :  { %766 = vtanh.f32 %v363_v23  ;;  %v366_v27 = vadd.f32 %v883_v11, %v365_v26 }
 0x1cd   :  { %v757_v28 = vpop.eup %756  ;;  %768 = vtanh.f32 %v374_v25 }
 0x1ce   :  { %v759_v29 = vpop.eup %758  ;;  %770 = vtanh.f32 %v366_v27 }
 0x1cf   :  { %v761_v30 = vpop.eup %760 }
 0x1d0   :  { %v763_v31 = vpop.eup %762  ;;  %v576_v32 = vpack.c.bf16 %v761_v30, %v757_v28  ;;  %v684_v33 = vpop.f32.mrb[4].mxu1 }
 0x1d1   :  { %v571_v34 = vpack.c.bf16 %v763_v31, %v759_v29  ;;  %v387_v35 = vadd.f32 %v684_v33, %v883_v11  ;;  %v378_v36 = vpop.f32.mrb[5].mxu1 }
 0x1d2   :  { %608 = vst [vmem:[%s930_s5 + $0x8] sm:$0xff] %v576_v32   ;;  %v379_v37 = vadd.f32 %v883_v11, %v378_v36  ;;  %v685_v38 = vpop.f32.mrb[6].mxu1 }
 0x1d3   :  { %572 = vst [vmem:[%s930_s5] sm:$0xff] %v571_v34   ;;  %772 = vtanh.f32 %v387_v35  ;;  %v390_v39 = vadd.f32 %v685_v38, %v883_v11  ;;  %v381_v40 = vpop.f32.mrb[7].mxu1 }
 0x1d4   :  { %774 = vtanh.f32 %v379_v37  ;;  %v382_v41 = vadd.f32 %v883_v11, %v381_v40 }
 0x1d5   :  { %v765_v42 = vpop.eup %764  ;;  %776 = vtanh.f32 %v390_v39 }
 0x1d6   :  { %v767_v43 = vpop.eup %766  ;;  %778 = vtanh.f32 %v382_v41 }
 0x1d7   :  { %v769_v44 = vpop.eup %768 }
 0x1d8   :  { %v771_v45 = vpop.eup %770  ;;  %v586_v46 = vpack.c.bf16 %v769_v44, %v765_v42  ;;  %v688_v47 = vpop.f32.mrb[8].mxu1 }
 0x1d9   :  { %v581_v48 = vpack.c.bf16 %v771_v45, %v767_v43  ;;  %v403_v49 = vadd.f32 %v688_v47, %v883_v11  ;;  %v394_v50 = vpop.f32.mrb[9].mxu1 }
 0x1da   :  { %610 = vst [vmem:[%s930_s5 + $0x18] sm:$0xff] %v586_v46   ;;  %v395_v51 = vadd.f32 %v883_v11, %v394_v50  ;;  %v689_v52 = vpop.f32.mrb[10].mxu1 }
 0x1db   :  { %609 = vst [vmem:[%s930_s5 + $0x10] sm:$0xff] %v581_v48   ;;  %780 = vtanh.f32 %v403_v49  ;;  %v406_v53 = vadd.f32 %v689_v52, %v883_v11  ;;  %v397_v54 = vpop.f32.mrb[11].mxu1 }
 0x1dc   :  { %782 = vtanh.f32 %v395_v51  ;;  %v398_v55 = vadd.f32 %v883_v11, %v397_v54 }
 0x1dd   :  { %v773_v56 = vpop.eup %772  ;;  %784 = vtanh.f32 %v406_v53 }
 0x1de   :  { %v775_v57 = vpop.eup %774  ;;  %786 = vtanh.f32 %v398_v55 }
 0x1df   :  { %v777_v58 = vpop.eup %776 }
 0x1e0   :  { %v779_v59 = vpop.eup %778  ;;  %v596_v60 = vpack.c.bf16 %v777_v58, %v773_v56 }
 0x1e1   :  { %v591_v61 = vpack.c.bf16 %v779_v59, %v775_v57 }
 0x1e2   :  { %612 = vst [vmem:[%s930_s5 + $0x28] sm:$0xff] %v596_v60  }
 0x1e3   :  { %611 = vst [vmem:[%s930_s5 + $0x20] sm:$0xff] %v591_v61  }
 0x1e5   :  { %v781_v62 = vpop.eup %780 }
 0x1e6   :  { %v783_v63 = vpop.eup %782 }
 0x1e7   :  { %v785_v0 = vpop.eup %784 }
 0x1e8   :  { %v787_v1 = vpop.eup %786  ;;  %v606_v2 = vpack.c.bf16 %v785_v0, %v781_v62 }
 0x1e9   :  { %v601_v3 = vpack.c.bf16 %v787_v1, %v783_v63 }
 0x1ea   :  { %614 = vst [vmem:[%s930_s5 + $0x38] sm:$0xff] %v606_v2  }
 0x1eb   :  { %613 = vst [vmem:[%s930_s5 + $0x30] sm:$0xff] %v601_v3  }

// kernel: mpnn_forward.15
= control target key start
LH: loop header
LB: loop body
LE: loop exit
PB: predicated region body
PF: predicated region fallthrough
CT: control target
= control target key end

     0   :  { %v882_v0 = vmov 0   ;;  %vm184_vm0 = vcmask 39936   ;;  %vm209_vm1 = vcmask 1041408   ;;  %vm210_vm2 = vcmask 1042432   ;;  %s1087_s1 = inlined_call_operand.vmem [shape: bf16[133,128], index: 1, kind: input, shape index: {}]   ;;  %s1088_s0 = inlined_call_operand.vmem [shape: bf16[128,133], index: 0, kind: input, shape index: {}]   ;;  %s1089_s3 = inlined_call_operand.vmem [shape: bf16[128,128], index: 3, kind: input, shape index: {}]   ;;  %s1090_s2 = inlined_call_operand.vmem [shape: f32[1,128], index: 2, kind: input, shape index: {}]   ;;  %s1091_s4 = inlined_call_operand.vmem [shape: f32[1,128], index: 4, kind: input, shape index: {}]   ;;  %s1092_s5 = inlined_call_operand.vmem [shape: bf16[128,128], index: 5, kind: output, shape index: {}]  }
   0x1   :  { %216 = vmatprep.subr.bf16.mxu0 %v882_v0  ;;  %v777_v1 = vld [vmem:[%s1087_s1] sm:$0xff]   ;;  %v778_v2 = vld [vmem:[%s1087_s1 + $0x8] sm:$0xff]   ;;  %v779_v3 = vld [vmem:[%s1087_s1 + $0x10] sm:$0xff]   ;;  %v883_v10 = vmov 65535  }
   0x2   :  { %217 = vmatpush1.bf16.msra.mxu0 %v777_v1  ;;  %v788_v4 = vld [vmem:[%s1088_s0 + $0x4] ss:$8 sps:$4 sm:$0xff]   ;;  %v780_v5 = vld [vmem:[%s1087_s1 + $0x18] sm:$0xff]   ;;  %v783_v9 = vld [vmem:[%s1087_s1 + $0x30] sm:$0xff]   ;;  %v211_v11 = vsel %vm209_vm1, 4294967295, %v883_v10 }
   0x3   :  { %218 = vmatprep.subr.bf16.mxu0 %v882_v0  ;;  %631 = vmatprep.mubr.msk.bf16.mxu0 %vm184_vm0, %v788_v4  ;;  %v781_v6 = vld [vmem:[%s1087_s1 + $0x20] sm:$0xff]   ;;  %v782_v7 = vld [vmem:[%s1087_s1 + $0x28] sm:$0xff]   ;;  %v784_v13 = vld [vmem:[%s1087_s1 + $0x38] sm:$0xff]   ;;  %v212_v15 = vsel %vm210_vm2, %v211_v11, 0 }
   0x4   :  { %v810_v8 = vld [vmem:[%s1089_s3] sm:$0xff]   ;;  %v811_v12 = vld [vmem:[%s1089_s3 + $0x8] sm:$0xff]   ;;  %v789_v18 = vld [vmem:[%s1088_s0 + $0x14] ss:$8 sps:$4 sm:$0xff]  }
   0x5   :  { %743 = vmatprep.subr.bf16.mxu1 %v810_v8  ;;  %v785_v14 = vld [vmem:[%s1087_s1 + $0x40] ss:$0 sps:$4 sm:$0x77]   ;;  %v791_v19 = vld [vmem:[%s1088_s0 + $0x10] ss:$8 sps:$4 sm:$0xff]   ;;  %v815_v35 = vld [vmem:[%s1089_s3 + $0x28] sm:$0xff]  }
   0x6   :  { %219 = vmatpush1.bf16.msra.mxu0 %v778_v2  ;;  %744 = vmatpush3.bf16.msra.mxu1 %v810_v8  ;;  %v214_v16 = vand.u32 %v785_v14, %v212_v15  ;;  %v786_v17 = vld [vmem:[%s1088_s0] ss:$8 sps:$4 sm:$0xff]   ;;  %v792_v20 = vld [vmem:[%s1088_s0 + $0x24] ss:$8 sps:$4 sm:$0xff]   ;;  %v795_v22 = vld [vmem:[%s1088_s0 + $0x34] ss:$8 sps:$4 sm:$0xff]  }
   0x7   :  { %220 = vmatprep.subr.bf16.mxu0 %v882_v0  ;;  %745 = vmatprep.subr.bf16.mxu1 %v811_v12  ;;  %v794_v21 = vld [vmem:[%s1088_s0 + $0x20] ss:$8 sps:$4 sm:$0xff]   ;;  %v797_v23 = vld [vmem:[%s1088_s0 + $0x30] ss:$8 sps:$4 sm:$0xff]   ;;  %v798_v24 = vld [vmem:[%s1088_s0 + $0x44] ss:$8 sps:$4 sm:$0xff]  }
   0x8   :  { %v800_v25 = vld [vmem:[%s1088_s0 + $0x40] ss:$8 sps:$4 sm:$0xff]   ;;  %v801_v26 = vld [vmem:[%s1088_s0 + $0x54] ss:$8 sps:$4 sm:$0xff]   ;;  %v803_v27 = vld [vmem:[%s1088_s0 + $0x50] ss:$8 sps:$4 sm:$0xff]  }
   0x9   :  { %v804_v28 = vld [vmem:[%s1088_s0 + $0x64] ss:$8 sps:$4 sm:$0xff]   ;;  %v806_v29 = vld [vmem:[%s1088_s0 + $0x60] ss:$8 sps:$4 sm:$0xff]   ;;  %v807_v30 = vld [vmem:[%s1088_s0 + $0x74] ss:$8 sps:$4 sm:$0xff]  }
   0xa   :  { %221 = vmatpush1.bf16.msra.mxu0 %v779_v3  ;;  %746 = vmatpush3.bf16.msra.mxu1 %v811_v12  ;;  %v809_v31 = vld [vmem:[%s1088_s0 + $0x70] ss:$8 sps:$4 sm:$0xff]   ;;  %v814_v34 = vld [vmem:[%s1089_s3 + $0x20] sm:$0xff]  }
   0xb   :  { %222 = vmatprep.subr.bf16.mxu0 %v882_v0  ;;  %v812_v32 = vld [vmem:[%s1089_s3 + $0x10] sm:$0xff]   ;;  %v813_v33 = vld [vmem:[%s1089_s3 + $0x18] sm:$0xff]   ;;  %v1024_v38 = vld [vmem:[%s1090_s2] ss:$0 sm:$0xff] }
   0xc   :  { %747 = vmatprep.subr.bf16.mxu1 %v812_v32  ;;  %v816_v36 = vld [vmem:[%s1089_s3 + $0x30] sm:$0xff]   ;;  %v817_v37 = vld [vmem:[%s1089_s3 + $0x38] sm:$0xff]  }
   0xe   :  { %223 = vmatpush1.bf16.msra.mxu0 %v780_v5  ;;  %748 = vmatpush3.bf16.msra.mxu1 %v812_v32 }
   0xf   :  { %224 = vmatprep.subr.bf16.mxu0 %v882_v0  ;;  %749 = vmatprep.subr.bf16.mxu1 %v813_v33 }
  0x12   :  { %225 = vmatpush1.bf16.msra.mxu0 %v781_v6  ;;  %750 = vmatpush3.bf16.msra.mxu1 %v813_v33 }
  0x13   :  { %226 = vmatprep.subr.bf16.mxu0 %v882_v0  ;;  %751 = vmatprep.subr.bf16.mxu1 %v814_v34 }
  0x16   :  { %227 = vmatpush1.bf16.msra.mxu0 %v782_v7  ;;  %752 = vmatpush3.bf16.msra.mxu1 %v814_v34 }
  0x17   :  { %228 = vmatprep.subr.bf16.mxu0 %v882_v0  ;;  %753 = vmatprep.subr.bf16.mxu1 %v815_v35 }
  0x1a   :  { %229 = vmatpush1.bf16.msra.mxu0 %v783_v9  ;;  %754 = vmatpush3.bf16.msra.mxu1 %v815_v35 }
  0x1b   :  { %230 = vmatprep.subr.bf16.mxu0 %v882_v0  ;;  %755 = vmatprep.subr.bf16.mxu1 %v816_v36 }
  0x1e   :  { %231 = vmatpush1.bf16.msra.mxu0 %v784_v13  ;;  %756 = vmatpush3.bf16.msra.mxu1 %v816_v36 }
  0x1f   :  { %232 = vmatprep.subr.bf16.mxu0 %v882_v0  ;;  %757 = vmatprep.subr.bf16.mxu1 %v817_v37 }
  0x22   :  { %233 = vmatpush1.bf16.msra.mxu0 %v214_v16  ;;  %758 = vmatpush3.bf16.msra.mxu1 %v817_v37 }
  0x25   :  { %249 = vmatmul.mubr.bf16.vlgmr.msra.gmra.mrb[0].mxu0 %v786_v17 }
  0x26   :  { %632 = vmatprep.mubr.msk.bf16.mxu0 %vm184_vm0, %v789_v18 }
  0x2d   :  { %257 = vmatmul.mubr.bf16.gmra.mrb[4].mxu0 %v791_v19 }
  0x2e   :  { %633 = vmatprep.mubr.msk.bf16.mxu0 %vm184_vm0, %v792_v20 }
  0x35   :  { %265 = vmatmul.mubr.bf16.gmra.mrb[8].mxu0 %v794_v21 }
  0x36   :  { %634 = vmatprep.mubr.msk.bf16.mxu0 %vm184_vm0, %v795_v22 }
  0x3d   :  { %273 = vmatmul.mubr.bf16.gmra.mrb[12].mxu0 %v797_v23 }
  0x3e   :  { %635 = vmatprep.mubr.msk.bf16.mxu0 %vm184_vm0, %v798_v24 }
  0x45   :  { %281 = vmatmul.mubr.bf16.gmra.mrb[16].mxu0 %v800_v25 }
  0x46   :  { %636 = vmatprep.mubr.msk.bf16.mxu0 %vm184_vm0, %v801_v26 }
  0x4d   :  { %289 = vmatmul.mubr.bf16.gmra.mrb[20].mxu0 %v803_v27 }
  0x4e   :  { %637 = vmatprep.mubr.msk.bf16.mxu0 %vm184_vm0, %v804_v28 }
  0x55   :  { %297 = vmatmul.mubr.bf16.gmra.mrb[24].mxu0 %v806_v29 }
  0x56   :  { %638 = vmatprep.mubr.msk.bf16.mxu0 %vm184_vm0, %v807_v30 }
  0x5d   :  { %305 = vmatmul.mubr.bf16.gmra.mrb[28].mxu0 %v809_v31 }
  0xf8   :  { %v250_v39 = vpop.f32.mrb[0].mxu0 }
  0xf9   :  { %v251_v40 = vadd.f32 %v1024_v38, %v250_v39  ;;  %v252_v41 = vpop.f32.mrb[1].mxu0 }
  0xfa   :  { %v253_v42 = vpop.f32.mrb[2].mxu0 }
  0xfb   :  { %v254_v43 = vadd.f32 %v1024_v38, %v253_v42  ;;  %v255_v44 = vpop.f32.mrb[3].mxu0  ;;  %818 = vtanh.f32 %v251_v40 }
  0xfd   :  { %820 = vtanh.f32 %v254_v43 }
 0x100   :  { %v258_v45 = vpop.f32.mrb[4].mxu0 }
 0x101   :  { %v259_v46 = vadd.f32 %v1024_v38, %v258_v45  ;;  %v260_v47 = vpop.f32.mrb[5].mxu0 }
 0x102   :  { %v261_v48 = vpop.f32.mrb[6].mxu0 }
 0x103   :  { %v262_v49 = vadd.f32 %v1024_v38, %v261_v48  ;;  %v263_v50 = vpop.f32.mrb[7].mxu0  ;;  %822 = vtanh.f32 %v259_v46  ;;  %v1045_v48 = vld [vmem:[%s1091_s4] ss:$0 sm:$0xff] }
 0x105   :  { %824 = vtanh.f32 %v262_v49  ;;  %v819_v51 = vpop.eup %818 }
 0x107   :  { %v821_v52 = vpop.eup %820 }
 0x108   :  { %v266_v53 = vpop.f32.mrb[8].mxu0  ;;  %v329_v54 = vpack.c.bf16 %v821_v52, %v819_v51 }
 0x109   :  { %v267_v55 = vadd.f32 %v1024_v38, %v266_v53  ;;  %v268_v56 = vpop.f32.mrb[9].mxu0 }
 0x10a   :  { %v269_v57 = vpop.f32.mrb[10].mxu0  ;;  %759 = vmatprep.mubr.bf16.mxu1 %v329_v54 }
 0x10b   :  { %v270_v58 = vadd.f32 %v1024_v38, %v269_v57  ;;  %v271_v59 = vpop.f32.mrb[11].mxu0  ;;  %826 = vtanh.f32 %v267_v55 }
 0x10d   :  { %828 = vtanh.f32 %v270_v58  ;;  %v823_v60 = vpop.eup %822 }
 0x10f   :  { %v825_v61 = vpop.eup %824 }
 0x110   :  { %v274_v62 = vpop.f32.mrb[12].mxu0  ;;  %v330_v63 = vpack.c.bf16 %v825_v61, %v823_v60 }
 0x111   :  { %v275_v0 = vadd.f32 %v1024_v38, %v274_v62  ;;  %v276_v1 = vpop.f32.mrb[13].mxu0 }
 0x112   :  { %v277_v2 = vpop.f32.mrb[14].mxu0  ;;  %760 = vmatmul.mubr.bf16.vlgmr.msra.gmra.mrb[0].mxu1 %v330_v63 }
 0x113   :  { %v278_v3 = vadd.f32 %v1024_v38, %v277_v2  ;;  %v279_v4 = vpop.f32.mrb[15].mxu0  ;;  %830 = vtanh.f32 %v275_v0 }
 0x115   :  { %832 = vtanh.f32 %v278_v3  ;;  %v827_v5 = vpop.eup %826 }
 0x117   :  { %v829_v6 = vpop.eup %828 }
 0x118   :  { %v282_v7 = vpop.f32.mrb[16].mxu0  ;;  %v331_v8 = vpack.c.bf16 %v829_v6, %v827_v5 }
 0x119   :  { %v283_v9 = vadd.f32 %v1024_v38, %v282_v7  ;;  %v284_v10 = vpop.f32.mrb[17].mxu0 }
 0x11a   :  { %v285_v11 = vpop.f32.mrb[18].mxu0  ;;  %763 = vmatprep.mubr.bf16.mxu1 %v331_v8 }
 0x11b   :  { %v286_v12 = vadd.f32 %v1024_v38, %v285_v11  ;;  %v287_v13 = vpop.f32.mrb[19].mxu0  ;;  %834 = vtanh.f32 %v283_v9 }
 0x11d   :  { %836 = vtanh.f32 %v286_v12  ;;  %v831_v14 = vpop.eup %830 }
 0x11f   :  { %v833_v15 = vpop.eup %832 }
 0x120   :  { %v290_v16 = vpop.f32.mrb[20].mxu0  ;;  %v332_v17 = vpack.c.bf16 %v833_v15, %v831_v14 }
 0x121   :  { %v291_v18 = vadd.f32 %v1024_v38, %v290_v16  ;;  %v292_v19 = vpop.f32.mrb[21].mxu0 }
 0x122   :  { %v293_v20 = vpop.f32.mrb[22].mxu0  ;;  %764 = vmatmul.mubr.bf16.gmra.mrb[4].mxu1 %v332_v17 }
 0x123   :  { %v294_v21 = vadd.f32 %v1024_v38, %v293_v20  ;;  %v295_v22 = vpop.f32.mrb[23].mxu0  ;;  %838 = vtanh.f32 %v291_v18 }
 0x125   :  { %840 = vtanh.f32 %v294_v21  ;;  %v835_v23 = vpop.eup %834 }
 0x127   :  { %v837_v24 = vpop.eup %836 }
 0x128   :  { %v298_v25 = vpop.f32.mrb[24].mxu0  ;;  %v333_v26 = vpack.c.bf16 %v837_v24, %v835_v23 }
 0x129   :  { %v299_v27 = vadd.f32 %v1024_v38, %v298_v25  ;;  %v300_v28 = vpop.f32.mrb[25].mxu0 }
 0x12a   :  { %v301_v29 = vpop.f32.mrb[26].mxu0  ;;  %767 = vmatprep.mubr.bf16.mxu1 %v333_v26 }
 0x12b   :  { %v302_v30 = vadd.f32 %v1024_v38, %v301_v29  ;;  %v303_v31 = vpop.f32.mrb[27].mxu0  ;;  %842 = vtanh.f32 %v299_v27 }
 0x12d   :  { %844 = vtanh.f32 %v302_v30  ;;  %v839_v32 = vpop.eup %838 }
 0x12f   :  { %v841_v33 = vpop.eup %840 }
 0x130   :  { %v306_v34 = vpop.f32.mrb[28].mxu0  ;;  %v334_v35 = vpack.c.bf16 %v841_v33, %v839_v32 }
 0x131   :  { %v307_v36 = vadd.f32 %v1024_v38, %v306_v34  ;;  %v308_v37 = vpop.f32.mrb[29].mxu0 }
 0x132   :  { %v309_v39 = vpop.f32.mrb[30].mxu0  ;;  %768 = vmatmul.mubr.bf16.gmra.mrb[8].mxu1 %v334_v35 }
 0x133   :  { %v310_v40 = vadd.f32 %v1024_v38, %v309_v39  ;;  %v311_v41 = vpop.f32.mrb[31].mxu0  ;;  %846 = vtanh.f32 %v307_v36 }
 0x135   :  { %848 = vtanh.f32 %v310_v40  ;;  %v843_v42 = vpop.eup %842 }
 0x137   :  { %v845_v43 = vpop.eup %844 }
 0x138   :  { %v335_v44 = vpack.c.bf16 %v845_v43, %v843_v42 }
 0x13a   :  { %771 = vmatprep.mubr.bf16.mxu1 %v335_v44 }
 0x13d   :  { %v847_v45 = vpop.eup %846 }
 0x13f   :  { %v849_v46 = vpop.eup %848 }
 0x140   :  { %v336_v47 = vpack.c.bf16 %v849_v46, %v847_v45 }
 0x142   :  { %772 = vmatmul.mubr.bf16.gmra.mrb[12].mxu1 %v336_v47 }
 0x1e5   :  { %v761_v49 = vpop.f32.mrb[0].mxu1 }
 0x1e6   :  { %v451_v50 = vadd.f32 %v761_v49, %v1045_v48  ;;  %v442_v38 = vpop.f32.mrb[1].mxu1 }
 0x1e7   :  { %v443_v51 = vadd.f32 %v1045_v48, %v442_v38  ;;  %v762_v52 = vpop.f32.mrb[2].mxu1 }
 0x1e8   :  { %850 = vtanh.f32 %v451_v50  ;;  %v454_v53 = vadd.f32 %v762_v52, %v1045_v48  ;;  %v445_v54 = vpop.f32.mrb[3].mxu1 }
 0x1e9   :  { %852 = vtanh.f32 %v443_v51  ;;  %v446_v55 = vadd.f32 %v1045_v48, %v445_v54 }
 0x1ea   :  { %854 = vtanh.f32 %v454_v53 }
 0x1eb   :  { %856 = vtanh.f32 %v446_v55 }
 0x1f2   :  { %v851_v56 = vpop.eup %850 }
 0x1f3   :  { %v853_v57 = vpop.eup %852 }
 0x1f4   :  { %v855_v58 = vpop.eup %854 }
 0x1f5   :  { %v857_v59 = vpop.eup %856  ;;  %v688_v60 = vpack.c.bf16 %v855_v58, %v851_v56  ;;  %v765_v61 = vpop.f32.mrb[4].mxu1 }
 0x1f6   :  { %v683_v62 = vpack.c.bf16 %v857_v59, %v853_v57  ;;  %v467_v63 = vadd.f32 %v765_v61, %v1045_v48  ;;  %v458_v0 = vpop.f32.mrb[5].mxu1 }
 0x1f7   :  { %720 = vst [vmem:[%s1092_s5 + $0x8] sm:$0xff] %v688_v60   ;;  %v459_v1 = vadd.f32 %v1045_v48, %v458_v0  ;;  %v766_v2 = vpop.f32.mrb[6].mxu1 }
 0x1f8   :  { %684 = vst [vmem:[%s1092_s5] sm:$0xff] %v683_v62   ;;  %858 = vtanh.f32 %v467_v63  ;;  %v470_v3 = vadd.f32 %v766_v2, %v1045_v48  ;;  %v461_v4 = vpop.f32.mrb[7].mxu1 }
 0x1f9   :  { %860 = vtanh.f32 %v459_v1  ;;  %v462_v5 = vadd.f32 %v1045_v48, %v461_v4 }
 0x1fa   :  { %862 = vtanh.f32 %v470_v3 }
 0x1fb   :  { %864 = vtanh.f32 %v462_v5 }
 0x202   :  { %v859_v6 = vpop.eup %858 }
 0x203   :  { %v861_v7 = vpop.eup %860 }
 0x204   :  { %v863_v8 = vpop.eup %862 }
 0x205   :  { %v865_v9 = vpop.eup %864  ;;  %v698_v10 = vpack.c.bf16 %v863_v8, %v859_v6  ;;  %v769_v11 = vpop.f32.mrb[8].mxu1 }
 0x206   :  { %v693_v12 = vpack.c.bf16 %v865_v9, %v861_v7  ;;  %v483_v13 = vadd.f32 %v769_v11, %v1045_v48  ;;  %v474_v14 = vpop.f32.mrb[9].mxu1 }
 0x207   :  { %722 = vst [vmem:[%s1092_s5 + $0x18] sm:$0xff] %v698_v10   ;;  %v475_v15 = vadd.f32 %v1045_v48, %v474_v14  ;;  %v770_v16 = vpop.f32.mrb[10].mxu1 }
 0x208   :  { %721 = vst [vmem:[%s1092_s5 + $0x10] sm:$0xff] %v693_v12   ;;  %866 = vtanh.f32 %v483_v13  ;;  %v486_v17 = vadd.f32 %v770_v16, %v1045_v48  ;;  %v477_v18 = vpop.f32.mrb[11].mxu1 }
 0x209   :  { %868 = vtanh.f32 %v475_v15  ;;  %v478_v19 = vadd.f32 %v1045_v48, %v477_v18 }
 0x20a   :  { %870 = vtanh.f32 %v486_v17 }
 0x20b   :  { %872 = vtanh.f32 %v478_v19 }
 0x212   :  { %v867_v20 = vpop.eup %866 }
 0x213   :  { %v869_v21 = vpop.eup %868 }
 0x214   :  { %v871_v22 = vpop.eup %870 }
 0x215   :  { %v873_v23 = vpop.eup %872  ;;  %v708_v24 = vpack.c.bf16 %v871_v22, %v867_v20  ;;  %v773_v25 = vpop.f32.mrb[12].mxu1 }
 0x216   :  { %v703_v26 = vpack.c.bf16 %v873_v23, %v869_v21  ;;  %v499_v27 = vadd.f32 %v773_v25, %v1045_v48  ;;  %v490_v28 = vpop.f32.mrb[13].mxu1 }
 0x217   :  { %724 = vst [vmem:[%s1092_s5 + $0x28] sm:$0xff] %v708_v24   ;;  %v491_v29 = vadd.f32 %v1045_v48, %v490_v28  ;;  %v774_v30 = vpop.f32.mrb[14].mxu1 }
 0x218   :  { %723 = vst [vmem:[%s1092_s5 + $0x20] sm:$0xff] %v703_v26   ;;  %874 = vtanh.f32 %v499_v27  ;;  %v502_v31 = vadd.f32 %v774_v30, %v1045_v48  ;;  %v493_v32 = vpop.f32.mrb[15].mxu1 }
 0x219   :  { %876 = vtanh.f32 %v491_v29  ;;  %v494_v33 = vadd.f32 %v1045_v48, %v493_v32 }
 0x21a   :  { %878 = vtanh.f32 %v502_v31 }
 0x21b   :  { %880 = vtanh.f32 %v494_v33 }
 0x222   :  { %v875_v34 = vpop.eup %874 }
 0x223   :  { %v877_v35 = vpop.eup %876 }
 0x224   :  { %v879_v36 = vpop.eup %878 }
 0x225   :  { %v881_v37 = vpop.eup %880  ;;  %v718_v39 = vpack.c.bf16 %v879_v36, %v875_v34 }
 0x226   :  { %v713_v40 = vpack.c.bf16 %v881_v37, %v877_v35 }
 0x227   :  { %726 = vst [vmem:[%s1092_s5 + $0x38] sm:$0xff] %v718_v39  }
 0x228   :  { %725 = vst [vmem:[%s1092_s5 + $0x30] sm:$0xff] %v713_v40  }

// kernel: mpnn_forward.16
= control target key start
LH: loop header
LB: loop body
LE: loop exit
PB: predicated region body
PF: predicated region fallthrough
CT: control target
= control target key end

     0   :  { %v885_v0 = vmov 0.0   ;;  %s1077_s0 = inlined_call_operand.<no memory space> [shape: s32[1], index: 0, kind: input, shape index: {}]   ;;  %s1078_s1 = inlined_call_operand.<no memory space> [shape: s32[1], index: 1, kind: input, shape index: {}]   ;;  %s1079_s4 = inlined_call_operand.vmem [shape: f32[128,1], index: 4, kind: input, shape index: {}]   ;;  %s1080_s5 = inlined_call_operand.vmem [shape: bf16[128,128], index: 5, kind: output, shape index: {}]   ;;  %s1081_s2 = inlined_call_operand.vmem [shape: s32[1,128], index: 2, kind: input, shape index: {}]   ;;  %s1082_s3 = inlined_call_operand.vmem [shape: bf16[128,128], index: 3, kind: input, shape index: {}]  }
   0x1   :  { %p85_p0 = scmp.gt.s32.totalorder %s1078_s1, %s1077_s0  ;;  %p682_p1 = scmp.lt.s32.totalorder %s1077_s0, 0  ;;  %129 = vst [vmem:[#allocation2] sm:$0xff] %v885_v0  ;;  %130 = vst [vmem:[#allocation2 + $0x8] sm:$0xff] %v885_v0 }
   0x2   :  { %131 = vst [vmem:[#allocation2 + $0x10] sm:$0xff] %v885_v0  ;;  %132 = vst [vmem:[#allocation2 + $0x18] sm:$0xff] %v885_v0  ;;  %p686_p2 = scmp.le.s32.totalorder %s1077_s0, 0  ;;  %p687_p3 = scmp.ge.s32.totalorder %s1078_s1, 0 }
   0x3   :  { %133 = vst [vmem:[#allocation2 + $0x20] sm:$0xff] %v885_v0  ;;  %134 = vst [vmem:[#allocation2 + $0x28] sm:$0xff] %v885_v0  ;;  %s1084_s1 = smov (!%p85_p0, %s1078_s1), %s1077_s0  ;;  %s1086_s0 = smov (%p682_p1, %s1077_s0), 0 }
   0x4   :  { %135 = vst [vmem:[#allocation2 + $0x30] sm:$0xff] %v885_v0  ;;  %136 = vst [vmem:[#allocation2 + $0x38] sm:$0xff] %v885_v0  ;;  %p149_p4 = pnand %p687_p3, %p686_p2  ;;  %p89_p5 = scmp.lt.s32.totalorder %s1086_s0, %s1084_s1 }
   0x5   :  { %137 = vst [vmem:[#allocation2 + $0x40] sm:$0xff] %v885_v0  ;;  %138 = vst [vmem:[#allocation2 + $0x48] sm:$0xff] %v885_v0  ;;  %v153_v2 = vlaneseq (!%p149_p4)  ;;  %v886_v12 = vmov (!%p149_p4), 1.0|1.0  }
   0x6   :  { %139 = vst [vmem:[#allocation2 + $0x50] sm:$0xff] %v885_v0  ;;  %140 = vst [vmem:[#allocation2 + $0x58] sm:$0xff] %v885_v0  ;;  %s1088_s0 = smov (!%p89_p5, %s1086_s0), %s1084_s1  ;;  %152 = sbr.rel (%p149_p4) target bundleno = 272 (0x110), region = 21 }
   0x7   :  { %141 = vst [vmem:[#allocation2 + $0x60] sm:$0xff] %v885_v0  ;;  %142 = vst [vmem:[#allocation2 + $0x68] sm:$0xff] %v885_v0  ;;  %p91_p6 = scmp.lt.s32.totalorder %s1088_s0, 0  ;;  %s684_s15 = sshll.u32 %s1088_s0, 4  ;;  %v963_v4 = vshrl.u32 (!%p149_p4), %v153_v2, 7 }
   0x8   :  { %143 = vst [vmem:[#allocation2 + $0x70] sm:$0xff] %v885_v0  ;;  %144 = vst [vmem:[#allocation2 + $0x78] sm:$0xff] %v885_v0  ;;  %p111_p7 = scmp.lt.s32.totalorder %s684_s15, 15  ;;  %v249_v30 = vld [vmem:[#allocation2] sm:$0xff] (!%p149_p4)  ;;  %v250_v40 = vld [vmem:[#allocation2 + $0x8] sm:$0xff] (!%p149_p4) }
   0x9   :  { %s1090_s0 = smov (!%p91_p6, %s1088_s0), 0  ;;  %v155_v6 = vadd.s32 (!%p149_p4), 8, %v963_v4  ;;  %v162_v7 = vadd.s32 (!%p149_p4), 64, %v963_v4  ;;  %v163_v8 = vadd.s32 (!%p149_p4), 72, %v963_v4  ;;  %v156_v15 = vadd.s32 (!%p149_p4), 16, %v963_v4  ;;  %v251_v28 = vld [vmem:[#allocation2 + $0x10] sm:$0xff] (!%p149_p4) }
   0xa   :  { %s1092_s15 = smov (!%p111_p7, %s684_s15), 15  ;;  %s93_s18 = scalar_lea.vmem %s1081_s2, %s1090_s0  ;;  %v157_v16 = vadd.s32 (!%p149_p4), 24, %v963_v4  ;;  %v164_v17 = vadd.s32 (!%p149_p4), 80, %v963_v4  ;;  %v165_v18 = vadd.s32 (!%p149_p4), 88, %v963_v4  ;;  %v158_v20 = vadd.s32 (!%p149_p4), 32, %v963_v4  ;;  %v252_v34 = vld [vmem:[#allocation2 + $0x18] sm:$0xff] (!%p149_p4) }
   0xb   :  { %s685_s19 = sshll.u32 %s1092_s15, 2  ;;  %v970_v10 = vld [vmem:[%s93_s18] ss:$0 sm:$0xff] (!%p149_p4)  ;;  %v159_v21 = vadd.s32 (!%p149_p4), 40, %v963_v4  ;;  %v166_v22 = vadd.s32 (!%p149_p4), 96, %v963_v4  ;;  %v167_v23 = vadd.s32 (!%p149_p4), 104, %v963_v4 }
   0xc   :  { %s959_s22 = scalar_lea.vmem %s1082_s3, %s685_s19  ;;  %vm193_vm0 = vcmp.eq.s32.totalorder (!%p149_p4), %v963_v4, %v970_v10  ;;  %vm194_vm1 = vcmp.eq.s32.totalorder (!%p149_p4), %v155_v6, %v970_v10  ;;  %vm201_vm2 = vcmp.eq.s32.totalorder (!%p149_p4), %v162_v7, %v970_v10  ;;  %vm202_vm3 = vcmp.eq.s32.totalorder (!%p149_p4), %v163_v8, %v970_v10  ;;  %v257_v31 = vld [vmem:[#allocation2 + $0x40] sm:$0xff] (!%p149_p4)  ;;  %v258_v41 = vld [vmem:[#allocation2 + $0x48] sm:$0xff] (!%p149_p4)  ;;  %v255_v52 = vld [vmem:[#allocation2 + $0x30] sm:$0xff] (!%p149_p4) }
   0xd   :  { %v875_v1 = vld [vmem:[%s959_s22] sm:$0xff]   ;;  %v876_v3 = vld [vmem:[%s959_s22 + $0x8] sm:$0xff]   ;;  %v877_v5 = vld [vmem:[%s959_s22 + $0x10] sm:$0xff]   ;;  %vm195_vm6 = vcmp.eq.s32.totalorder %v156_v15, %v970_v10  ;;  %vm196_vm7 = vcmp.eq.s32.totalorder %v157_v16, %v970_v10  ;;  %vm203_vm8 = vcmp.eq.s32.totalorder %v164_v17, %v970_v10  ;;  %vm204_vm9 = vcmp.eq.s32.totalorder %v165_v18, %v970_v10 }
   0xe   :  { %824 = vmatprep.subr.bf16.mxu0 %v875_v1  ;;  %856 = vmatprep.subr.bf16.mxu1 %v875_v1  ;;  %v878_v9 = vld [vmem:[%s959_s22 + $0x18] sm:$0xff]   ;;  %vm713_vm4 = vmpackc.low %vm194_vm1, %vm193_vm0  ;;  %v879_v11 = vld [vmem:[%s959_s22 + $0x20] sm:$0xff]   ;;  %vm197_vm10 = vcmp.eq.s32.totalorder %v158_v20, %v970_v10  ;;  %vm198_vm11 = vcmp.eq.s32.totalorder %v159_v21, %v970_v10  ;;  %vm205_vm13 = vcmp.eq.s32.totalorder %v166_v22, %v970_v10  ;;  %v160_v24 = vadd.s32 48, %v963_v4 }
   0xf   :  { %825 = vmatpush3.bf16.msra.mxu0 %v875_v1  ;;  %864 = vmatpush3.bf16.msra.mxu1 %v875_v1  ;;  %vm721_vm5 = vmpackc.low %vm202_vm3, %vm201_vm2  ;;  %v880_v13 = vld [vmem:[%s959_s22 + $0x28] sm:$0xff]   ;;  %v881_v14 = vld [vmem:[%s959_s22 + $0x30] sm:$0xff]   ;;  %vm206_vm14 = vcmp.eq.s32.totalorder %v167_v23, %v970_v10  ;;  %v161_v25 = vadd.s32 56, %v963_v4  ;;  %v168_v26 = vadd.s32 112, %v963_v4  ;;  %v169_v27 = vadd.s32 120, %v963_v4 }
  0x10   :  { %826 = vmatprep.subr.bf16.mxu0 %v876_v3  ;;  %857 = vmatprep.subr.bf16.mxu1 %v876_v3  ;;  %v882_v19 = vld [vmem:[%s959_s22 + $0x38] sm:$0xff]   ;;  %vm715_vm12 = vmpackc.low %vm196_vm7, %vm195_vm6  ;;  %vm199_vm2 = vcmp.eq.s32.totalorder %v160_v24, %v970_v10  ;;  %v259_v29 = vld [vmem:[#allocation2 + $0x50] sm:$0xff] }
  0x11   :  { %840 = vmatprep.mubr.msk.bf16.mxu0 %vm713_vm4, %v886_v12  ;;  %848 = vmatprep.mubr.msk.bf16.mxu1 %vm721_vm5, %v886_v12  ;;  %vm723_vm15 = vmpackc.low %vm204_vm9, %vm203_vm8  ;;  %vm200_vm3 = vcmp.eq.s32.totalorder %v161_v25, %v970_v10  ;;  %vm207_vm4 = vcmp.eq.s32.totalorder %v168_v26, %v970_v10  ;;  %vm208_vm5 = vcmp.eq.s32.totalorder %v169_v27, %v970_v10  ;;  %v260_v35 = vld [vmem:[#allocation2 + $0x58] sm:$0xff]  ;;  %v263_v53 = vld [vmem:[#allocation2 + $0x70] sm:$0xff] }
  0x12   :  { %vm717_vm0 = vmpackc.low %vm198_vm11, %vm197_vm10  ;;  %v253_v54 = vld [vmem:[#allocation2 + $0x20] sm:$0xff]  ;;  %v256_v58 = vld [vmem:[#allocation2 + $0x38] sm:$0xff] }
  0x13   :  { %827 = vmatpush3.bf16.msra.mxu0 %v876_v3  ;;  %865 = vmatpush3.bf16.msra.mxu1 %v876_v3  ;;  %vm725_vm1 = vmpackc.low %vm206_vm14, %vm205_vm13  ;;  %v261_v55 = vld [vmem:[#allocation2 + $0x60] sm:$0xff]  ;;  %v264_v59 = vld [vmem:[#allocation2 + $0x78] sm:$0xff] }
  0x14   :  { %828 = vmatprep.subr.bf16.mxu0 %v877_v5  ;;  %858 = vmatprep.subr.bf16.mxu1 %v877_v5  ;;  %vm719_vm6 = vmpackc.low %vm200_vm3, %vm199_vm2  ;;  %v254_v0 = vld [vmem:[#allocation2 + $0x28] sm:$0xff] }
  0x15   :  { %vm727_vm7 = vmpackc.low %vm208_vm5, %vm207_vm4  ;;  %v262_v1 = vld [vmem:[#allocation2 + $0x68] sm:$0xff] }
  0x17   :  { %829 = vmatpush3.bf16.msra.mxu0 %v877_v5  ;;  %866 = vmatpush3.bf16.msra.mxu1 %v877_v5 }
  0x18   :  { %830 = vmatprep.subr.bf16.mxu0 %v878_v9  ;;  %859 = vmatprep.subr.bf16.mxu1 %v878_v9 }
  0x1b   :  { %831 = vmatpush3.bf16.msra.mxu0 %v878_v9  ;;  %867 = vmatpush3.bf16.msra.mxu1 %v878_v9 }
  0x1c   :  { %832 = vmatprep.subr.bf16.mxu0 %v879_v11  ;;  %860 = vmatprep.subr.bf16.mxu1 %v879_v11 }
  0x1f   :  { %833 = vmatpush3.bf16.msra.mxu0 %v879_v11  ;;  %868 = vmatpush3.bf16.msra.mxu1 %v879_v11 }
  0x20   :  { %834 = vmatprep.subr.bf16.mxu0 %v880_v13  ;;  %861 = vmatprep.subr.bf16.mxu1 %v880_v13 }
  0x23   :  { %835 = vmatpush3.bf16.msra.mxu0 %v880_v13  ;;  %869 = vmatpush3.bf16.msra.mxu1 %v880_v13 }
  0x24   :  { %836 = vmatprep.subr.bf16.mxu0 %v881_v14  ;;  %862 = vmatprep.subr.bf16.mxu1 %v881_v14 }
  0x27   :  { %837 = vmatpush3.bf16.msra.mxu0 %v881_v14  ;;  %870 = vmatpush3.bf16.msra.mxu1 %v881_v14 }
  0x28   :  { %838 = vmatprep.subr.bf16.mxu0 %v882_v19  ;;  %863 = vmatprep.subr.bf16.mxu1 %v882_v19 }
  0x2b   :  { %839 = vmatpush3.bf16.msra.mxu0 %v882_v19  ;;  %871 = vmatpush3.bf16.msra.mxu1 %v882_v19 }
  0x2e   :  { %841 = vmatmul.mubr.msk.bf16.vlgmr.msra.gmra.mrb[0].mxu0 %vm715_vm12, %v886_v12  ;;  %849 = vmatmul.mubr.msk.bf16.vlgmr.msra.gmra.mrb[0].mxu1 %vm723_vm15, %v886_v12 }
  0x2f   :  { %844 = vmatprep.mubr.msk.bf16.mxu0 %vm717_vm0, %v886_v12  ;;  %852 = vmatprep.mubr.msk.bf16.mxu1 %vm725_vm1, %v886_v12 }
  0x36   :  { %845 = vmatmul.mubr.msk.bf16.gmra.mrb[4].mxu0 %vm719_vm6, %v886_v12  ;;  %853 = vmatmul.mubr.msk.bf16.gmra.mrb[4].mxu1 %vm727_vm7, %v886_v12 }
 0x101   :  { %v842_v32 = vpop.f32.mrb[0].mxu0  ;;  %v850_v33 = vpop.f32.mrb[0].mxu1 }
 0x102   :  { %v428_v36 = vadd.f32 %v842_v32, %v251_v28  ;;  %v436_v37 = vadd.f32 %v850_v33, %v259_v29  ;;  %v363_v38 = vpop.f32.mrb[1].mxu0  ;;  %v395_v39 = vpop.f32.mrb[1].mxu1 }
 0x103   :  { %v426_v42 = vadd.f32 %v363_v38, %v249_v30  ;;  %v434_v43 = vadd.f32 %v395_v39, %v257_v31  ;;  %v843_v44 = vpop.f32.mrb[2].mxu0  ;;  %v851_v45 = vpop.f32.mrb[2].mxu1 }
 0x104   :  { %444 = vst [vmem:[#allocation2 + $0x10] sm:$0xff] %v428_v36  ;;  %452 = vst [vmem:[#allocation2 + $0x50] sm:$0xff] %v436_v37  ;;  %v429_v46 = vadd.f32 %v843_v44, %v252_v34  ;;  %v437_v47 = vadd.f32 %v851_v45, %v260_v35  ;;  %v366_v48 = vpop.f32.mrb[3].mxu0  ;;  %v398_v49 = vpop.f32.mrb[3].mxu1 }
 0x105   :  { %442 = vst [vmem:[#allocation2] sm:$0xff] %v426_v42  ;;  %450 = vst [vmem:[#allocation2 + $0x40] sm:$0xff] %v434_v43  ;;  %v427_v50 = vadd.f32 %v366_v48, %v250_v40  ;;  %v435_v51 = vadd.f32 %v398_v49, %v258_v41 }
 0x106   :  { %445 = vst [vmem:[#allocation2 + $0x18] sm:$0xff] %v429_v46  ;;  %453 = vst [vmem:[#allocation2 + $0x58] sm:$0xff] %v437_v47 }
 0x107   :  { %443 = vst [vmem:[#allocation2 + $0x8] sm:$0xff] %v427_v50  ;;  %451 = vst [vmem:[#allocation2 + $0x48] sm:$0xff] %v435_v51 }
 0x109   :  { %v846_v56 = vpop.f32.mrb[4].mxu0  ;;  %v854_v57 = vpop.f32.mrb[4].mxu1 }
 0x10a   :  { %v432_v60 = vadd.f32 %v846_v56, %v255_v52  ;;  %v440_v61 = vadd.f32 %v854_v57, %v263_v53  ;;  %v379_v62 = vpop.f32.mrb[5].mxu0  ;;  %v411_v63 = vpop.f32.mrb[5].mxu1 }
 0x10b   :  { %v430_v2 = vadd.f32 %v379_v62, %v253_v54  ;;  %v438_v3 = vadd.f32 %v411_v63, %v261_v55  ;;  %v847_v4 = vpop.f32.mrb[6].mxu0  ;;  %v855_v5 = vpop.f32.mrb[6].mxu1 }
 0x10c   :  { %448 = vst [vmem:[#allocation2 + $0x30] sm:$0xff] %v432_v60  ;;  %456 = vst [vmem:[#allocation2 + $0x70] sm:$0xff] %v440_v61  ;;  %v433_v6 = vadd.f32 %v847_v4, %v256_v58  ;;  %v441_v7 = vadd.f32 %v855_v5, %v264_v59  ;;  %v382_v8 = vpop.f32.mrb[7].mxu0  ;;  %v414_v9 = vpop.f32.mrb[7].mxu1 }
 0x10d   :  { %446 = vst [vmem:[#allocation2 + $0x20] sm:$0xff] %v430_v2  ;;  %454 = vst [vmem:[#allocation2 + $0x60] sm:$0xff] %v438_v3  ;;  %v431_v10 = vadd.f32 %v382_v8, %v254_v0  ;;  %v439_v11 = vadd.f32 %v414_v9, %v262_v1 }
 0x10e   :  { %449 = vst [vmem:[#allocation2 + $0x38] sm:$0xff] %v433_v6  ;;  %457 = vst [vmem:[#allocation2 + $0x78] sm:$0xff] %v441_v7 }
 0x10f   :  { %447 = vst [vmem:[#allocation2 + $0x28] sm:$0xff] %v431_v10  ;;  %455 = vst [vmem:[#allocation2 + $0x68] sm:$0xff] %v439_v11 }
 0x110 PF:  { %v479_v12 = vld [vmem:[%s1079_s4 + $0x10] sm:$0xff]  ;;  %v477_v13 = vld [vmem:[%s1079_s4] sm:$0xff]  ;;  %v887_v14 = vmov 0   ;;  %v480_v15 = vld [vmem:[%s1079_s4 + $0x18] sm:$0xff] }
 0x111   :  { %884 = vset.pattern.permute.xlu1 %v887_v14  ;;  %883 = vset.pattern.permute.xlu0 %v887_v14  ;;  %v478_v16 = vld [vmem:[%s1079_s4 + $0x8] sm:$0xff]  ;;  %v481_v18 = vld [vmem:[%s1079_s4 + $0x20] sm:$0xff]  ;;  %v484_v19 = vld [vmem:[%s1079_s4 + $0x38] sm:$0xff] }
 0x112   :  { %505 = vperm.xlu1 %884, %v479_v12   ;;  %495 = vperm.xlu0 %883, %v477_v13   ;;  %v482_v17 = vld [vmem:[%s1079_s4 + $0x28] sm:$0xff]  ;;  %v483_v20 = vld [vmem:[%s1079_s4 + $0x30] sm:$0xff]  ;;  %v485_v22 = vld [vmem:[%s1079_s4 + $0x40] sm:$0xff] }
 0x113   :  { %v486_v21 = vld [vmem:[%s1079_s4 + $0x48] sm:$0xff]  ;;  %v488_v23 = vld [vmem:[%s1079_s4 + $0x58] sm:$0xff]  ;;  %v487_v24 = vld [vmem:[%s1079_s4 + $0x50] sm:$0xff] }
 0x114   :  { %v490_v25 = vld [vmem:[%s1079_s4 + $0x68] sm:$0xff]  ;;  %v489_v26 = vld [vmem:[%s1079_s4 + $0x60] sm:$0xff]  ;;  %v492_v27 = vld [vmem:[%s1079_s4 + $0x78] sm:$0xff] }
 0x115   :  { %v491_v28 = vld [vmem:[%s1079_s4 + $0x70] sm:$0xff]  ;;  %v461_v32 = vld [vmem:[#allocation2] sm:$0xff]  ;;  %v464_v33 = vld [vmem:[#allocation2 + $0x18] sm:$0xff] }
 0x116   :  { %510 = vperm.xlu1 %884, %v480_v15   ;;  %500 = vperm.xlu0 %883, %v478_v16   ;;  %v463_v31 = vld [vmem:[#allocation2 + $0x10] sm:$0xff]  ;;  %v462_v34 = vld [vmem:[#allocation2 + $0x8] sm:$0xff]  ;;  %v465_v42 = vld [vmem:[#allocation2 + $0x20] sm:$0xff] }
 0x117   :  { %v466_v41 = vld [vmem:[#allocation2 + $0x28] sm:$0xff]  ;;  %v468_v49 = vld [vmem:[#allocation2 + $0x38] sm:$0xff]  ;;  %v467_v50 = vld [vmem:[#allocation2 + $0x30] sm:$0xff] }
 0x118   :  { %v470_v56 = vld [vmem:[#allocation2 + $0x48] sm:$0xff]  ;;  %v469_v57 = vld [vmem:[#allocation2 + $0x40] sm:$0xff]  ;;  %v472_v63 = vld [vmem:[#allocation2 + $0x58] sm:$0xff] }
 0x119   :  { %v471_v0 = vld [vmem:[#allocation2 + $0x50] sm:$0xff]  ;;  %v474_v6 = vld [vmem:[#allocation2 + $0x68] sm:$0xff]  ;;  %v473_v7 = vld [vmem:[#allocation2 + $0x60] sm:$0xff] }
 0x11a   :  { %520 = vperm.xlu1 %884, %v482_v17   ;;  %515 = vperm.xlu0 %883, %v481_v18   ;;  %v476_v13 = vld [vmem:[#allocation2 + $0x78] sm:$0xff]  ;;  %v475_v14 = vld [vmem:[#allocation2 + $0x70] sm:$0xff] }
 0x11e   :  { %530 = vperm.xlu1 %884, %v484_v19   ;;  %525 = vperm.xlu0 %883, %v483_v20  }
 0x122   :  { %540 = vperm.xlu1 %884, %v486_v21   ;;  %535 = vperm.xlu0 %883, %v485_v22  }
 0x126   :  { %550 = vperm.xlu1 %884, %v488_v23   ;;  %545 = vperm.xlu0 %883, %v487_v24  }
 0x12a   :  { %560 = vperm.xlu1 %884, %v490_v25   ;;  %555 = vperm.xlu0 %883, %v489_v26  }
 0x12e   :  { %570 = vperm.xlu1 %884, %v492_v27   ;;  %565 = vperm.xlu0 %883, %v491_v28  }
 0x191   :  { %v506_v29 = vpop.permute.xlu1 %505  ;;  %v496_v30 = vpop.permute.xlu0 %495 }
 0x192   :  { %v575_v37 = vmul.f32 %v506_v29, %v463_v31  ;;  %v573_v38 = vmul.f32 %v496_v30, %v461_v32 }
 0x195   :  { %v511_v35 = vpop.permute.xlu1 %510  ;;  %v501_v36 = vpop.permute.xlu0 %500 }
 0x196   :  { %v576_v39 = vmul.f32 %v511_v35, %v464_v33  ;;  %v574_v40 = vmul.f32 %v501_v36, %v462_v34 }
 0x198   :  { %v769_v43 = vpack.c.bf16 %v576_v39, %v575_v37  ;;  %v764_v44 = vpack.c.bf16 %v574_v40, %v573_v38 }
 0x199   :  { %v521_v45 = vpop.permute.xlu1 %520  ;;  %v516_v46 = vpop.permute.xlu0 %515 }
 0x19a   :  { %801 = vst [vmem:[%s1080_s5 + $0x8] sm:$0xff] %v769_v43   ;;  %765 = vst [vmem:[%s1080_s5] sm:$0xff] %v764_v44   ;;  %v578_v47 = vmul.f32 %v521_v45, %v466_v41  ;;  %v577_v48 = vmul.f32 %v516_v46, %v465_v42 }
 0x19c   :  { %v774_v51 = vpack.c.bf16 %v578_v47, %v577_v48 }
 0x19d   :  { %v531_v52 = vpop.permute.xlu1 %530  ;;  %v526_v53 = vpop.permute.xlu0 %525 }
 0x19e   :  { %802 = vst [vmem:[%s1080_s5 + $0x10] sm:$0xff] %v774_v51   ;;  %v580_v54 = vmul.f32 %v531_v52, %v468_v49  ;;  %v579_v55 = vmul.f32 %v526_v53, %v467_v50 }
 0x1a0   :  { %v779_v58 = vpack.c.bf16 %v580_v54, %v579_v55 }
 0x1a1   :  { %v541_v59 = vpop.permute.xlu1 %540  ;;  %v536_v60 = vpop.permute.xlu0 %535 }
 0x1a2   :  { %803 = vst [vmem:[%s1080_s5 + $0x18] sm:$0xff] %v779_v58   ;;  %v582_v61 = vmul.f32 %v541_v59, %v470_v56  ;;  %v581_v62 = vmul.f32 %v536_v60, %v469_v57 }
 0x1a4   :  { %v784_v1 = vpack.c.bf16 %v582_v61, %v581_v62 }
 0x1a5   :  { %v551_v2 = vpop.permute.xlu1 %550  ;;  %v546_v3 = vpop.permute.xlu0 %545 }
 0x1a6   :  { %804 = vst [vmem:[%s1080_s5 + $0x20] sm:$0xff] %v784_v1   ;;  %v584_v4 = vmul.f32 %v551_v2, %v472_v63  ;;  %v583_v5 = vmul.f32 %v546_v3, %v471_v0 }
 0x1a8   :  { %v789_v8 = vpack.c.bf16 %v584_v4, %v583_v5 }
 0x1a9   :  { %v561_v9 = vpop.permute.xlu1 %560  ;;  %v556_v10 = vpop.permute.xlu0 %555 }
 0x1aa   :  { %805 = vst [vmem:[%s1080_s5 + $0x28] sm:$0xff] %v789_v8   ;;  %v586_v11 = vmul.f32 %v561_v9, %v474_v6  ;;  %v585_v12 = vmul.f32 %v556_v10, %v473_v7 }
 0x1ac   :  { %v794_v15 = vpack.c.bf16 %v586_v11, %v585_v12 }
 0x1ad   :  { %v571_v16 = vpop.permute.xlu1 %570  ;;  %v566_v17 = vpop.permute.xlu0 %565 }
 0x1ae   :  { %806 = vst [vmem:[%s1080_s5 + $0x30] sm:$0xff] %v794_v15   ;;  %v588_v18 = vmul.f32 %v571_v16, %v476_v13  ;;  %v587_v19 = vmul.f32 %v566_v17, %v475_v14 }
 0x1b0   :  { %v799_v20 = vpack.c.bf16 %v588_v18, %v587_v19 }
 0x1b2   :  { %807 = vst [vmem:[%s1080_s5 + $0x38] sm:$0xff] %v799_v20  }

// kernel: mpnn_forward.17
= control target key start
LH: loop header
LB: loop body
LE: loop exit
PB: predicated region body
PF: predicated region fallthrough
CT: control target
= control target key end

     0   :  { %s1319_s3 = inlined_call_operand.vmem [shape: bf16[128,128], index: 3, kind: input, shape index: {}]   ;;  %s1320_s1 = inlined_call_operand.vmem [shape: bf16[128,128], index: 1, kind: input, shape index: {}]   ;;  %s1321_s2 = inlined_call_operand.vmem [shape: bf16[128,128], index: 2, kind: input, shape index: {}]   ;;  %s1322_s0 = inlined_call_operand.vmem [shape: bf16[128,128], index: 0, kind: input, shape index: {}]   ;;  %s1323_s5 = inlined_call_operand.vmem [shape: bf16[128,128], index: 5, kind: input, shape index: {}]   ;;  %s1324_s4 = inlined_call_operand.vmem [shape: f32[1,128], index: 4, kind: input, shape index: {}]   ;;  %s1325_s6 = inlined_call_operand.vmem [shape: f32[1,128], index: 6, kind: input, shape index: {}]   ;;  %s1326_s7 = inlined_call_operand.vmem [shape: bf16[128,128], index: 7, kind: output, shape index: {}]  }
   0x1   :  { %v1057_v0 = vld [vmem:[%s1319_s3] sm:$0xff]   ;;  %v1058_v1 = vld [vmem:[%s1319_s3 + $0x8] sm:$0xff]   ;;  %v1059_v2 = vld [vmem:[%s1319_s3 + $0x10] sm:$0xff]  }
   0x2   :  { %945 = vmatprep.subr.bf16.mxu0 %v1057_v0  ;;  %v1060_v3 = vld [vmem:[%s1319_s3 + $0x18] sm:$0xff]   ;;  %v1065_v4 = vld [vmem:[%s1320_s1] sm:$0xff]   ;;  %v1062_v6 = vld [vmem:[%s1319_s3 + $0x28] sm:$0xff]  }
   0x3   :  { %946 = vmatpush3.bf16.msra.mxu0 %v1057_v0  ;;  %961 = vmatprep.mubr.bf16.mxu0 %v1065_v4  ;;  %v1061_v5 = vld [vmem:[%s1319_s3 + $0x20] sm:$0xff]   ;;  %v1063_v7 = vld [vmem:[%s1319_s3 + $0x30] sm:$0xff]   ;;  %v1064_v8 = vld [vmem:[%s1319_s3 + $0x38] sm:$0xff]  }
   0x4   :  { %947 = vmatprep.subr.bf16.mxu0 %v1058_v1  ;;  %v1067_v9 = vld [vmem:[%s1321_s2] sm:$0xff]   ;;  %v1066_v10 = vld [vmem:[%s1320_s1 + $0x8] sm:$0xff]   ;;  %v1069_v12 = vld [vmem:[%s1320_s1 + $0x10] sm:$0xff]  }
   0x5   :  { %v1068_v11 = vld [vmem:[%s1321_s2 + $0x8] sm:$0xff]   ;;  %v1089_v13 = vld [vmem:[%s1323_s5] sm:$0xff]   ;;  %v1071_v15 = vld [vmem:[%s1321_s2 + $0x10] sm:$0xff]  }
   0x6   :  { %v1090_v14 = vld [vmem:[%s1323_s5 + $0x8] sm:$0xff]   ;;  %1009 = vmatprep.subr.bf16.mxu1 %v1089_v13  ;;  %v1091_v16 = vld [vmem:[%s1323_s5 + $0x10] sm:$0xff]   ;;  %v1070_v17 = vld [vmem:[%s1320_s1 + $0x18] sm:$0xff]  }
   0x7   :  { %948 = vmatpush3.bf16.msra.mxu0 %v1058_v1  ;;  %1010 = vmatpush3.bf16.msra.mxu1 %v1089_v13  ;;  %v1073_v18 = vld [vmem:[%s1320_s1 + $0x20] sm:$0xff]   ;;  %v1072_v19 = vld [vmem:[%s1321_s2 + $0x18] sm:$0xff]   ;;  %v1074_v21 = vld [vmem:[%s1320_s1 + $0x28] sm:$0xff]  }
   0x8   :  { %949 = vmatprep.subr.bf16.mxu0 %v1059_v2  ;;  %1011 = vmatprep.subr.bf16.mxu1 %v1090_v14  ;;  %v1075_v20 = vld [vmem:[%s1321_s2 + $0x20] sm:$0xff]   ;;  %v1077_v22 = vld [vmem:[%s1320_s1 + $0x30] sm:$0xff]   ;;  %v1076_v23 = vld [vmem:[%s1321_s2 + $0x28] sm:$0xff]  }
   0x9   :  { %v1079_v24 = vld [vmem:[%s1321_s2 + $0x30] sm:$0xff]   ;;  %v1078_v25 = vld [vmem:[%s1320_s1 + $0x38] sm:$0xff]   ;;  %v1081_v26 = vld [vmem:[%s1322_s0] sm:$0xff]  }
   0xa   :  { %v1080_v27 = vld [vmem:[%s1321_s2 + $0x38] sm:$0xff]   ;;  %v1082_v28 = vld [vmem:[%s1322_s0 + $0x8] sm:$0xff]   ;;  %v1083_v29 = vld [vmem:[%s1322_s0 + $0x10] sm:$0xff]  }
   0xb   :  { %950 = vmatpush3.bf16.msra.mxu0 %v1059_v2  ;;  %1012 = vmatpush3.bf16.msra.mxu1 %v1090_v14  ;;  %v1084_v30 = vld [vmem:[%s1322_s0 + $0x18] sm:$0xff]   ;;  %v1085_v31 = vld [vmem:[%s1322_s0 + $0x20] sm:$0xff]   ;;  %v1086_v32 = vld [vmem:[%s1322_s0 + $0x28] sm:$0xff]  }
   0xc   :  { %951 = vmatprep.subr.bf16.mxu0 %v1060_v3  ;;  %1013 = vmatprep.subr.bf16.mxu1 %v1091_v16  ;;  %v1087_v33 = vld [vmem:[%s1322_s0 + $0x30] sm:$0xff]   ;;  %v1088_v34 = vld [vmem:[%s1322_s0 + $0x38] sm:$0xff]   ;;  %v1093_v36 = vld [vmem:[%s1323_s5 + $0x20] sm:$0xff]  }
   0xd   :  { %v1092_v35 = vld [vmem:[%s1323_s5 + $0x18] sm:$0xff]   ;;  %v1094_v37 = vld [vmem:[%s1323_s5 + $0x28] sm:$0xff]   ;;  %v1095_v38 = vld [vmem:[%s1323_s5 + $0x30] sm:$0xff]  }
   0xe   :  { %v1096_v39 = vld [vmem:[%s1323_s5 + $0x38] sm:$0xff]   ;;  %v808_v40 = vld [vmem:[%s1324_s4] ss:$0 sm:$0xff] }
   0xf   :  { %952 = vmatpush3.bf16.msra.mxu0 %v1060_v3  ;;  %1014 = vmatpush3.bf16.msra.mxu1 %v1091_v16 }
  0x10   :  { %953 = vmatprep.subr.bf16.mxu0 %v1061_v5  ;;  %1015 = vmatprep.subr.bf16.mxu1 %v1092_v35 }
  0x13   :  { %954 = vmatpush3.bf16.msra.mxu0 %v1061_v5  ;;  %1016 = vmatpush3.bf16.msra.mxu1 %v1092_v35 }
  0x14   :  { %955 = vmatprep.subr.bf16.mxu0 %v1062_v6  ;;  %1017 = vmatprep.subr.bf16.mxu1 %v1093_v36 }
  0x17   :  { %956 = vmatpush3.bf16.msra.mxu0 %v1062_v6  ;;  %1018 = vmatpush3.bf16.msra.mxu1 %v1093_v36 }
  0x18   :  { %957 = vmatprep.subr.bf16.mxu0 %v1063_v7  ;;  %1019 = vmatprep.subr.bf16.mxu1 %v1094_v37 }
  0x1b   :  { %958 = vmatpush3.bf16.msra.mxu0 %v1063_v7  ;;  %1020 = vmatpush3.bf16.msra.mxu1 %v1094_v37 }
  0x1c   :  { %959 = vmatprep.subr.bf16.mxu0 %v1064_v8  ;;  %1021 = vmatprep.subr.bf16.mxu1 %v1095_v38 }
  0x1f   :  { %960 = vmatpush3.bf16.msra.mxu0 %v1064_v8  ;;  %1022 = vmatpush3.bf16.msra.mxu1 %v1095_v38 }
  0x20   :  { %977 = vmatprep.subr.bf16.mxu0 %v1067_v9  ;;  %1023 = vmatprep.subr.bf16.mxu1 %v1096_v39 }
  0x22   :  { %962 = vmatmul.mubr.bf16.vlgmr.msra.gmra.mrb[0].mxu0 %v1066_v10 }
  0x23   :  { %978 = vmatpush3.bf16.msra.mxu0 %v1067_v9  ;;  %965 = vmatprep.mubr.bf16.mxu0 %v1069_v12 }
  0x24   :  { %979 = vmatprep.subr.bf16.mxu0 %v1068_v11  ;;  %1024 = vmatpush3.bf16.msra.mxu1 %v1096_v39 }
  0x27   :  { %980 = vmatpush3.bf16.msra.mxu0 %v1068_v11 }
  0x28   :  { %981 = vmatprep.subr.bf16.mxu0 %v1071_v15 }
  0x2a   :  { %966 = vmatmul.mubr.bf16.gmra.mrb[4].mxu0 %v1070_v17 }
  0x2b   :  { %982 = vmatpush3.bf16.msra.mxu0 %v1071_v15  ;;  %969 = vmatprep.mubr.bf16.mxu0 %v1073_v18 }
  0x2c   :  { %983 = vmatprep.subr.bf16.mxu0 %v1072_v19 }
  0x2f   :  { %984 = vmatpush3.bf16.msra.mxu0 %v1072_v19 }
  0x30   :  { %985 = vmatprep.subr.bf16.mxu0 %v1075_v20 }
  0x32   :  { %970 = vmatmul.mubr.bf16.gmra.mrb[8].mxu0 %v1074_v21 }
  0x33   :  { %986 = vmatpush3.bf16.msra.mxu0 %v1075_v20  ;;  %973 = vmatprep.mubr.bf16.mxu0 %v1077_v22 }
  0x34   :  { %987 = vmatprep.subr.bf16.mxu0 %v1076_v23 }
  0x37   :  { %988 = vmatpush3.bf16.msra.mxu0 %v1076_v23 }
  0x38   :  { %989 = vmatprep.subr.bf16.mxu0 %v1079_v24 }
  0x3a   :  { %974 = vmatmul.mubr.bf16.gmra.mrb[12].mxu0 %v1078_v25 }
  0x3b   :  { %990 = vmatpush3.bf16.msra.mxu0 %v1079_v24  ;;  %993 = vmatprep.mubr.bf16.mxu0 %v1081_v26 }
  0x3c   :  { %991 = vmatprep.subr.bf16.mxu0 %v1080_v27 }
  0x3f   :  { %992 = vmatpush3.bf16.msra.mxu0 %v1080_v27 }
  0x42   :  { %994 = vmatmul.mubr.bf16.vlgmr.msra.gmra.mrb[0].mxu0 %v1082_v28 }
  0x43   :  { %997 = vmatprep.mubr.bf16.mxu0 %v1083_v29 }
  0x4a   :  { %998 = vmatmul.mubr.bf16.gmra.mrb[4].mxu0 %v1084_v30 }
  0x4b   :  { %1001 = vmatprep.mubr.bf16.mxu0 %v1085_v31 }
  0x52   :  { %1002 = vmatmul.mubr.bf16.gmra.mrb[8].mxu0 %v1086_v32 }
  0x53   :  { %1005 = vmatprep.mubr.bf16.mxu0 %v1087_v33 }
  0x5a   :  { %1006 = vmatmul.mubr.bf16.gmra.mrb[12].mxu0 %v1088_v34  ;;  %v809_v34 = vld [vmem:[%s1325_s6] ss:$0 sm:$0xff] }
 0x115   :  { %v995_v41 = vpop.f32.mrb[0].mxu0 }
 0x116   :  { %v486_v42 = vadd.f32 %v995_v41, %v808_v40  ;;  %v414_v43 = vpop.f32.mrb[1].mxu0 }
 0x117   :  { %v484_v44 = vadd.f32 %v808_v40, %v414_v43  ;;  %v996_v45 = vpop.f32.mrb[2].mxu0 }
 0x118   :  { %1097 = vtanh.f32 %v486_v42  ;;  %v487_v46 = vadd.f32 %v996_v45, %v808_v40  ;;  %v417_v47 = vpop.f32.mrb[3].mxu0 }
 0x119   :  { %1099 = vtanh.f32 %v484_v44  ;;  %v485_v48 = vadd.f32 %v808_v40, %v417_v47 }
 0x11a   :  { %1101 = vtanh.f32 %v487_v46 }
 0x11b   :  { %1103 = vtanh.f32 %v485_v48 }
 0x11d   :  { %v999_v49 = vpop.f32.mrb[4].mxu0 }
 0x11e   :  { %v490_v50 = vadd.f32 %v999_v49, %v808_v40  ;;  %v430_v51 = vpop.f32.mrb[5].mxu0 }
 0x11f   :  { %v488_v52 = vadd.f32 %v808_v40, %v430_v51  ;;  %v1000_v53 = vpop.f32.mrb[6].mxu0 }
 0x120   :  { %1105 = vtanh.f32 %v490_v50  ;;  %v491_v54 = vadd.f32 %v1000_v53, %v808_v40  ;;  %v433_v55 = vpop.f32.mrb[7].mxu0 }
 0x121   :  { %1107 = vtanh.f32 %v488_v52  ;;  %v489_v56 = vadd.f32 %v808_v40, %v433_v55 }
 0x122   :  { %v1098_v57 = vpop.eup %1097  ;;  %1109 = vtanh.f32 %v491_v54 }
 0x123   :  { %v1100_v58 = vpop.eup %1099  ;;  %1111 = vtanh.f32 %v489_v56 }
 0x124   :  { %v1102_v59 = vpop.eup %1101 }
 0x125   :  { %v1104_v60 = vpop.eup %1103  ;;  %v1003_v61 = vpop.f32.mrb[8].mxu0  ;;  %v517_v62 = vpack.c.bf16 %v1102_v59, %v1098_v57 }
 0x126   :  { %v494_v63 = vadd.f32 %v1003_v61, %v808_v40  ;;  %v446_v0 = vpop.f32.mrb[9].mxu0  ;;  %v516_v1 = vpack.c.bf16 %v1104_v60, %v1100_v58 }
 0x127   :  { %v492_v2 = vadd.f32 %v808_v40, %v446_v0  ;;  %v1004_v3 = vpop.f32.mrb[10].mxu0 }
 0x128   :  { %1113 = vtanh.f32 %v494_v63  ;;  %v495_v4 = vadd.f32 %v1004_v3, %v808_v40  ;;  %v449_v5 = vpop.f32.mrb[11].mxu0  ;;  %1025 = vmatprep.mubr.bf16.mxu1 %v516_v1 }
 0x129   :  { %1115 = vtanh.f32 %v492_v2  ;;  %v493_v6 = vadd.f32 %v808_v40, %v449_v5  ;;  %1026 = vmatmul.mubr.bf16.vlgmr.msra.gmra.mrb[0].mxu1 %v517_v62 }
 0x12a   :  { %v1106_v7 = vpop.eup %1105  ;;  %1117 = vtanh.f32 %v495_v4 }
 0x12b   :  { %v1108_v8 = vpop.eup %1107  ;;  %1119 = vtanh.f32 %v493_v6 }
 0x12c   :  { %v1110_v9 = vpop.eup %1109 }
 0x12d   :  { %v1112_v10 = vpop.eup %1111  ;;  %v1007_v11 = vpop.f32.mrb[12].mxu0  ;;  %v519_v12 = vpack.c.bf16 %v1110_v9, %v1106_v7 }
 0x12e   :  { %v498_v13 = vadd.f32 %v1007_v11, %v808_v40  ;;  %v462_v14 = vpop.f32.mrb[13].mxu0  ;;  %v518_v15 = vpack.c.bf16 %v1112_v10, %v1108_v8 }
 0x12f   :  { %v496_v16 = vadd.f32 %v808_v40, %v462_v14  ;;  %v1008_v17 = vpop.f32.mrb[14].mxu0 }
 0x130   :  { %1121 = vtanh.f32 %v498_v13  ;;  %v499_v18 = vadd.f32 %v1008_v17, %v808_v40  ;;  %v465_v19 = vpop.f32.mrb[15].mxu0  ;;  %1029 = vmatprep.mubr.bf16.mxu1 %v518_v15 }
 0x131   :  { %1123 = vtanh.f32 %v496_v16  ;;  %v497_v20 = vadd.f32 %v808_v40, %v465_v19  ;;  %1030 = vmatmul.mubr.bf16.gmra.mrb[4].mxu1 %v519_v12 }
 0x132   :  { %v1114_v21 = vpop.eup %1113  ;;  %1125 = vtanh.f32 %v499_v18 }
 0x133   :  { %v1116_v22 = vpop.eup %1115  ;;  %1127 = vtanh.f32 %v497_v20 }
 0x134   :  { %v1118_v23 = vpop.eup %1117 }
 0x135   :  { %v1120_v24 = vpop.eup %1119  ;;  %v521_v25 = vpack.c.bf16 %v1118_v23, %v1114_v21 }
 0x136   :  { %v520_v26 = vpack.c.bf16 %v1120_v24, %v1116_v22 }
 0x138   :  { %1033 = vmatprep.mubr.bf16.mxu1 %v520_v26 }
 0x139   :  { %1034 = vmatmul.mubr.bf16.gmra.mrb[8].mxu1 %v521_v25 }
 0x13a   :  { %v1122_v27 = vpop.eup %1121 }
 0x13b   :  { %v1124_v28 = vpop.eup %1123 }
 0x13c   :  { %v1126_v29 = vpop.eup %1125 }
 0x13d   :  { %v1128_v30 = vpop.eup %1127  ;;  %v523_v31 = vpack.c.bf16 %v1126_v29, %v1122_v27 }
 0x13e   :  { %v522_v32 = vpack.c.bf16 %v1128_v30, %v1124_v28 }
 0x140   :  { %1037 = vmatprep.mubr.bf16.mxu1 %v522_v32 }
 0x141   :  { %1038 = vmatmul.mubr.bf16.gmra.mrb[12].mxu1 %v523_v31 }
 0x1fc   :  { %v1027_v33 = vpop.f32.mrb[0].mxu1 }
 0x1fd   :  { %v629_v35 = vpop.f32.mrb[1].mxu1  ;;  %v638_v37 = vadd.f32 %v1027_v33, %v809_v34 }
 0x1fe   :  { %v1028_v36 = vpop.f32.mrb[2].mxu1  ;;  %v630_v40 = vadd.f32 %v809_v34, %v629_v35 }
 0x1ff   :  { %v641_v38 = vadd.f32 %v1028_v36, %v809_v34  ;;  %v632_v39 = vpop.f32.mrb[3].mxu1 }
 0x200   :  { %v633_v41 = vadd.f32 %v809_v34, %v632_v39 }
 0x201   :  { %v858_v42 = vpack.c.bf16 %v641_v38, %v638_v37 }
 0x202   :  { %v853_v43 = vpack.c.bf16 %v633_v41, %v630_v40 }
 0x203   :  { %890 = vst [vmem:[%s1326_s7 + $0x8] sm:$0xff] %v858_v42  }
 0x204   :  { %854 = vst [vmem:[%s1326_s7] sm:$0xff] %v853_v43   ;;  %v1031_v44 = vpop.f32.mrb[4].mxu1 }
 0x205   :  { %v645_v45 = vpop.f32.mrb[5].mxu1  ;;  %v654_v47 = vadd.f32 %v1031_v44, %v809_v34 }
 0x206   :  { %v1032_v46 = vpop.f32.mrb[6].mxu1  ;;  %v646_v50 = vadd.f32 %v809_v34, %v645_v45 }
 0x207   :  { %v657_v48 = vadd.f32 %v1032_v46, %v809_v34  ;;  %v648_v49 = vpop.f32.mrb[7].mxu1 }
 0x208   :  { %v649_v51 = vadd.f32 %v809_v34, %v648_v49 }
 0x209   :  { %v868_v52 = vpack.c.bf16 %v657_v48, %v654_v47 }
 0x20a   :  { %v863_v53 = vpack.c.bf16 %v649_v51, %v646_v50 }
 0x20b   :  { %892 = vst [vmem:[%s1326_s7 + $0x18] sm:$0xff] %v868_v52  }
 0x20c   :  { %891 = vst [vmem:[%s1326_s7 + $0x10] sm:$0xff] %v863_v53   ;;  %v1035_v54 = vpop.f32.mrb[8].mxu1 }
 0x20d   :  { %v661_v55 = vpop.f32.mrb[9].mxu1  ;;  %v670_v57 = vadd.f32 %v1035_v54, %v809_v34 }
 0x20e   :  { %v1036_v56 = vpop.f32.mrb[10].mxu1  ;;  %v662_v60 = vadd.f32 %v809_v34, %v661_v55 }
 0x20f   :  { %v673_v58 = vadd.f32 %v1036_v56, %v809_v34  ;;  %v664_v59 = vpop.f32.mrb[11].mxu1 }
 0x210   :  { %v665_v61 = vadd.f32 %v809_v34, %v664_v59 }
 0x211   :  { %v878_v62 = vpack.c.bf16 %v673_v58, %v670_v57 }
 0x212   :  { %v873_v63 = vpack.c.bf16 %v665_v61, %v662_v60 }
 0x213   :  { %894 = vst [vmem:[%s1326_s7 + $0x28] sm:$0xff] %v878_v62  }
 0x214   :  { %893 = vst [vmem:[%s1326_s7 + $0x20] sm:$0xff] %v873_v63   ;;  %v1039_v0 = vpop.f32.mrb[12].mxu1 }
 0x215   :  { %v677_v1 = vpop.f32.mrb[13].mxu1  ;;  %v686_v3 = vadd.f32 %v1039_v0, %v809_v34 }
 0x216   :  { %v1040_v2 = vpop.f32.mrb[14].mxu1  ;;  %v678_v6 = vadd.f32 %v809_v34, %v677_v1 }
 0x217   :  { %v689_v4 = vadd.f32 %v1040_v2, %v809_v34  ;;  %v680_v5 = vpop.f32.mrb[15].mxu1 }
 0x218   :  { %v681_v7 = vadd.f32 %v809_v34, %v680_v5 }
 0x219   :  { %v888_v8 = vpack.c.bf16 %v689_v4, %v686_v3 }
 0x21a   :  { %v883_v9 = vpack.c.bf16 %v681_v7, %v678_v6 }
 0x21b   :  { %896 = vst [vmem:[%s1326_s7 + $0x38] sm:$0xff] %v888_v8  }
 0x21c   :  { %895 = vst [vmem:[%s1326_s7 + $0x30] sm:$0xff] %v883_v9  }

// kernel: squeeze.8
= control target key start
LH: loop header
LB: loop body
LE: loop exit
PB: predicated region body
PF: predicated region fallthrough
CT: control target
= control target key end

     0   :  { %vm7_vm0 = vcmask 97280   ;;  %vm13_vm1 = vcmask 195680   ;;  %s39_s0 = inlined_call_operand.vmem [shape: s32[2,12], index: 0, kind: input, shape index: {}]   ;;  %s40_s1 = inlined_call_operand.vmem [shape: s32[24], index: 1, kind: output, shape index: {}]  }
   0x1   :  { %v4_v0 = vld [vmem:[%s39_s0] sm:$0x3]  ;;  %s22_s0 = smov 12  }
   0x2   :  { %5 = vst [vmem:[#allocation1] sm:$0x3] %v4_v0 }
   0x9   :  { %v10_v1 = vld [vmem:[#allocation1 + $0x1] sm:$0x1]   ;;  %v6_v2 = vld [vmem:[#allocation1] sm:$0x1]  }
   0xa   :  { %11 = vrot.lane.b32.xlu0 %v10_v1, %s22_s0  ;;  %8 = vst.msk [vmem:[#allocation0] sm:$0x1] %vm7_vm0, %v6_v2  }
  0x7c   :  { %v12_v3 = vpop.permute.xlu0 %11  }
  0x7d   :  { %14 = vst.msk [vmem:[#allocation0] sm:$0x1] %vm13_vm1, %v12_v3  }
  0x84   :  { %v18_v4 = vld [vmem:[#allocation0] sm:$0x1] }
  0x85   :  { %20 = vst [vmem:[%s40_s1] sm:$0x1] %v18_v4 }

// kernel: mpnn_forward.18
= control target key start
LH: loop header
LB: loop body
LE: loop exit
PB: predicated region body
PF: predicated region fallthrough
CT: control target
= control target key end

     0   :  { %vm345_vm0 = vcmask 1040384   ;;  %vm320_vm1 = vcmask 146432   ;;  %s1514_s1 = inlined_call_operand.vmem [shape: bf16[274,128], index: 1, kind: input, shape index: {}]   ;;  %s1515_s0 = inlined_call_operand.vmem [shape: bf16[128,274], index: 0, kind: input, shape index: {}]   ;;  %s1516_s3 = inlined_call_operand.vmem [shape: bf16[128,128], index: 3, kind: input, shape index: {}]   ;;  %s1517_s2 = inlined_call_operand.vmem [shape: f32[1,128], index: 2, kind: input, shape index: {}]   ;;  %s1518_s4 = inlined_call_operand.vmem [shape: f32[1,128], index: 4, kind: input, shape index: {}]   ;;  %s1519_s5 = inlined_call_operand.vmem [shape: bf16[128,128], index: 5, kind: output, shape index: {}]  }
   0x1   :  { %v1117_v0 = vld [vmem:[%s1514_s1 + $0x40] sm:$0xff]   ;;  %v1119_v2 = vld [vmem:[%s1514_s1 + $0x48] sm:$0xff]   ;;  %v1121_v4 = vld [vmem:[%s1514_s1 + $0x50] sm:$0xff]  }
   0x2   :  { %v1118_v1 = vld [vmem:[%s1514_s1] sm:$0xff]   ;;  %974 = vmatprep.subr.bf16.mxu0 %v1117_v0  ;;  %v1120_v3 = vld [vmem:[%s1514_s1 + $0x8] sm:$0xff]   ;;  %v1122_v5 = vld [vmem:[%s1514_s1 + $0x10] sm:$0xff]  }
   0x3   :  { %975 = vmatpush3.bf16.msra.mxu0 %v1118_v1  ;;  %v1123_v6 = vld [vmem:[%s1514_s1 + $0x58] sm:$0xff]   ;;  %v1125_v8 = vld [vmem:[%s1514_s1 + $0x60] sm:$0xff]   ;;  %v1127_v11 = vld [vmem:[%s1514_s1 + $0x68] sm:$0xff]  }
   0x4   :  { %976 = vmatprep.subr.bf16.mxu0 %v1119_v2  ;;  %v1124_v7 = vld [vmem:[%s1514_s1 + $0x18] sm:$0xff]   ;;  %v1126_v9 = vld [vmem:[%s1514_s1 + $0x20] sm:$0xff]   ;;  %v1128_v12 = vld [vmem:[%s1514_s1 + $0x28] sm:$0xff]  }
   0x5   :  { %v1132_v10 = vld [vmem:[%s1514_s1 + $0x80] sm:$0xff]   ;;  %v1129_v13 = vld [vmem:[%s1514_s1 + $0x70] sm:$0xff]   ;;  %v1137_v15 = vld [vmem:[%s1514_s1 + $0x88] ss:$0 sps:$4 sm:$0x11]  }
   0x6   :  { %1064 = vmatprep.subr.bf16.mxu1 %v1132_v10  ;;  %v1136_v14 = vld [vmem:[%s1515_s0 + $0x4] ss:$12 sps:$4 sm:$0xff]   ;;  %v1138_v16 = vld [vmem:[%s1515_s0 + $0x8] ss:$12 sps:$4 sm:$0xff]   ;;  %v347_v17 = vsel %vm345_vm0, %v1137_v15, 0  ;;  %v1131_v20 = vld [vmem:[%s1514_s1 + $0x78] sm:$0xff]  }
   0x7   :  { %977 = vmatpush3.bf16.msra.mxu0 %v1120_v3  ;;  %1065 = vmatpush3.bf16.msra.mxu1 %v1132_v10  ;;  %v1139_v18 = vld [vmem:[%s1515_s0 + $0x20] ss:$12 sps:$4 sm:$0xff]   ;;  %v1130_v19 = vld [vmem:[%s1514_s1 + $0x30] sm:$0xff]   ;;  %v1146_v21 = vld [vmem:[%s1515_s0 + $0x38] ss:$12 sps:$4 sm:$0xff]  }
   0x8   :  { %978 = vmatprep.subr.bf16.mxu0 %v1121_v4  ;;  %381 = vmatprep.mubr.bf16.mxu0 %v1136_v14  ;;  %v1133_v22 = vld [vmem:[%s1514_s1 + $0x38] sm:$0xff]   ;;  %v1134_v23 = vld [vmem:[%s1515_s0] ss:$12 sps:$4 sm:$0xff]   ;;  %v1154_v25 = vld [vmem:[%s1515_s0 + $0x68] ss:$12 sps:$4 sm:$0xff]  }
   0x9   :  { %1116 = vmatprep.subr.msk.bf16.mxu1 %vm345_vm0, %v1137_v15  ;;  %1068 = vmatprep.mubr.msk.bf16.mxu1 %vm320_vm1, %v1138_v16  ;;  %v1147_v24 = vld [vmem:[%s1515_s0 + $0x50] ss:$12 sps:$4 sm:$0xff]   ;;  %v1155_v27 = vld [vmem:[%s1515_s0 + $0x80] ss:$12 sps:$4 sm:$0xff]   ;;  %v1142_v28 = vld [vmem:[%s1515_s0 + $0x18] ss:$12 sps:$4 sm:$0xff]  }
   0xa   :  { %v1140_v26 = vld [vmem:[%s1515_s0 + $0x1c] ss:$12 sps:$4 sm:$0xff]   ;;  %v1162_v29 = vld [vmem:[%s1515_s0 + $0x98] ss:$12 sps:$4 sm:$0xff]   ;;  %v1143_v30 = vld [vmem:[%s1515_s0 + $0x34] ss:$12 sps:$4 sm:$0xff]  }
   0xb   :  { %979 = vmatpush3.bf16.msra.mxu0 %v1122_v5  ;;  %1067 = vmatpush3.bf16.msra.mxu1 %v347_v17  ;;  %v1167_v31 = vld [vmem:[%s1516_s3] sm:$0xff]   ;;  %v1163_v32 = vld [vmem:[%s1515_s0 + $0xb0] ss:$12 sps:$4 sm:$0xff]   ;;  %v1148_v34 = vld [vmem:[%s1515_s0 + $0x4c] ss:$12 sps:$4 sm:$0xff]  }
   0xc   :  { %980 = vmatprep.subr.bf16.mxu0 %v1123_v6  ;;  %1084 = vmatprep.subr.bf16.mxu1 %v1167_v31  ;;  %v1145_v33 = vld [vmem:[%s1515_s0 + $0x30] ss:$12 sps:$4 sm:$0xff]   ;;  %v1150_v35 = vld [vmem:[%s1515_s0 + $0x48] ss:$12 sps:$4 sm:$0xff]   ;;  %v1153_v37 = vld [vmem:[%s1515_s0 + $0x60] ss:$12 sps:$4 sm:$0xff]  }
   0xd   :  { %v1151_v36 = vld [vmem:[%s1515_s0 + $0x64] ss:$12 sps:$4 sm:$0xff]   ;;  %v1156_v38 = vld [vmem:[%s1515_s0 + $0x7c] ss:$12 sps:$4 sm:$0xff]   ;;  %v1159_v40 = vld [vmem:[%s1515_s0 + $0x94] ss:$12 sps:$4 sm:$0xff]  }
   0xe   :  { %1069 = vmatmul.mubr.msk.bf16.vlgmr.msra.gmra.mrb[0].mxu1 %vm320_vm1, %v1139_v18  ;;  %v1158_v39 = vld [vmem:[%s1515_s0 + $0x78] ss:$12 sps:$4 sm:$0xff]   ;;  %v1161_v41 = vld [vmem:[%s1515_s0 + $0x90] ss:$12 sps:$4 sm:$0xff]   ;;  %v1166_v43 = vld [vmem:[%s1515_s0 + $0xa8] ss:$12 sps:$4 sm:$0xff]  }
   0xf   :  { %981 = vmatpush3.bf16.msra.mxu0 %v1124_v7  ;;  %1072 = vmatprep.mubr.msk.bf16.mxu1 %vm320_vm1, %v1146_v21  ;;  %v1164_v42 = vld [vmem:[%s1515_s0 + $0xac] ss:$12 sps:$4 sm:$0xff]   ;;  %v1169_v45 = vld [vmem:[%s1516_s3 + $0x10] sm:$0xff]   ;;  %v1171_v47 = vld [vmem:[%s1516_s3 + $0x20] sm:$0xff]  }
  0x10   :  { %982 = vmatprep.subr.bf16.mxu0 %v1125_v8  ;;  %1085 = vmatpush3.bf16.msra.mxu1 %v1167_v31  ;;  %v1168_v44 = vld [vmem:[%s1516_s3 + $0x8] sm:$0xff]   ;;  %v1170_v46 = vld [vmem:[%s1516_s3 + $0x18] sm:$0xff]   ;;  %v1173_v49 = vld [vmem:[%s1516_s3 + $0x30] sm:$0xff]  }
  0x11   :  { %1086 = vmatprep.subr.bf16.mxu1 %v1168_v44  ;;  %v1172_v48 = vld [vmem:[%s1516_s3 + $0x28] sm:$0xff]   ;;  %v1174_v50 = vld [vmem:[%s1516_s3 + $0x38] sm:$0xff]   ;;  %v1432_v59 = vld [vmem:[%s1517_s2] ss:$0 sm:$0xff] }
  0x13   :  { %983 = vmatpush3.bf16.msra.mxu0 %v1126_v9 }
  0x14   :  { %984 = vmatprep.subr.bf16.mxu0 %v1127_v11  ;;  %1087 = vmatpush3.bf16.msra.mxu1 %v1168_v44 }
  0x15   :  { %1088 = vmatprep.subr.bf16.mxu1 %v1169_v45 }
  0x16   :  { %1073 = vmatmul.mubr.msk.bf16.gmra.mrb[4].mxu1 %vm320_vm1, %v1147_v24 }
  0x17   :  { %985 = vmatpush3.bf16.msra.mxu0 %v1128_v12  ;;  %1076 = vmatprep.mubr.msk.bf16.mxu1 %vm320_vm1, %v1154_v25 }
  0x18   :  { %986 = vmatprep.subr.bf16.mxu0 %v1129_v13  ;;  %1089 = vmatpush3.bf16.msra.mxu1 %v1169_v45 }
  0x19   :  { %1090 = vmatprep.subr.bf16.mxu1 %v1170_v46 }
  0x1b   :  { %987 = vmatpush3.bf16.msra.mxu0 %v1130_v19 }
  0x1c   :  { %988 = vmatprep.subr.bf16.mxu0 %v1131_v20  ;;  %1091 = vmatpush3.bf16.msra.mxu1 %v1170_v46 }
  0x1d   :  { %1092 = vmatprep.subr.bf16.mxu1 %v1171_v47 }
  0x1e   :  { %1077 = vmatmul.mubr.msk.bf16.gmra.mrb[8].mxu1 %vm320_vm1, %v1155_v27 }
  0x1f   :  { %989 = vmatpush3.bf16.msra.mxu0 %v1133_v22  ;;  %1080 = vmatprep.mubr.msk.bf16.mxu1 %vm320_vm1, %v1162_v29 }
  0x20   :  { %1093 = vmatpush3.bf16.msra.mxu1 %v1171_v47 }
  0x21   :  { %1094 = vmatprep.subr.bf16.mxu1 %v1172_v48 }
  0x22   :  { %382 = vmatmul.mubr.bf16.vlgmr.msra.gmra.mrb[0].mxu0 %v1134_v23 }
  0x23   :  { %389 = vmatprep.mubr.bf16.mxu0 %v1140_v26 }
  0x24   :  { %1095 = vmatpush3.bf16.msra.mxu1 %v1172_v48 }
  0x25   :  { %1096 = vmatprep.subr.bf16.mxu1 %v1173_v49 }
  0x26   :  { %1081 = vmatmul.mubr.msk.bf16.gmra.mrb[12].mxu1 %vm320_vm1, %v1163_v32 }
  0x28   :  { %1097 = vmatpush3.bf16.msra.mxu1 %v1173_v49 }
  0x29   :  { %1098 = vmatprep.subr.bf16.mxu1 %v1174_v50 }
  0x2a   :  { %390 = vmatmul.mubr.bf16.gmra.mrb[4].mxu0 %v1142_v28 }
  0x2b   :  { %397 = vmatprep.mubr.bf16.mxu0 %v1143_v30 }
  0x2c   :  { %1099 = vmatpush3.bf16.msra.mxu1 %v1174_v50 }
  0x32   :  { %398 = vmatmul.mubr.bf16.gmra.mrb[8].mxu0 %v1145_v33 }
  0x33   :  { %405 = vmatprep.mubr.bf16.mxu0 %v1148_v34 }
  0x3a   :  { %406 = vmatmul.mubr.bf16.gmra.mrb[12].mxu0 %v1150_v35 }
  0x3b   :  { %413 = vmatprep.mubr.bf16.mxu0 %v1151_v36 }
  0x42   :  { %414 = vmatmul.mubr.bf16.gmra.mrb[16].mxu0 %v1153_v37 }
  0x43   :  { %421 = vmatprep.mubr.bf16.mxu0 %v1156_v38 }
  0x4a   :  { %422 = vmatmul.mubr.bf16.gmra.mrb[20].mxu0 %v1158_v39 }
  0x4b   :  { %429 = vmatprep.mubr.bf16.mxu0 %v1159_v40 }
  0x52   :  { %430 = vmatmul.mubr.bf16.gmra.mrb[24].mxu0 %v1161_v41 }
  0x53   :  { %437 = vmatprep.mubr.bf16.mxu0 %v1164_v42 }
  0x5a   :  { %438 = vmatmul.mubr.bf16.gmra.mrb[28].mxu0 %v1166_v43 }
  0xe1   :  { %v1070_v51 = vpop.f32.mrb[0].mxu1 }
  0xe2   :  { %v480_v52 = vpop.f32.mrb[1].mxu1 }
  0xe3   :  { %v1071_v53 = vpop.f32.mrb[2].mxu1 }
  0xe4   :  { %v483_v54 = vpop.f32.mrb[3].mxu1 }
  0xe9   :  { %v1427_v55 = vpop.f32.mrb[4].mxu1 }
  0xea   :  { %v496_v57 = vpop.f32.mrb[5].mxu1 }
  0xeb   :  { %v1075_v60 = vpop.f32.mrb[6].mxu1 }
  0xec   :  { %v499_v63 = vpop.f32.mrb[7].mxu1 }
  0xf1   :  { %v1436_v5 = vpop.f32.mrb[8].mxu1 }
  0xf2   :  { %v512_v8 = vpop.f32.mrb[9].mxu1 }
  0xf3   :  { %v1438_v10 = vpop.f32.mrb[10].mxu1 }
  0xf4   :  { %v515_v13 = vpop.f32.mrb[11].mxu1 }
  0xf5   :  { %v990_v56 = vpop.f32.mrb[0].mxu0 }
  0xf6   :  { %v991_v58 = vpop.f32.mrb[1].mxu0 }
  0xf7   :  { %v992_v61 = vadd.f32 %v991_v58, %v990_v56  ;;  %v993_v62 = vpop.f32.mrb[2].mxu0 }
  0xf8   :  { %v994_v0 = vpop.f32.mrb[3].mxu0 }
  0xf9   :  { %v995_v1 = vadd.f32 %v994_v0, %v993_v62  ;;  %v384_v2 = vadd.f32 %v992_v61, %v1432_v59  ;;  %v1442_v19 = vpop.f32.mrb[12].mxu1 }
  0xfa   :  { %v1444_v22 = vpop.f32.mrb[13].mxu1 }
  0xfb   :  { %v481_v3 = vadd.f32 %v480_v52, %v384_v2  ;;  %v387_v4 = vadd.f32 %v995_v1, %v1432_v59  ;;  %v1446_v24 = vpop.f32.mrb[14].mxu1 }
  0xfc   :  { %v1448_v27 = vpop.f32.mrb[15].mxu1 }
  0xfd   :  { %v484_v6 = vadd.f32 %v483_v54, %v387_v4  ;;  %v996_v7 = vpop.f32.mrb[4].mxu0  ;;  %1175 = vtanh.f32 %v481_v3 }
  0xfe   :  { %v997_v9 = vpop.f32.mrb[5].mxu0 }
  0xff   :  { %1177 = vtanh.f32 %v484_v6  ;;  %v998_v11 = vadd.f32 %v997_v9, %v996_v7  ;;  %v999_v12 = vpop.f32.mrb[6].mxu0 }
 0x100   :  { %v1000_v14 = vpop.f32.mrb[7].mxu0 }
 0x101   :  { %v392_v15 = vadd.f32 %v998_v11, %v1432_v59  ;;  %v1001_v16 = vadd.f32 %v1000_v14, %v999_v12 }
 0x103   :  { %v489_v17 = vadd.f32 %v1070_v51, %v392_v15  ;;  %v395_v18 = vadd.f32 %v1001_v16, %v1432_v59 }
 0x105   :  { %v492_v20 = vadd.f32 %v1071_v53, %v395_v18  ;;  %v1002_v21 = vpop.f32.mrb[8].mxu0  ;;  %1179 = vtanh.f32 %v489_v17 }
 0x106   :  { %v1003_v23 = vpop.f32.mrb[9].mxu0 }
 0x107   :  { %1181 = vtanh.f32 %v492_v20  ;;  %v1004_v25 = vadd.f32 %v1003_v23, %v1002_v21  ;;  %v1005_v26 = vpop.f32.mrb[10].mxu0  ;;  %v1176_v28 = vpop.eup %1175 }
 0x108   :  { %v1006_v29 = vpop.f32.mrb[11].mxu0 }
 0x109   :  { %v1178_v30 = vpop.eup %1177  ;;  %v1007_v31 = vadd.f32 %v1006_v29, %v1005_v26  ;;  %v400_v32 = vadd.f32 %v1004_v25, %v1432_v59 }
 0x10a   :  { %v559_v33 = vpack.c.bf16 %v1178_v30, %v1176_v28 }
 0x10b   :  { %v497_v34 = vadd.f32 %v496_v57, %v400_v32  ;;  %v403_v35 = vadd.f32 %v1007_v31, %v1432_v59 }
 0x10c   :  { %1100 = vmatprep.mubr.bf16.mxu1 %v559_v33 }
 0x10d   :  { %v500_v36 = vadd.f32 %v499_v63, %v403_v35  ;;  %v1008_v37 = vpop.f32.mrb[12].mxu0  ;;  %1183 = vtanh.f32 %v497_v34 }
 0x10e   :  { %v1009_v38 = vpop.f32.mrb[13].mxu0 }
 0x10f   :  { %1185 = vtanh.f32 %v500_v36  ;;  %v1010_v39 = vadd.f32 %v1009_v38, %v1008_v37  ;;  %v1011_v40 = vpop.f32.mrb[14].mxu0  ;;  %v1180_v41 = vpop.eup %1179 }
 0x110   :  { %v1012_v42 = vpop.f32.mrb[15].mxu0 }
 0x111   :  { %v1182_v43 = vpop.eup %1181  ;;  %v408_v44 = vadd.f32 %v1010_v39, %v1432_v59  ;;  %v1013_v45 = vadd.f32 %v1012_v42, %v1011_v40 }
 0x112   :  { %v560_v46 = vpack.c.bf16 %v1182_v43, %v1180_v41 }
 0x113   :  { %v505_v47 = vadd.f32 %v1427_v55, %v408_v44  ;;  %v411_v48 = vadd.f32 %v1013_v45, %v1432_v59 }
 0x114   :  { %1101 = vmatmul.mubr.bf16.vlgmr.msra.gmra.mrb[16].mxu1 %v560_v46 }
 0x115   :  { %v508_v49 = vadd.f32 %v1075_v60, %v411_v48  ;;  %v1014_v50 = vpop.f32.mrb[16].mxu0  ;;  %1187 = vtanh.f32 %v505_v47  ;;  %v1472_v47 = vld [vmem:[%s1518_s4] ss:$0 sm:$0xff] }
 0x116   :  { %v1015_v51 = vpop.f32.mrb[17].mxu0 }
 0x117   :  { %1189 = vtanh.f32 %v508_v49  ;;  %v1016_v52 = vadd.f32 %v1015_v51, %v1014_v50  ;;  %v1017_v53 = vpop.f32.mrb[18].mxu0  ;;  %v1184_v54 = vpop.eup %1183 }
 0x118   :  { %v1018_v56 = vpop.f32.mrb[19].mxu0 }
 0x119   :  { %v1186_v57 = vpop.eup %1185  ;;  %v1019_v58 = vadd.f32 %v1018_v56, %v1017_v53  ;;  %v416_v61 = vadd.f32 %v1016_v52, %v1432_v59 }
 0x11a   :  { %v561_v62 = vpack.c.bf16 %v1186_v57, %v1184_v54 }
 0x11b   :  { %v513_v63 = vadd.f32 %v512_v8, %v416_v61  ;;  %v419_v55 = vadd.f32 %v1019_v58, %v1432_v59 }
 0x11c   :  { %1104 = vmatprep.mubr.bf16.mxu1 %v561_v62 }
 0x11d   :  { %v516_v0 = vadd.f32 %v515_v13, %v419_v55  ;;  %v1020_v1 = vpop.f32.mrb[20].mxu0  ;;  %1191 = vtanh.f32 %v513_v63 }
 0x11e   :  { %v1021_v60 = vpop.f32.mrb[21].mxu0 }
 0x11f   :  { %1193 = vtanh.f32 %v516_v0  ;;  %v1022_v2 = vadd.f32 %v1021_v60, %v1020_v1  ;;  %v1023_v3 = vpop.f32.mrb[22].mxu0  ;;  %v1188_v4 = vpop.eup %1187 }
 0x120   :  { %v1024_v6 = vpop.f32.mrb[23].mxu0 }
 0x121   :  { %v1190_v7 = vpop.eup %1189  ;;  %v424_v9 = vadd.f32 %v1022_v2, %v1432_v59  ;;  %v1025_v11 = vadd.f32 %v1024_v6, %v1023_v3 }
 0x122   :  { %v562_v12 = vpack.c.bf16 %v1190_v7, %v1188_v4 }
 0x123   :  { %v521_v14 = vadd.f32 %v1436_v5, %v424_v9  ;;  %v427_v8 = vadd.f32 %v1025_v11, %v1432_v59 }
 0x124   :  { %1105 = vmatmul.mubr.bf16.gmra.mrb[20].mxu1 %v562_v12 }
 0x125   :  { %v524_v13 = vadd.f32 %v1438_v10, %v427_v8  ;;  %v1026_v15 = vpop.f32.mrb[24].mxu0  ;;  %1195 = vtanh.f32 %v521_v14 }
 0x126   :  { %v1027_v16 = vpop.f32.mrb[25].mxu0 }
 0x127   :  { %1197 = vtanh.f32 %v524_v13  ;;  %v1028_v17 = vadd.f32 %v1027_v16, %v1026_v15  ;;  %v1029_v18 = vpop.f32.mrb[26].mxu0  ;;  %v1192_v20 = vpop.eup %1191 }
 0x128   :  { %v1030_v21 = vpop.f32.mrb[27].mxu0 }
 0x129   :  { %v1194_v23 = vpop.eup %1193  ;;  %v1031_v25 = vadd.f32 %v1030_v21, %v1029_v18  ;;  %v432_v26 = vadd.f32 %v1028_v17, %v1432_v59 }
 0x12a   :  { %v563_v28 = vpack.c.bf16 %v1194_v23, %v1192_v20 }
 0x12b   :  { %v529_v5 = vadd.f32 %v1444_v22, %v432_v26  ;;  %v435_v29 = vadd.f32 %v1031_v25, %v1432_v59 }
 0x12c   :  { %1108 = vmatprep.mubr.bf16.mxu1 %v563_v28 }
 0x12d   :  { %v532_v10 = vadd.f32 %v1448_v27, %v435_v29  ;;  %v1032_v30 = vpop.f32.mrb[28].mxu0  ;;  %1199 = vtanh.f32 %v529_v5 }
 0x12e   :  { %v1033_v31 = vpop.f32.mrb[29].mxu0 }
 0x12f   :  { %1201 = vtanh.f32 %v532_v10  ;;  %v1034_v32 = vadd.f32 %v1033_v31, %v1032_v30  ;;  %v1035_v33 = vpop.f32.mrb[30].mxu0  ;;  %v1196_v34 = vpop.eup %1195 }
 0x130   :  { %v1036_v35 = vpop.f32.mrb[31].mxu0 }
 0x131   :  { %v1198_v36 = vpop.eup %1197  ;;  %v440_v37 = vadd.f32 %v1034_v32, %v1432_v59  ;;  %v1037_v38 = vadd.f32 %v1036_v35, %v1035_v33 }
 0x132   :  { %v564_v39 = vpack.c.bf16 %v1198_v36, %v1196_v34 }
 0x133   :  { %v537_v22 = vadd.f32 %v1442_v19, %v440_v37  ;;  %v443_v40 = vadd.f32 %v1037_v38, %v1432_v59 }
 0x134   :  { %1109 = vmatmul.mubr.bf16.gmra.mrb[24].mxu1 %v564_v39 }
 0x135   :  { %v540_v27 = vadd.f32 %v1446_v24, %v443_v40  ;;  %1203 = vtanh.f32 %v537_v22 }
 0x137   :  { %1205 = vtanh.f32 %v540_v27  ;;  %v1200_v41 = vpop.eup %1199 }
 0x139   :  { %v1202_v42 = vpop.eup %1201 }
 0x13a   :  { %v565_v43 = vpack.c.bf16 %v1202_v42, %v1200_v41 }
 0x13c   :  { %1112 = vmatprep.mubr.bf16.mxu1 %v565_v43 }
 0x13f   :  { %v1204_v44 = vpop.eup %1203 }
 0x141   :  { %v1206_v45 = vpop.eup %1205 }
 0x142   :  { %v566_v46 = vpack.c.bf16 %v1206_v45, %v1204_v44 }
 0x144   :  { %1113 = vmatmul.mubr.bf16.gmra.mrb[28].mxu1 %v566_v46 }
 0x1e7   :  { %v1102_v19 = vpop.f32.mrb[16].mxu1 }
 0x1e8   :  { %v681_v59 = vadd.f32 %v1102_v19, %v1472_v47  ;;  %v672_v48 = vpop.f32.mrb[17].mxu1 }
 0x1e9   :  { %v673_v24 = vadd.f32 %v1472_v47, %v672_v48  ;;  %v1103_v49 = vpop.f32.mrb[18].mxu1 }
 0x1ea   :  { %1207 = vtanh.f32 %v681_v59  ;;  %v684_v50 = vadd.f32 %v1103_v49, %v1472_v47  ;;  %v675_v51 = vpop.f32.mrb[19].mxu1 }
 0x1eb   :  { %1209 = vtanh.f32 %v673_v24  ;;  %v676_v52 = vadd.f32 %v1472_v47, %v675_v51 }
 0x1ec   :  { %1211 = vtanh.f32 %v684_v50 }
 0x1ed   :  { %1213 = vtanh.f32 %v676_v52 }
 0x1f4   :  { %v1208_v53 = vpop.eup %1207 }
 0x1f5   :  { %v1210_v54 = vpop.eup %1209 }
 0x1f6   :  { %v1212_v56 = vpop.eup %1211 }
 0x1f7   :  { %v1214_v57 = vpop.eup %1213  ;;  %v935_v58 = vpack.c.bf16 %v1212_v56, %v1208_v53  ;;  %v1106_v61 = vpop.f32.mrb[20].mxu1 }
 0x1f8   :  { %v930_v62 = vpack.c.bf16 %v1214_v57, %v1210_v54  ;;  %v697_v63 = vadd.f32 %v1106_v61, %v1472_v47  ;;  %v688_v55 = vpop.f32.mrb[21].mxu1 }
 0x1f9   :  { %967 = vst [vmem:[%s1519_s5 + $0x8] sm:$0xff] %v935_v58   ;;  %v689_v0 = vadd.f32 %v1472_v47, %v688_v55  ;;  %v1107_v1 = vpop.f32.mrb[22].mxu1 }
 0x1fa   :  { %931 = vst [vmem:[%s1519_s5] sm:$0xff] %v930_v62   ;;  %1215 = vtanh.f32 %v697_v63  ;;  %v700_v60 = vadd.f32 %v1107_v1, %v1472_v47  ;;  %v691_v2 = vpop.f32.mrb[23].mxu1 }
 0x1fb   :  { %1217 = vtanh.f32 %v689_v0  ;;  %v692_v3 = vadd.f32 %v1472_v47, %v691_v2 }
 0x1fc   :  { %1219 = vtanh.f32 %v700_v60 }
 0x1fd   :  { %1221 = vtanh.f32 %v692_v3 }
 0x204   :  { %v1216_v4 = vpop.eup %1215 }
 0x205   :  { %v1218_v6 = vpop.eup %1217 }
 0x206   :  { %v1220_v7 = vpop.eup %1219 }
 0x207   :  { %v1222_v9 = vpop.eup %1221  ;;  %v945_v11 = vpack.c.bf16 %v1220_v7, %v1216_v4  ;;  %v1110_v12 = vpop.f32.mrb[24].mxu1 }
 0x208   :  { %v940_v14 = vpack.c.bf16 %v1222_v9, %v1218_v6  ;;  %v713_v8 = vadd.f32 %v1110_v12, %v1472_v47  ;;  %v704_v13 = vpop.f32.mrb[25].mxu1 }
 0x209   :  { %969 = vst [vmem:[%s1519_s5 + $0x18] sm:$0xff] %v945_v11   ;;  %v705_v15 = vadd.f32 %v1472_v47, %v704_v13  ;;  %v1111_v16 = vpop.f32.mrb[26].mxu1 }
 0x20a   :  { %968 = vst [vmem:[%s1519_s5 + $0x10] sm:$0xff] %v940_v14   ;;  %1223 = vtanh.f32 %v713_v8  ;;  %v716_v17 = vadd.f32 %v1111_v16, %v1472_v47  ;;  %v707_v18 = vpop.f32.mrb[27].mxu1 }
 0x20b   :  { %1225 = vtanh.f32 %v705_v15  ;;  %v708_v20 = vadd.f32 %v1472_v47, %v707_v18 }
 0x20c   :  { %1227 = vtanh.f32 %v716_v17 }
 0x20d   :  { %1229 = vtanh.f32 %v708_v20 }
 0x214   :  { %v1224_v21 = vpop.eup %1223 }
 0x215   :  { %v1226_v23 = vpop.eup %1225 }
 0x216   :  { %v1228_v25 = vpop.eup %1227 }
 0x217   :  { %v1230_v26 = vpop.eup %1229  ;;  %v955_v28 = vpack.c.bf16 %v1228_v25, %v1224_v21  ;;  %v1114_v5 = vpop.f32.mrb[28].mxu1 }
 0x218   :  { %v950_v29 = vpack.c.bf16 %v1230_v26, %v1226_v23  ;;  %v729_v10 = vadd.f32 %v1114_v5, %v1472_v47  ;;  %v720_v30 = vpop.f32.mrb[29].mxu1 }
 0x219   :  { %971 = vst [vmem:[%s1519_s5 + $0x28] sm:$0xff] %v955_v28   ;;  %v721_v31 = vadd.f32 %v1472_v47, %v720_v30  ;;  %v1115_v32 = vpop.f32.mrb[30].mxu1 }
 0x21a   :  { %970 = vst [vmem:[%s1519_s5 + $0x20] sm:$0xff] %v950_v29   ;;  %1231 = vtanh.f32 %v729_v10  ;;  %v732_v33 = vadd.f32 %v1115_v32, %v1472_v47  ;;  %v723_v34 = vpop.f32.mrb[31].mxu1 }
 0x21b   :  { %1233 = vtanh.f32 %v721_v31  ;;  %v724_v35 = vadd.f32 %v1472_v47, %v723_v34 }
 0x21c   :  { %1235 = vtanh.f32 %v732_v33 }
 0x21d   :  { %1237 = vtanh.f32 %v724_v35 }
 0x224   :  { %v1232_v36 = vpop.eup %1231 }
 0x225   :  { %v1234_v37 = vpop.eup %1233 }
 0x226   :  { %v1236_v38 = vpop.eup %1235 }
 0x227   :  { %v1238_v39 = vpop.eup %1237  ;;  %v965_v22 = vpack.c.bf16 %v1236_v38, %v1232_v36 }
 0x228   :  { %v960_v40 = vpack.c.bf16 %v1238_v39, %v1234_v37 }
 0x229   :  { %973 = vst [vmem:[%s1519_s5 + $0x38] sm:$0xff] %v965_v22  }
 0x22a   :  { %972 = vst [vmem:[%s1519_s5 + $0x30] sm:$0xff] %v960_v40  }

// kernel: mpnn_forward.27
= control target key start
LH: loop header
LB: loop body
LE: loop exit
PB: predicated region body
PF: predicated region fallthrough
CT: control target
= control target key end

     0   :  { %s799_s1 = inlined_call_operand.vmem [shape: bf16[128,128], index: 1, kind: input, shape index: {}]   ;;  %s800_s0 = inlined_call_operand.vmem [shape: bf16[128,128], index: 0, kind: input, shape index: {}]   ;;  %s801_s3 = inlined_call_operand.vmem [shape: bf16[128,128], index: 3, kind: input, shape index: {}]   ;;  %s802_s2 = inlined_call_operand.vmem [shape: f32[1,128], index: 2, kind: input, shape index: {}]   ;;  %s803_s4 = inlined_call_operand.vmem [shape: f32[1,128], index: 4, kind: input, shape index: {}]   ;;  %s804_s5 = inlined_call_operand.vmem [shape: f32[128,128], index: 5, kind: output, shape index: {}]  }
   0x1   :  { %v587_v0 = vld [vmem:[%s799_s1] sm:$0xff]   ;;  %v588_v1 = vld [vmem:[%s799_s1 + $0x8] sm:$0xff]   ;;  %v589_v2 = vld [vmem:[%s799_s1 + $0x10] sm:$0xff]  }
   0x2   :  { %523 = vmatprep.subr.bf16.mxu0 %v587_v0  ;;  %v590_v3 = vld [vmem:[%s799_s1 + $0x18] sm:$0xff]   ;;  %v595_v4 = vld [vmem:[%s800_s0] sm:$0xff]   ;;  %v592_v6 = vld [vmem:[%s799_s1 + $0x28] sm:$0xff]  }
   0x3   :  { %524 = vmatpush3.bf16.msra.mxu0 %v587_v0  ;;  %539 = vmatprep.mubr.bf16.mxu0 %v595_v4  ;;  %v591_v5 = vld [vmem:[%s799_s1 + $0x20] sm:$0xff]   ;;  %v604_v8 = vld [vmem:[%s801_s3 + $0x8] sm:$0xff]   ;;  %v593_v9 = vld [vmem:[%s799_s1 + $0x30] sm:$0xff]  }
   0x4   :  { %525 = vmatprep.subr.bf16.mxu0 %v588_v1  ;;  %v603_v7 = vld [vmem:[%s801_s3] sm:$0xff]   ;;  %v605_v10 = vld [vmem:[%s801_s3 + $0x10] sm:$0xff]   ;;  %v594_v11 = vld [vmem:[%s799_s1 + $0x38] sm:$0xff]  }
   0x5   :  { %555 = vmatprep.subr.bf16.mxu1 %v603_v7  ;;  %v596_v12 = vld [vmem:[%s800_s0 + $0x8] sm:$0xff]   ;;  %v597_v13 = vld [vmem:[%s800_s0 + $0x10] sm:$0xff]   ;;  %v598_v14 = vld [vmem:[%s800_s0 + $0x18] sm:$0xff]  }
   0x6   :  { %556 = vmatpush3.bf16.msra.mxu1 %v603_v7  ;;  %v599_v15 = vld [vmem:[%s800_s0 + $0x20] sm:$0xff]   ;;  %v600_v16 = vld [vmem:[%s800_s0 + $0x28] sm:$0xff]   ;;  %v601_v17 = vld [vmem:[%s800_s0 + $0x30] sm:$0xff]  }
   0x7   :  { %526 = vmatpush3.bf16.msra.mxu0 %v588_v1  ;;  %557 = vmatprep.subr.bf16.mxu1 %v604_v8  ;;  %v602_v18 = vld [vmem:[%s800_s0 + $0x38] sm:$0xff]   ;;  %v607_v20 = vld [vmem:[%s801_s3 + $0x20] sm:$0xff]   ;;  %v608_v21 = vld [vmem:[%s801_s3 + $0x28] sm:$0xff]  }
   0x8   :  { %527 = vmatprep.subr.bf16.mxu0 %v589_v2  ;;  %v606_v19 = vld [vmem:[%s801_s3 + $0x18] sm:$0xff]   ;;  %v609_v22 = vld [vmem:[%s801_s3 + $0x30] sm:$0xff]   ;;  %v465_v24 = vld [vmem:[%s802_s2] ss:$0 sm:$0xff] }
   0x9   :  { %v610_v23 = vld [vmem:[%s801_s3 + $0x38] sm:$0xff]  }
   0xa   :  { %558 = vmatpush3.bf16.msra.mxu1 %v604_v8 }
   0xb   :  { %528 = vmatpush3.bf16.msra.mxu0 %v589_v2  ;;  %559 = vmatprep.subr.bf16.mxu1 %v605_v10 }
   0xc   :  { %529 = vmatprep.subr.bf16.mxu0 %v590_v3 }
   0xe   :  { %560 = vmatpush3.bf16.msra.mxu1 %v605_v10 }
   0xf   :  { %530 = vmatpush3.bf16.msra.mxu0 %v590_v3  ;;  %561 = vmatprep.subr.bf16.mxu1 %v606_v19 }
  0x10   :  { %531 = vmatprep.subr.bf16.mxu0 %v591_v5 }
  0x12   :  { %562 = vmatpush3.bf16.msra.mxu1 %v606_v19 }
  0x13   :  { %532 = vmatpush3.bf16.msra.mxu0 %v591_v5  ;;  %563 = vmatprep.subr.bf16.mxu1 %v607_v20 }
  0x14   :  { %533 = vmatprep.subr.bf16.mxu0 %v592_v6 }
  0x16   :  { %564 = vmatpush3.bf16.msra.mxu1 %v607_v20 }
  0x17   :  { %534 = vmatpush3.bf16.msra.mxu0 %v592_v6  ;;  %565 = vmatprep.subr.bf16.mxu1 %v608_v21 }
  0x18   :  { %535 = vmatprep.subr.bf16.mxu0 %v593_v9 }
  0x1a   :  { %566 = vmatpush3.bf16.msra.mxu1 %v608_v21 }
  0x1b   :  { %536 = vmatpush3.bf16.msra.mxu0 %v593_v9  ;;  %567 = vmatprep.subr.bf16.mxu1 %v609_v22 }
  0x1c   :  { %537 = vmatprep.subr.bf16.mxu0 %v594_v11 }
  0x1e   :  { %568 = vmatpush3.bf16.msra.mxu1 %v609_v22 }
  0x1f   :  { %538 = vmatpush3.bf16.msra.mxu0 %v594_v11  ;;  %569 = vmatprep.subr.bf16.mxu1 %v610_v23 }
  0x22   :  { %540 = vmatmul.mubr.bf16.vlgmr.msra.gmra.mrb[0].mxu0 %v596_v12  ;;  %570 = vmatpush3.bf16.msra.mxu1 %v610_v23 }
  0x23   :  { %543 = vmatprep.mubr.bf16.mxu0 %v597_v13 }
  0x2a   :  { %544 = vmatmul.mubr.bf16.gmra.mrb[4].mxu0 %v598_v14 }
  0x2b   :  { %547 = vmatprep.mubr.bf16.mxu0 %v599_v15 }
  0x32   :  { %548 = vmatmul.mubr.bf16.gmra.mrb[8].mxu0 %v600_v16 }
  0x33   :  { %551 = vmatprep.mubr.bf16.mxu0 %v601_v17  ;;  %v482_v17 = vld [vmem:[%s803_s4] ss:$0 sm:$0xff] }
  0x3a   :  { %552 = vmatmul.mubr.bf16.gmra.mrb[12].mxu0 %v602_v18 }
  0xf5   :  { %v541_v25 = vpop.f32.mrb[0].mxu0 }
  0xf6   :  { %v199_v26 = vadd.f32 %v541_v25, %v465_v24  ;;  %v190_v27 = vpop.f32.mrb[1].mxu0 }
  0xf7   :  { %v191_v28 = vadd.f32 %v465_v24, %v190_v27  ;;  %v542_v29 = vpop.f32.mrb[2].mxu0 }
  0xf8   :  { %611 = vtanh.f32 %v199_v26  ;;  %v202_v30 = vadd.f32 %v542_v29, %v465_v24  ;;  %v193_v31 = vpop.f32.mrb[3].mxu0 }
  0xf9   :  { %613 = vtanh.f32 %v191_v28  ;;  %v194_v32 = vadd.f32 %v465_v24, %v193_v31 }
  0xfa   :  { %615 = vtanh.f32 %v202_v30 }
  0xfb   :  { %617 = vtanh.f32 %v194_v32 }
  0xfd   :  { %v545_v33 = vpop.f32.mrb[4].mxu0 }
  0xfe   :  { %v215_v34 = vadd.f32 %v545_v33, %v465_v24  ;;  %v206_v35 = vpop.f32.mrb[5].mxu0 }
  0xff   :  { %v207_v36 = vadd.f32 %v465_v24, %v206_v35  ;;  %v546_v37 = vpop.f32.mrb[6].mxu0 }
 0x100   :  { %619 = vtanh.f32 %v215_v34  ;;  %v218_v38 = vadd.f32 %v546_v37, %v465_v24  ;;  %v209_v39 = vpop.f32.mrb[7].mxu0 }
 0x101   :  { %621 = vtanh.f32 %v207_v36  ;;  %v210_v40 = vadd.f32 %v465_v24, %v209_v39 }
 0x102   :  { %v612_v41 = vpop.eup %611  ;;  %623 = vtanh.f32 %v218_v38 }
 0x103   :  { %v614_v42 = vpop.eup %613  ;;  %625 = vtanh.f32 %v210_v40 }
 0x104   :  { %v616_v43 = vpop.eup %615 }
 0x105   :  { %v618_v44 = vpop.eup %617  ;;  %v549_v45 = vpop.f32.mrb[8].mxu0  ;;  %v270_v46 = vpack.c.bf16 %v616_v43, %v612_v41 }
 0x106   :  { %v231_v47 = vadd.f32 %v549_v45, %v465_v24  ;;  %v222_v48 = vpop.f32.mrb[9].mxu0  ;;  %v269_v49 = vpack.c.bf16 %v618_v44, %v614_v42 }
 0x107   :  { %v223_v50 = vadd.f32 %v465_v24, %v222_v48  ;;  %v550_v51 = vpop.f32.mrb[10].mxu0 }
 0x108   :  { %627 = vtanh.f32 %v231_v47  ;;  %v234_v52 = vadd.f32 %v550_v51, %v465_v24  ;;  %v225_v53 = vpop.f32.mrb[11].mxu0  ;;  %571 = vmatprep.mubr.bf16.mxu1 %v269_v49 }
 0x109   :  { %629 = vtanh.f32 %v223_v50  ;;  %v226_v54 = vadd.f32 %v465_v24, %v225_v53  ;;  %572 = vmatmul.mubr.bf16.vlgmr.msra.gmra.mrb[0].mxu1 %v270_v46 }
 0x10a   :  { %v620_v55 = vpop.eup %619  ;;  %631 = vtanh.f32 %v234_v52 }
 0x10b   :  { %v622_v56 = vpop.eup %621  ;;  %633 = vtanh.f32 %v226_v54 }
 0x10c   :  { %v624_v57 = vpop.eup %623 }
 0x10d   :  { %v626_v58 = vpop.eup %625  ;;  %v553_v59 = vpop.f32.mrb[12].mxu0  ;;  %v272_v60 = vpack.c.bf16 %v624_v57, %v620_v55 }
 0x10e   :  { %v247_v61 = vadd.f32 %v553_v59, %v465_v24  ;;  %v238_v62 = vpop.f32.mrb[13].mxu0  ;;  %v271_v63 = vpack.c.bf16 %v626_v58, %v622_v56 }
 0x10f   :  { %v239_v0 = vadd.f32 %v465_v24, %v238_v62  ;;  %v554_v1 = vpop.f32.mrb[14].mxu0 }
 0x110   :  { %635 = vtanh.f32 %v247_v61  ;;  %v250_v2 = vadd.f32 %v554_v1, %v465_v24  ;;  %v241_v3 = vpop.f32.mrb[15].mxu0  ;;  %575 = vmatprep.mubr.bf16.mxu1 %v271_v63 }
 0x111   :  { %637 = vtanh.f32 %v239_v0  ;;  %v242_v4 = vadd.f32 %v465_v24, %v241_v3  ;;  %576 = vmatmul.mubr.bf16.gmra.mrb[4].mxu1 %v272_v60 }
 0x112   :  { %v628_v5 = vpop.eup %627  ;;  %639 = vtanh.f32 %v250_v2 }
 0x113   :  { %v630_v6 = vpop.eup %629  ;;  %641 = vtanh.f32 %v242_v4 }
 0x114   :  { %v632_v7 = vpop.eup %631 }
 0x115   :  { %v634_v8 = vpop.eup %633  ;;  %v274_v9 = vpack.c.bf16 %v632_v7, %v628_v5 }
 0x116   :  { %v273_v10 = vpack.c.bf16 %v634_v8, %v630_v6 }
 0x118   :  { %579 = vmatprep.mubr.bf16.mxu1 %v273_v10 }
 0x119   :  { %580 = vmatmul.mubr.bf16.gmra.mrb[8].mxu1 %v274_v9 }
 0x11a   :  { %v636_v11 = vpop.eup %635 }
 0x11b   :  { %v638_v12 = vpop.eup %637 }
 0x11c   :  { %v640_v13 = vpop.eup %639 }
 0x11d   :  { %v642_v14 = vpop.eup %641  ;;  %v276_v15 = vpack.c.bf16 %v640_v13, %v636_v11 }
 0x11e   :  { %v275_v16 = vpack.c.bf16 %v642_v14, %v638_v12 }
 0x120   :  { %583 = vmatprep.mubr.bf16.mxu1 %v275_v16 }
 0x121   :  { %584 = vmatmul.mubr.bf16.gmra.mrb[12].mxu1 %v276_v15 }
 0x1dc   :  { %v573_v18 = vpop.f32.mrb[0].mxu1 }
 0x1dd   :  { %v391_v19 = vadd.f32 %v573_v18, %v482_v17  ;;  %v382_v20 = vpop.f32.mrb[1].mxu1 }
 0x1de   :  { %v383_v21 = vadd.f32 %v482_v17, %v382_v20  ;;  %v574_v22 = vpop.f32.mrb[2].mxu1 }
 0x1df   :  { %447 = vst [vmem:[%s804_s5 + $0x10] sm:$0xff] %v391_v19  ;;  %v394_v23 = vadd.f32 %v574_v22, %v482_v17  ;;  %v385_v24 = vpop.f32.mrb[3].mxu1 }
 0x1e0   :  { %445 = vst [vmem:[%s804_s5] sm:$0xff] %v383_v21  ;;  %v386_v25 = vadd.f32 %v482_v17, %v385_v24 }
 0x1e1   :  { %448 = vst [vmem:[%s804_s5 + $0x18] sm:$0xff] %v394_v23 }
 0x1e2   :  { %446 = vst [vmem:[%s804_s5 + $0x8] sm:$0xff] %v386_v25 }
 0x1e4   :  { %v577_v26 = vpop.f32.mrb[4].mxu1 }
 0x1e5   :  { %v407_v27 = vadd.f32 %v577_v26, %v482_v17  ;;  %v398_v28 = vpop.f32.mrb[5].mxu1 }
 0x1e6   :  { %v399_v29 = vadd.f32 %v482_v17, %v398_v28  ;;  %v578_v30 = vpop.f32.mrb[6].mxu1 }
 0x1e7   :  { %451 = vst [vmem:[%s804_s5 + $0x30] sm:$0xff] %v407_v27  ;;  %v410_v31 = vadd.f32 %v578_v30, %v482_v17  ;;  %v401_v32 = vpop.f32.mrb[7].mxu1 }
 0x1e8   :  { %449 = vst [vmem:[%s804_s5 + $0x20] sm:$0xff] %v399_v29  ;;  %v402_v33 = vadd.f32 %v482_v17, %v401_v32 }
 0x1e9   :  { %452 = vst [vmem:[%s804_s5 + $0x38] sm:$0xff] %v410_v31 }
 0x1ea   :  { %450 = vst [vmem:[%s804_s5 + $0x28] sm:$0xff] %v402_v33 }
 0x1ec   :  { %v581_v34 = vpop.f32.mrb[8].mxu1 }
 0x1ed   :  { %v423_v35 = vadd.f32 %v581_v34, %v482_v17  ;;  %v414_v36 = vpop.f32.mrb[9].mxu1 }
 0x1ee   :  { %v415_v37 = vadd.f32 %v482_v17, %v414_v36  ;;  %v582_v38 = vpop.f32.mrb[10].mxu1 }
 0x1ef   :  { %455 = vst [vmem:[%s804_s5 + $0x50] sm:$0xff] %v423_v35  ;;  %v426_v39 = vadd.f32 %v582_v38, %v482_v17  ;;  %v417_v40 = vpop.f32.mrb[11].mxu1 }
 0x1f0   :  { %453 = vst [vmem:[%s804_s5 + $0x40] sm:$0xff] %v415_v37  ;;  %v418_v41 = vadd.f32 %v482_v17, %v417_v40 }
 0x1f1   :  { %456 = vst [vmem:[%s804_s5 + $0x58] sm:$0xff] %v426_v39 }
 0x1f2   :  { %454 = vst [vmem:[%s804_s5 + $0x48] sm:$0xff] %v418_v41 }
 0x1f4   :  { %v585_v42 = vpop.f32.mrb[12].mxu1 }
 0x1f5   :  { %v439_v43 = vadd.f32 %v585_v42, %v482_v17  ;;  %v430_v44 = vpop.f32.mrb[13].mxu1 }
 0x1f6   :  { %v431_v45 = vadd.f32 %v482_v17, %v430_v44  ;;  %v586_v46 = vpop.f32.mrb[14].mxu1 }
 0x1f7   :  { %459 = vst [vmem:[%s804_s5 + $0x70] sm:$0xff] %v439_v43  ;;  %v442_v47 = vadd.f32 %v586_v46, %v482_v17  ;;  %v433_v48 = vpop.f32.mrb[15].mxu1 }
 0x1f8   :  { %457 = vst [vmem:[%s804_s5 + $0x60] sm:$0xff] %v431_v45  ;;  %v434_v49 = vadd.f32 %v482_v17, %v433_v48 }
 0x1f9   :  { %460 = vst [vmem:[%s804_s5 + $0x78] sm:$0xff] %v442_v47 }
 0x1fa   :  { %458 = vst [vmem:[%s804_s5 + $0x68] sm:$0xff] %v434_v49 }

</bundles_post_ra>
